<compile_context>
chip_gen: v6e
topology: v6e:2x2x1
jax: 0.10.0
libtpu: 0.0.40
codegen_flags: <defaults>
</compile_context>

<pallas_src>
import functools
import math

import jax
import jax.numpy as jnp
from jax.experimental import pallas as pl
from jax.experimental.pallas import tpu as pltpu

EPS = 1e-5  # PyTorch LayerNorm default eps


def _layernorm(x, g, b):
    mu = jnp.mean(x, axis=-1, keepdims=True)
    var = jnp.mean((x - mu) ** 2, axis=-1, keepdims=True)
    return (x - mu) * jax.lax.rsqrt(var + EPS) * g + b


# ----------------------------------------------------------------------------
# Fused kernel: fc_in + pos + CLS + all transformer blocks + fc_out
# (single invocation, no grid; everything VMEM-resident)
# ----------------------------------------------------------------------------
def vit_fused_kernel(patches_ref, fc_in_w_ref, fc_in_b_ref, pos_ref, cls_ref,
                     fc_out_w_ref, fc_out_b_ref,
                     ln1_g_ref, ln1_b_ref, wqk_ref, bqk_ref, wvo_ref, bo_ref,
                     ln2_g_ref, ln2_b_ref, w1_ref, b1_ref, lnm_g_ref, lnm_b_ref,
                     w2_ref, b2_ref,
                     out_ref, asm_ref, *, batch, num_heads):
    B = batch
    nh = num_heads
    Lp, H = pos_ref.shape
    S = Lp + 1
    num_layers = ln1_g_ref.shape[0]

    # ---- patch embedding (whole batch in one matmul) + pos, CLS prepended ----
    emb = jnp.dot(patches_ref[...], fc_in_w_ref[...],
                  preferred_element_type=jnp.float32) + fc_in_b_ref[...]   # (B*Lp, H)
    pos = pos_ref[...]                                                      # (Lp, H)
    cls_row = cls_ref[...]                                                  # (1, H)
    for b in range(B):
        asm_ref[b * S:b * S + 1, :] = cls_row
        asm_ref[b * S + 1:(b + 1) * S, :] = emb[b * Lp:(b + 1) * Lp, :] + pos
    x = asm_ref[...]                                                        # (B*S, H)

    # ---- transformer blocks (fully unrolled; per-head weights folded offline) --
    for l in range(num_layers):
        # --- multi-head self-attention with folded QK / VO weights ---
        nx = _layernorm(x, ln1_g_ref[l], ln1_b_ref[l])                      # (B*S, H)
        qk = jnp.dot(nx, wqk_ref[l],
                     preferred_element_type=jnp.float32) + bqk_ref[l]       # (B*S, nh*H)
        vo = jnp.dot(nx, wvo_ref[l],
                     preferred_element_type=jnp.float32)                    # (B*S, nh*H)

        for b in range(B):
            nx_b = nx[b * S:(b + 1) * S, :]                                 # (S, H)
            qk_b = qk[b * S:(b + 1) * S, :]
            vo_b = vo[b * S:(b + 1) * S, :]
            attn_b = None
            for h in range(nh):
                qkh = qk_b[:, h * H:(h + 1) * H]                            # (S, H)
                # scores = (nx Wqk_h + kbq_h) @ nx^T   (NT matmul, no transpose)
                s = jax.lax.dot_general(qkh, nx_b, (((1,), (1,)), ((), ())),
                                        preferred_element_type=jnp.float32)  # (S, S)
                s = s - jnp.max(s, axis=-1, keepdims=True)
                e = jnp.exp(s)
                p = e / jnp.sum(e, axis=-1, keepdims=True)
                # TODO(synk): attention dropout (p=0.1) omitted (eval-mode identity).
                contrib = jnp.dot(p, vo_b[:, h * H:(h + 1) * H],
                                  preferred_element_type=jnp.float32)        # (S, H)
                attn_b = contrib if attn_b is None else attn_b + contrib
            asm_ref[b * S:(b + 1) * S, :] = attn_b
        x = x + asm_ref[...] + bo_ref[l]      # bo_ref already includes folded value biases

        # --- MLP: Linear -> LayerNorm -> ELU -> Linear, residual (whole slab) ---
        nx2 = _layernorm(x, ln2_g_ref[l], ln2_b_ref[l])
        h1 = jnp.dot(nx2, w1_ref[l], preferred_element_type=jnp.float32) + b1_ref[l]
        h1 = _layernorm(h1, lnm_g_ref[l], lnm_b_ref[l])
        h1 = jnp.where(h1 > 0, h1, jnp.exp(jnp.minimum(h1, 0.0)) - 1.0)     # ELU(alpha=1)
        x = x + jnp.dot(h1, w2_ref[l], preferred_element_type=jnp.float32) + b2_ref[l]

    # ---- classification head on the CLS token (lane-padded output) ----
    for b in range(B):
        out_ref[b:b + 1, :] = (jnp.dot(x[b * S:b * S + 1, :], fc_out_w_ref[...],
                                       preferred_element_type=jnp.float32)
                               + fc_out_b_ref[...])


# ----------------------------------------------------------------------------
# Wrapper: one grid-less pallas_call for the whole forward pass
# ----------------------------------------------------------------------------
def extract_patches(image, patch_size):
    # image: (B, C, H, W) NCHW — matches torch.nn.Unfold(kernel=stride=p) ordering
    B, C, Himg, Wimg = image.shape
    ph, pw = Himg // patch_size, Wimg // patch_size
    x = image.reshape(B, C, ph, patch_size, pw, patch_size)
    x = x.transpose(0, 2, 4, 1, 3, 5)               # (B, ph, pw, C, p, p)
    return x.reshape(B, ph * pw, C * patch_size * patch_size)


def vit_forward(kparams, image, *, patch_size, num_heads, num_classes=15):
    patches = extract_patches(image, patch_size)     # (B, Lp, Dp)
    B, Lp, Dp = patches.shape
    H = kparams["fc_in_w"].shape[1]
    S = Lp + 1
    O_pad = kparams["fc_out_w"].shape[1]
    patches_flat = patches.reshape(B * Lp, Dp)

    kernel = functools.partial(vit_fused_kernel, batch=B, num_heads=num_heads)

    args = (patches_flat,
            kparams["fc_in_w"], kparams["fc_in_b"], kparams["pos"], kparams["cls"],
            kparams["fc_out_w"], kparams["fc_out_b"],
            kparams["ln1_g"], kparams["ln1_b"],
            kparams["wqk"], kparams["bqk"], kparams["wvo"], kparams["bo"],
            kparams["ln2_g"], kparams["ln2_b"],
            kparams["w1"], kparams["b1"], kparams["lnm_g"], kparams["lnm_b"],
            kparams["w2"], kparams["b2"])

    out_pad = pl.pallas_call(
        kernel,
        out_shape=jax.ShapeDtypeStruct((B, O_pad), jnp.float32),
        in_specs=[pl.BlockSpec(memory_space=pltpu.MemorySpace.VMEM)
                  for _ in range(len(args))],
        out_specs=pl.BlockSpec(memory_space=pltpu.MemorySpace.VMEM),
        scratch_shapes=[pltpu.VMEM((B * S, H), jnp.float32)],   # slab assembly scratch
    )(*args)
    return out_pad[:, :num_classes]


# ----------------------------------------------------------------------------
# Parameter init (PyTorch-layout) + one-time kernel-layout preparation
# ----------------------------------------------------------------------------
def init_params(key, channels_in, patch_size, hidden, num_layers, seq_len):
    Dp = channels_in * patch_size * patch_size
    keys = jax.random.split(key, 3 + num_layers)

    def linear(k, out_f, in_f):
        kw, kb = jax.random.split(k)
        bound = 1.0 / math.sqrt(in_f)
        w = jax.random.uniform(kw, (out_f, in_f), jnp.float32, -bound, bound)
        b = jax.random.uniform(kb, (out_f,), jnp.float32, -bound, bound)
        return w, b

    params = {}
    params["fc_in_w"], params["fc_in_b"] = linear(keys[0], hidden, Dp)
    params["fc_out_w"], params["fc_out_b"] = linear(keys[1], 15, hidden)
    params["pos"] = 0.001 * jax.random.normal(keys[2], (1, seq_len, hidden), jnp.float32)
    params["out_vec"] = jnp.zeros((1, 1, hidden), jnp.float32)

    layers = []
    for l in range(num_layers):
        ks = jax.random.split(keys[3 + l], 4)
        layer = {}
        layer["ln1_g"] = jnp.ones((hidden,), jnp.float32)
        layer["ln1_b"] = jnp.zeros((hidden,), jnp.float32)
        layer["wqkv"], layer["bqkv"] = linear(ks[0], 3 * hidden, hidden)   # in_proj
        layer["wo"], layer["bo"] = linear(ks[1], hidden, hidden)           # out_proj
        layer["ln2_g"] = jnp.ones((hidden,), jnp.float32)
        layer["ln2_b"] = jnp.zeros((hidden,), jnp.float32)
        layer["w1"], layer["b1"] = linear(ks[2], 2 * hidden, hidden)
        layer["lnm_g"] = jnp.ones((2 * hidden,), jnp.float32)
        layer["lnm_b"] = jnp.zeros((2 * hidden,), jnp.float32)
        layer["w2"], layer["b2"] = linear(ks[3], hidden, 2 * hidden)
        layers.append(layer)
    params["layers"] = layers
    return params


def prepare_params(params, num_heads, out_pad=128):
    """One-time conversion of PyTorch-layout params to kernel layout.

    Folds per-head Q/K and V/O weight pairs into (H, H) matrices (attention
    scale included), folds the q-bias into a folded-QK bias and the v-bias
    into the out-projection bias (softmax-row-constant terms drop exactly),
    stacks heads along columns, pre-transposes all Linear weights, pads the
    classifier to 128 lanes, and stacks everything per layer.
    """
    H = params["fc_in_w"].shape[0]
    nh = num_heads
    dh = H // nh
    scale = 1.0 / math.sqrt(dh)

    O = params["fc_out_w"].shape[0]
    fc_out_w = jnp.zeros((H, out_pad), jnp.float32).at[:, :O].set(params["fc_out_w"].T)
    fc_out_b = jnp.zeros((1, out_pad), jnp.float32).at[:, :O].set(
        params["fc_out_b"].reshape(1, O))

    kp = {
        "fc_in_w": params["fc_in_w"].T,               # (Dp, H)
        "fc_in_b": params["fc_in_b"].reshape(1, H),
        "pos": params["pos"][0],                       # (Lp, H)
        "cls": params["out_vec"][0],                   # (1, H)
        "fc_out_w": fc_out_w,                          # (H, 128) zero-padded
        "fc_out_b": fc_out_b,                          # (1, 128)
    }

    names = ["ln1_g", "ln1_b", "wqk", "bqk", "wvo", "bo",
             "ln2_g", "ln2_b", "w1", "b1", "lnm_g", "lnm_b", "w2", "b2"]
    acc = {k: [] for k in names}
    for layer in params["layers"]:
        Wq_t = layer["wqkv"][:H, :].T                  # (H_in, H_out)
        Wk_t = layer["wqkv"][H:2 * H, :].T
        Wv_t = layer["wqkv"][2 * H:, :].T
        bq = layer["bqkv"][:H]
        bv = layer["bqkv"][2 * H:]
        # bk only adds per-softmax-row constants -> drops exactly.
        Wo_t = layer["wo"].T                           # (H_in = concat heads, H_out)
        bo_eff = layer["bo"]

        wqk_h, bqk_h, wvo_h = [], [], []
        for h in range(nh):
            sl = slice(h * dh, (h + 1) * dh)
            Wq_hh, Wk_hh, Wv_hh = Wq_t[:, sl], Wk_t[:, sl], Wv_t[:, sl]
            Wo_hh = Wo_t[sl, :]                        # (dh, H)
            wqk_h.append(scale * (Wq_hh @ Wk_hh.T))    # (H, H)
            bqk_h.append(scale * (Wk_hh @ bq[sl]))     # (H,)
            wvo_h.append(Wv_hh @ Wo_hh)                # (H, H)
            bo_eff = bo_eff + bv[sl] @ Wo_hh           # value bias folds into out bias
        acc["wqk"].append(jnp.concatenate(wqk_h, axis=1))          # (H, nh*H)
        acc["bqk"].append(jnp.concatenate(bqk_h).reshape(1, nh * H))
        acc["wvo"].append(jnp.concatenate(wvo_h, axis=1))          # (H, nh*H)
        acc["bo"].append(bo_eff.reshape(1, H))
        acc["ln1_g"].append(layer["ln1_g"].reshape(1, H))
        acc["ln1_b"].append(layer["ln1_b"].reshape(1, H))
        acc["ln2_g"].append(layer["ln2_g"].reshape(1, H))
        acc["ln2_b"].append(layer["ln2_b"].reshape(1, H))
        acc["w1"].append(layer["w1"].T)                # (H, 2H)
        acc["b1"].append(layer["b1"].reshape(1, 2 * H))
        acc["lnm_g"].append(layer["lnm_g"].reshape(1, 2 * H))
        acc["lnm_b"].append(layer["lnm_b"].reshape(1, 2 * H))
        acc["w2"].append(layer["w2"].T)                # (2H, H)
        acc["b2"].append(layer["b2"].reshape(1, H))

    for k in names:
        kp[k] = jnp.stack(acc[k], axis=0)
    return kp


if __name__ == "__main__":
    # Config consistent with the module: ViT(image_size=16, channels_in=4,
    # patch_size=4, hidden_size=32, num_layers=2, num_heads=4)
    image_size, channels_in, patch_size = 16, 4, 4
    hidden, num_layers, num_heads = 32, 2, 4
    seq_len = (image_size // patch_size) ** 2          # 16 patch tokens (+1 CLS in-kernel)

    key = jax.random.PRNGKey(0)
    pkey, xkey = jax.random.split(key)
    params = init_params(pkey, channels_in, patch_size, hidden, num_layers, seq_len)
    kparams = prepare_params(params, num_heads)        # one-time layout prep + folding

    image = jax.random.normal(xkey, (2, channels_in, image_size, image_size), jnp.float32)

    fwd = jax.jit(functools.partial(vit_forward, patch_size=patch_size,
                                    num_heads=num_heads, num_classes=15))
    out = jax.block_until_ready(fwd(kparams, image))
    assert out.shape == (2, 15), out.shape
    print("KERNEL_OK")
</pallas_src>

<mosaic_0001>
module attributes {stable_mosaic.version = 11 : i64} {
  func.func @vit_fused_kernel(%arg0: memref<32x64xf32, #tpu.memory_space<vmem>>, %arg1: memref<64x32xf32, #tpu.memory_space<vmem>>, %arg2: memref<1x32xf32, #tpu.memory_space<vmem>>, %arg3: memref<16x32xf32, #tpu.memory_space<vmem>>, %arg4: memref<1x32xf32, #tpu.memory_space<vmem>>, %arg5: memref<32x128xf32, #tpu.memory_space<vmem>>, %arg6: memref<1x128xf32, #tpu.memory_space<vmem>>, %arg7: memref<2x1x32xf32, #tpu.memory_space<vmem>>, %arg8: memref<2x1x32xf32, #tpu.memory_space<vmem>>, %arg9: memref<2x32x128xf32, #tpu.memory_space<vmem>>, %arg10: memref<2x1x128xf32, #tpu.memory_space<vmem>>, %arg11: memref<2x32x128xf32, #tpu.memory_space<vmem>>, %arg12: memref<2x1x32xf32, #tpu.memory_space<vmem>>, %arg13: memref<2x1x32xf32, #tpu.memory_space<vmem>>, %arg14: memref<2x1x32xf32, #tpu.memory_space<vmem>>, %arg15: memref<2x32x64xf32, #tpu.memory_space<vmem>>, %arg16: memref<2x1x64xf32, #tpu.memory_space<vmem>>, %arg17: memref<2x1x64xf32, #tpu.memory_space<vmem>>, %arg18: memref<2x1x64xf32, #tpu.memory_space<vmem>>, %arg19: memref<2x64x32xf32, #tpu.memory_space<vmem>>, %arg20: memref<2x1x32xf32, #tpu.memory_space<vmem>>, %arg21: memref<2x128xf32, #tpu.memory_space<vmem>>, %arg22: memref<34x32xf32, #tpu.memory_space<vmem>>) attributes {dimension_semantics = [], scalar_prefetch = 0 : i64, scratch_operands = 1 : i64, tpu.core_type = #tpu.core_type<tc>} {
    %c0 = arith.constant 0 : index
    %c0_0 = arith.constant 0 : index
    %0 = vector.load %arg0[%c0, %c0_0] : memref<32x64xf32, #tpu.memory_space<vmem>>, vector<32x64xf32>
    %c0_1 = arith.constant 0 : index
    %c0_2 = arith.constant 0 : index
    %1 = vector.load %arg1[%c0_1, %c0_2] : memref<64x32xf32, #tpu.memory_space<vmem>>, vector<64x32xf32>
    %cst = arith.constant dense<0.000000e+00> : vector<32x32xf32>
    %2 = tpu.matmul %0, %1, %cst {dimension_numbers = #tpu.dot_dimension_numbers<[1], [0], [0], [1], [0, 0, 1, 1], [], []>} : vector<32x64xf32>, vector<64x32xf32>, vector<32x32xf32> -> vector<32x32xf32>
    %c0_3 = arith.constant 0 : index
    %c0_4 = arith.constant 0 : index
    %3 = vector.load %arg2[%c0_3, %c0_4] : memref<1x32xf32, #tpu.memory_space<vmem>>, vector<1x32xf32>
    %4 = vector.broadcast %3 : vector<1x32xf32> to vector<32x32xf32>
    %5 = arith.addf %2, %4 : vector<32x32xf32>
    %c0_5 = arith.constant 0 : index
    %c0_6 = arith.constant 0 : index
    %6 = vector.load %arg3[%c0_5, %c0_6] : memref<16x32xf32, #tpu.memory_space<vmem>>, vector<16x32xf32>
    %c0_7 = arith.constant 0 : index
    %c0_8 = arith.constant 0 : index
    %7 = vector.load %arg4[%c0_7, %c0_8] : memref<1x32xf32, #tpu.memory_space<vmem>>, vector<1x32xf32>
    %c0_9 = arith.constant 0 : index
    %c0_10 = arith.constant 0 : index
    %8 = vector.load %arg22[%c0_9, %c0_10] : memref<34x32xf32, #tpu.memory_space<vmem>>, vector<1x32xf32>
    tpu.vector_store %arg22[%c0_9, %c0_10], %7 {strides = array<i32>} : memref<34x32xf32, #tpu.memory_space<vmem>>, vector<1x32xf32>,
    %9 = vector.extract_strided_slice %5 {offsets = [0, 0], sizes = [16, 32], strides = [1, 1]} : vector<32x32xf32> to vector<16x32xf32>
    %10 = arith.addf %9, %6 : vector<16x32xf32>
    %c1 = arith.constant 1 : index
    %c0_11 = arith.constant 0 : index
    %11 = vector.load %arg22[%c1, %c0_11] : memref<34x32xf32, #tpu.memory_space<vmem>>, vector<16x32xf32>
    tpu.vector_store %arg22[%c1, %c0_11], %10 {strides = array<i32>} : memref<34x32xf32, #tpu.memory_space<vmem>>, vector<16x32xf32>,
    %c17 = arith.constant 17 : index
    %c0_12 = arith.constant 0 : index
    %12 = vector.load %arg22[%c17, %c0_12] : memref<34x32xf32, #tpu.memory_space<vmem>>, vector<1x32xf32>
    tpu.vector_store %arg22[%c17, %c0_12], %7 {strides = array<i32>} : memref<34x32xf32, #tpu.memory_space<vmem>>, vector<1x32xf32>,
    %13 = vector.extract_strided_slice %5 {offsets = [16, 0], sizes = [16, 32], strides = [1, 1]} : vector<32x32xf32> to vector<16x32xf32>
    %14 = arith.addf %13, %6 : vector<16x32xf32>
    %c18 = arith.constant 18 : index
    %c0_13 = arith.constant 0 : index
    %15 = vector.load %arg22[%c18, %c0_13] : memref<34x32xf32, #tpu.memory_space<vmem>>, vector<16x32xf32>
    tpu.vector_store %arg22[%c18, %c0_13], %14 {strides = array<i32>} : memref<34x32xf32, #tpu.memory_space<vmem>>, vector<16x32xf32>,
    %c0_14 = arith.constant 0 : index
    %c0_15 = arith.constant 0 : index
    %16 = vector.load %arg22[%c0_14, %c0_15] : memref<34x32xf32, #tpu.memory_space<vmem>>, vector<34x32xf32>
    %c0_16 = arith.constant 0 : index
    %c0_17 = arith.constant 0 : index
    %c0_18 = arith.constant 0 : index
    %17 = vector.load %arg7[%c0_16, %c0_17, %c0_18] : memref<2x1x32xf32, #tpu.memory_space<vmem>>, vector<1x1x32xf32>
    %18 = vector.shape_cast %17 : vector<1x1x32xf32> to vector<1x32xf32>
    %c0_19 = arith.constant 0 : index
    %c0_20 = arith.constant 0 : index
    %c0_21 = arith.constant 0 : index
    %19 = vector.load %arg8[%c0_19, %c0_20, %c0_21] : memref<2x1x32xf32, #tpu.memory_space<vmem>>, vector<1x1x32xf32>
    %20 = vector.shape_cast %19 : vector<1x1x32xf32> to vector<1x32xf32>
    %cst_22 = arith.constant dense<0.000000e+00> : vector<34xf32>
    %21 = vector.multi_reduction <add>, %16, %cst_22 [1] : vector<34x32xf32> to vector<34xf32>
    %22 = vector.shape_cast %21 : vector<34xf32> to vector<34x1xf32>
    %cst_23 = arith.constant 3.200000e+01 : f32
    %23 = vector.broadcast %cst_23 : f32 to vector<34x1xf32>
    %24 = arith.divf %22, %23 : vector<34x1xf32>
    %25 = vector.broadcast %24 : vector<34x1xf32> to vector<34x32xf32>
    %26 = arith.subf %16, %25 : vector<34x32xf32>
    %27 = arith.mulf %26, %26 : vector<34x32xf32>
    %cst_24 = arith.constant dense<0.000000e+00> : vector<34xf32>
    %28 = vector.multi_reduction <add>, %27, %cst_24 [1] : vector<34x32xf32> to vector<34xf32>
    %29 = vector.shape_cast %28 : vector<34xf32> to vector<34x1xf32>
    %cst_25 = arith.constant 3.200000e+01 : f32
    %30 = vector.broadcast %cst_25 : f32 to vector<34x1xf32>
    %31 = arith.divf %29, %30 : vector<34x1xf32>
    %32 = vector.broadcast %24 : vector<34x1xf32> to vector<34x32xf32>
    %33 = arith.subf %16, %32 : vector<34x32xf32>
    %cst_26 = arith.constant 9.99999974E-6 : f32
    %34 = vector.broadcast %cst_26 : f32 to vector<34x1xf32>
    %35 = arith.addf %31, %34 : vector<34x1xf32>
    %36 = math.rsqrt %35 : vector<34x1xf32>
    %37 = vector.broadcast %36 : vector<34x1xf32> to vector<34x32xf32>
    %38 = arith.mulf %33, %37 : vector<34x32xf32>
    %39 = vector.broadcast %18 : vector<1x32xf32> to vector<34x32xf32>
    %40 = arith.mulf %38, %39 : vector<34x32xf32>
    %41 = vector.broadcast %20 : vector<1x32xf32> to vector<34x32xf32>
    %42 = arith.addf %40, %41 : vector<34x32xf32>
    %c0_27 = arith.constant 0 : index
    %c0_28 = arith.constant 0 : index
    %c0_29 = arith.constant 0 : index
    %43 = vector.load %arg9[%c0_27, %c0_28, %c0_29] : memref<2x32x128xf32, #tpu.memory_space<vmem>>, vector<1x32x128xf32>
    %44 = vector.shape_cast %43 : vector<1x32x128xf32> to vector<32x128xf32>
    %cst_30 = arith.constant dense<0.000000e+00> : vector<34x128xf32>
    %45 = tpu.matmul %42, %44, %cst_30 {dimension_numbers = #tpu.dot_dimension_numbers<[1], [0], [0], [1], [0, 0, 1, 1], [], []>} : vector<34x32xf32>, vector<32x128xf32>, vector<34x128xf32> -> vector<34x128xf32>
    %c0_31 = arith.constant 0 : index
    %c0_32 = arith.constant 0 : index
    %c0_33 = arith.constant 0 : index
    %46 = vector.load %arg10[%c0_31, %c0_32, %c0_33] : memref<2x1x128xf32, #tpu.memory_space<vmem>>, vector<1x1x128xf32>
    %47 = vector.shape_cast %46 : vector<1x1x128xf32> to vector<1x128xf32>
    %48 = vector.broadcast %47 : vector<1x128xf32> to vector<34x128xf32>
    %49 = arith.addf %45, %48 : vector<34x128xf32>
    %c0_34 = arith.constant 0 : index
    %c0_35 = arith.constant 0 : index
    %c0_36 = arith.constant 0 : index
    %50 = vector.load %arg11[%c0_34, %c0_35, %c0_36] : memref<2x32x128xf32, #tpu.memory_space<vmem>>, vector<1x32x128xf32>
    %51 = vector.shape_cast %50 : vector<1x32x128xf32> to vector<32x128xf32>
    %cst_37 = arith.constant dense<0.000000e+00> : vector<34x128xf32>
    %52 = tpu.matmul %42, %51, %cst_37 {dimension_numbers = #tpu.dot_dimension_numbers<[1], [0], [0], [1], [0, 0, 1, 1], [], []>} : vector<34x32xf32>, vector<32x128xf32>, vector<34x128xf32> -> vector<34x128xf32>
    %53 = vector.extract_strided_slice %42 {offsets = [0, 0], sizes = [17, 32], strides = [1, 1]} : vector<34x32xf32> to vector<17x32xf32>
    %54 = vector.extract_strided_slice %49 {offsets = [0, 0], sizes = [17, 128], strides = [1, 1]} : vector<34x128xf32> to vector<17x128xf32>
    %55 = vector.extract_strided_slice %52 {offsets = [0, 0], sizes = [17, 128], strides = [1, 1]} : vector<34x128xf32> to vector<17x128xf32>
    %56 = vector.extract_strided_slice %54 {offsets = [0, 0], sizes = [17, 32], strides = [1, 1]} : vector<17x128xf32> to vector<17x32xf32>
    %cst_38 = arith.constant dense<0.000000e+00> : vector<17x17xf32>
    %57 = tpu.matmul %56, %53, %cst_38 {dimension_numbers = #tpu.dot_dimension_numbers<[1], [1], [0], [0], [0, 0, 1, 0], [], []>} : vector<17x32xf32>, vector<17x32xf32>, vector<17x17xf32> -> vector<17x17xf32>
    %cst_39 = arith.constant dense<0xFF800000> : vector<17xf32>
    %58 = vector.multi_reduction <maximumf>, %57, %cst_39 [1] : vector<17x17xf32> to vector<17xf32>
    %59 = vector.shape_cast %58 : vector<17xf32> to vector<17x1xf32>
    %60 = vector.broadcast %59 : vector<17x1xf32> to vector<17x17xf32>
    %61 = arith.subf %57, %60 : vector<17x17xf32>
    %62 = math.exp %61 : vector<17x17xf32>
    %cst_40 = arith.constant dense<0.000000e+00> : vector<17xf32>
    %63 = vector.multi_reduction <add>, %62, %cst_40 [1] : vector<17x17xf32> to vector<17xf32>
    %64 = vector.shape_cast %63 : vector<17xf32> to vector<17x1xf32>
    %65 = vector.broadcast %64 : vector<17x1xf32> to vector<17x17xf32>
    %66 = arith.divf %62, %65 : vector<17x17xf32>
    %67 = vector.extract_strided_slice %55 {offsets = [0, 0], sizes = [17, 32], strides = [1, 1]} : vector<17x128xf32> to vector<17x32xf32>
    %cst_41 = arith.constant dense<0.000000e+00> : vector<17x32xf32>
    %68 = tpu.matmul %66, %67, %cst_41 {dimension_numbers = #tpu.dot_dimension_numbers<[1], [0], [0], [1], [0, 0, 1, 1], [], []>} : vector<17x17xf32>, vector<17x32xf32>, vector<17x32xf32> -> vector<17x32xf32>
    %69 = vector.extract_strided_slice %54 {offsets = [0, 32], sizes = [17, 32], strides = [1, 1]} : vector<17x128xf32> to vector<17x32xf32>
    %cst_42 = arith.constant dense<0.000000e+00> : vector<17x17xf32>
    %70 = tpu.matmul %69, %53, %cst_42 {dimension_numbers = #tpu.dot_dimension_numbers<[1], [1], [0], [0], [0, 0, 1, 0], [], []>} : vector<17x32xf32>, vector<17x32xf32>, vector<17x17xf32> -> vector<17x17xf32>
    %cst_43 = arith.constant dense<0xFF800000> : vector<17xf32>
    %71 = vector.multi_reduction <maximumf>, %70, %cst_43 [1] : vector<17x17xf32> to vector<17xf32>
    %72 = vector.shape_cast %71 : vector<17xf32> to vector<17x1xf32>
    %73 = vector.broadcast %72 : vector<17x1xf32> to vector<17x17xf32>
    %74 = arith.subf %70, %73 : vector<17x17xf32>
    %75 = math.exp %74 : vector<17x17xf32>
    %cst_44 = arith.constant dense<0.000000e+00> : vector<17xf32>
    %76 = vector.multi_reduction <add>, %75, %cst_44 [1] : vector<17x17xf32> to vector<17xf32>
    %77 = vector.shape_cast %76 : vector<17xf32> to vector<17x1xf32>
    %78 = vector.broadcast %77 : vector<17x1xf32> to vector<17x17xf32>
    %79 = arith.divf %75, %78 : vector<17x17xf32>
    %80 = vector.extract_strided_slice %55 {offsets = [0, 32], sizes = [17, 32], strides = [1, 1]} : vector<17x128xf32> to vector<17x32xf32>
    %cst_45 = arith.constant dense<0.000000e+00> : vector<17x32xf32>
    %81 = tpu.matmul %79, %80, %cst_45 {dimension_numbers = #tpu.dot_dimension_numbers<[1], [0], [0], [1], [0, 0, 1, 1], [], []>} : vector<17x17xf32>, vector<17x32xf32>, vector<17x32xf32> -> vector<17x32xf32>
    %82 = arith.addf %68, %81 : vector<17x32xf32>
    %83 = vector.extract_strided_slice %54 {offsets = [0, 64], sizes = [17, 32], strides = [1, 1]} : vector<17x128xf32> to vector<17x32xf32>
    %cst_46 = arith.constant dense<0.000000e+00> : vector<17x17xf32>
    %84 = tpu.matmul %83, %53, %cst_46 {dimension_numbers = #tpu.dot_dimension_numbers<[1], [1], [0], [0], [0, 0, 1, 0], [], []>} : vector<17x32xf32>, vector<17x32xf32>, vector<17x17xf32> -> vector<17x17xf32>
    %cst_47 = arith.constant dense<0xFF800000> : vector<17xf32>
    %85 = vector.multi_reduction <maximumf>, %84, %cst_47 [1] : vector<17x17xf32> to vector<17xf32>
    %86 = vector.shape_cast %85 : vector<17xf32> to vector<17x1xf32>
    %87 = vector.broadcast %86 : vector<17x1xf32> to vector<17x17xf32>
    %88 = arith.subf %84, %87 : vector<17x17xf32>
    %89 = math.exp %88 : vector<17x17xf32>
    %cst_48 = arith.constant dense<0.000000e+00> : vector<17xf32>
    %90 = vector.multi_reduction <add>, %89, %cst_48 [1] : vector<17x17xf32> to vector<17xf32>
    %91 = vector.shape_cast %90 : vector<17xf32> to vector<17x1xf32>
    %92 = vector.broadcast %91 : vector<17x1xf32> to vector<17x17xf32>
    %93 = arith.divf %89, %92 : vector<17x17xf32>
    %94 = vector.extract_strided_slice %55 {offsets = [0, 64], sizes = [17, 32], strides = [1, 1]} : vector<17x128xf32> to vector<17x32xf32>
    %cst_49 = arith.constant dense<0.000000e+00> : vector<17x32xf32>
    %95 = tpu.matmul %93, %94, %cst_49 {dimension_numbers = #tpu.dot_dimension_numbers<[1], [0], [0], [1], [0, 0, 1, 1], [], []>} : vector<17x17xf32>, vector<17x32xf32>, vector<17x32xf32> -> vector<17x32xf32>
    %96 = arith.addf %82, %95 : vector<17x32xf32>
    %97 = vector.extract_strided_slice %54 {offsets = [0, 96], sizes = [17, 32], strides = [1, 1]} : vector<17x128xf32> to vector<17x32xf32>
    %cst_50 = arith.constant dense<0.000000e+00> : vector<17x17xf32>
    %98 = tpu.matmul %97, %53, %cst_50 {dimension_numbers = #tpu.dot_dimension_numbers<[1], [1], [0], [0], [0, 0, 1, 0], [], []>} : vector<17x32xf32>, vector<17x32xf32>, vector<17x17xf32> -> vector<17x17xf32>
    %cst_51 = arith.constant dense<0xFF800000> : vector<17xf32>
    %99 = vector.multi_reduction <maximumf>, %98, %cst_51 [1] : vector<17x17xf32> to vector<17xf32>
    %100 = vector.shape_cast %99 : vector<17xf32> to vector<17x1xf32>
    %101 = vector.broadcast %100 : vector<17x1xf32> to vector<17x17xf32>
    %102 = arith.subf %98, %101 : vector<17x17xf32>
    %103 = math.exp %102 : vector<17x17xf32>
    %cst_52 = arith.constant dense<0.000000e+00> : vector<17xf32>
    %104 = vector.multi_reduction <add>, %103, %cst_52 [1] : vector<17x17xf32> to vector<17xf32>
    %105 = vector.shape_cast %104 : vector<17xf32> to vector<17x1xf32>
    %106 = vector.broadcast %105 : vector<17x1xf32> to vector<17x17xf32>
    %107 = arith.divf %103, %106 : vector<17x17xf32>
    %108 = vector.extract_strided_slice %55 {offsets = [0, 96], sizes = [17, 32], strides = [1, 1]} : vector<17x128xf32> to vector<17x32xf32>
    %cst_53 = arith.constant dense<0.000000e+00> : vector<17x32xf32>
    %109 = tpu.matmul %107, %108, %cst_53 {dimension_numbers = #tpu.dot_dimension_numbers<[1], [0], [0], [1], [0, 0, 1, 1], [], []>} : vector<17x17xf32>, vector<17x32xf32>, vector<17x32xf32> -> vector<17x32xf32>
    %110 = arith.addf %96, %109 : vector<17x32xf32>
    %c0_54 = arith.constant 0 : index
    %c0_55 = arith.constant 0 : index
    %111 = vector.load %arg22[%c0_54, %c0_55] : memref<34x32xf32, #tpu.memory_space<vmem>>, vector<17x32xf32>
    tpu.vector_store %arg22[%c0_54, %c0_55], %110 {strides = array<i32>} : memref<34x32xf32, #tpu.memory_space<vmem>>, vector<17x32xf32>,
    %112 = vector.extract_strided_slice %42 {offsets = [17, 0], sizes = [17, 32], strides = [1, 1]} : vector<34x32xf32> to vector<17x32xf32>
    %113 = vector.extract_strided_slice %49 {offsets = [17, 0], sizes = [17, 128], strides = [1, 1]} : vector<34x128xf32> to vector<17x128xf32>
    %114 = vector.extract_strided_slice %52 {offsets = [17, 0], sizes = [17, 128], strides = [1, 1]} : vector<34x128xf32> to vector<17x128xf32>
    %115 = vector.extract_strided_slice %113 {offsets = [0, 0], sizes = [17, 32], strides = [1, 1]} : vector<17x128xf32> to vector<17x32xf32>
    %cst_56 = arith.constant dense<0.000000e+00> : vector<17x17xf32>
    %116 = tpu.matmul %115, %112, %cst_56 {dimension_numbers = #tpu.dot_dimension_numbers<[1], [1], [0], [0], [0, 0, 1, 0], [], []>} : vector<17x32xf32>, vector<17x32xf32>, vector<17x17xf32> -> vector<17x17xf32>
    %cst_57 = arith.constant dense<0xFF800000> : vector<17xf32>
    %117 = vector.multi_reduction <maximumf>, %116, %cst_57 [1] : vector<17x17xf32> to vector<17xf32>
    %118 = vector.shape_cast %117 : vector<17xf32> to vector<17x1xf32>
    %119 = vector.broadcast %118 : vector<17x1xf32> to vector<17x17xf32>
    %120 = arith.subf %116, %119 : vector<17x17xf32>
    %121 = math.exp %120 : vector<17x17xf32>
    %cst_58 = arith.constant dense<0.000000e+00> : vector<17xf32>
    %122 = vector.multi_reduction <add>, %121, %cst_58 [1] : vector<17x17xf32> to vector<17xf32>
    %123 = vector.shape_cast %122 : vector<17xf32> to vector<17x1xf32>
    %124 = vector.broadcast %123 : vector<17x1xf32> to vector<17x17xf32>
    %125 = arith.divf %121, %124 : vector<17x17xf32>
    %126 = vector.extract_strided_slice %114 {offsets = [0, 0], sizes = [17, 32], strides = [1, 1]} : vector<17x128xf32> to vector<17x32xf32>
    %cst_59 = arith.constant dense<0.000000e+00> : vector<17x32xf32>
    %127 = tpu.matmul %125, %126, %cst_59 {dimension_numbers = #tpu.dot_dimension_numbers<[1], [0], [0], [1], [0, 0, 1, 1], [], []>} : vector<17x17xf32>, vector<17x32xf32>, vector<17x32xf32> -> vector<17x32xf32>
    %128 = vector.extract_strided_slice %113 {offsets = [0, 32], sizes = [17, 32], strides = [1, 1]} : vector<17x128xf32> to vector<17x32xf32>
    %cst_60 = arith.constant dense<0.000000e+00> : vector<17x17xf32>
    %129 = tpu.matmul %128, %112, %cst_60 {dimension_numbers = #tpu.dot_dimension_numbers<[1], [1], [0], [0], [0, 0, 1, 0], [], []>} : vector<17x32xf32>, vector<17x32xf32>, vector<17x17xf32> -> vector<17x17xf32>
    %cst_61 = arith.constant dense<0xFF800000> : vector<17xf32>
    %130 = vector.multi_reduction <maximumf>, %129, %cst_61 [1] : vector<17x17xf32> to vector<17xf32>
    %131 = vector.shape_cast %130 : vector<17xf32> to vector<17x1xf32>
    %132 = vector.broadcast %131 : vector<17x1xf32> to vector<17x17xf32>
    %133 = arith.subf %129, %132 : vector<17x17xf32>
    %134 = math.exp %133 : vector<17x17xf32>
    %cst_62 = arith.constant dense<0.000000e+00> : vector<17xf32>
    %135 = vector.multi_reduction <add>, %134, %cst_62 [1] : vector<17x17xf32> to vector<17xf32>
    %136 = vector.shape_cast %135 : vector<17xf32> to vector<17x1xf32>
    %137 = vector.broadcast %136 : vector<17x1xf32> to vector<17x17xf32>
    %138 = arith.divf %134, %137 : vector<17x17xf32>
    %139 = vector.extract_strided_slice %114 {offsets = [0, 32], sizes = [17, 32], strides = [1, 1]} : vector<17x128xf32> to vector<17x32xf32>
    %cst_63 = arith.constant dense<0.000000e+00> : vector<17x32xf32>
    %140 = tpu.matmul %138, %139, %cst_63 {dimension_numbers = #tpu.dot_dimension_numbers<[1], [0], [0], [1], [0, 0, 1, 1], [], []>} : vector<17x17xf32>, vector<17x32xf32>, vector<17x32xf32> -> vector<17x32xf32>
    %141 = arith.addf %127, %140 : vector<17x32xf32>
    %142 = vector.extract_strided_slice %113 {offsets = [0, 64], sizes = [17, 32], strides = [1, 1]} : vector<17x128xf32> to vector<17x32xf32>
    %cst_64 = arith.constant dense<0.000000e+00> : vector<17x17xf32>
    %143 = tpu.matmul %142, %112, %cst_64 {dimension_numbers = #tpu.dot_dimension_numbers<[1], [1], [0], [0], [0, 0, 1, 0], [], []>} : vector<17x32xf32>, vector<17x32xf32>, vector<17x17xf32> -> vector<17x17xf32>
    %cst_65 = arith.constant dense<0xFF800000> : vector<17xf32>
    %144 = vector.multi_reduction <maximumf>, %143, %cst_65 [1] : vector<17x17xf32> to vector<17xf32>
    %145 = vector.shape_cast %144 : vector<17xf32> to vector<17x1xf32>
    %146 = vector.broadcast %145 : vector<17x1xf32> to vector<17x17xf32>
    %147 = arith.subf %143, %146 : vector<17x17xf32>
    %148 = math.exp %147 : vector<17x17xf32>
    %cst_66 = arith.constant dense<0.000000e+00> : vector<17xf32>
    %149 = vector.multi_reduction <add>, %148, %cst_66 [1] : vector<17x17xf32> to vector<17xf32>
    %150 = vector.shape_cast %149 : vector<17xf32> to vector<17x1xf32>
    %151 = vector.broadcast %150 : vector<17x1xf32> to vector<17x17xf32>
    %152 = arith.divf %148, %151 : vector<17x17xf32>
    %153 = vector.extract_strided_slice %114 {offsets = [0, 64], sizes = [17, 32], strides = [1, 1]} : vector<17x128xf32> to vector<17x32xf32>
    %cst_67 = arith.constant dense<0.000000e+00> : vector<17x32xf32>
    %154 = tpu.matmul %152, %153, %cst_67 {dimension_numbers = #tpu.dot_dimension_numbers<[1], [0], [0], [1], [0, 0, 1, 1], [], []>} : vector<17x17xf32>, vector<17x32xf32>, vector<17x32xf32> -> vector<17x32xf32>
    %155 = arith.addf %141, %154 : vector<17x32xf32>
    %156 = vector.extract_strided_slice %113 {offsets = [0, 96], sizes = [17, 32], strides = [1, 1]} : vector<17x128xf32> to vector<17x32xf32>
    %cst_68 = arith.constant dense<0.000000e+00> : vector<17x17xf32>
    %157 = tpu.matmul %156, %112, %cst_68 {dimension_numbers = #tpu.dot_dimension_numbers<[1], [1], [0], [0], [0, 0, 1, 0], [], []>} : vector<17x32xf32>, vector<17x32xf32>, vector<17x17xf32> -> vector<17x17xf32>
    %cst_69 = arith.constant dense<0xFF800000> : vector<17xf32>
    %158 = vector.multi_reduction <maximumf>, %157, %cst_69 [1] : vector<17x17xf32> to vector<17xf32>
    %159 = vector.shape_cast %158 : vector<17xf32> to vector<17x1xf32>
    %160 = vector.broadcast %159 : vector<17x1xf32> to vector<17x17xf32>
    %161 = arith.subf %157, %160 : vector<17x17xf32>
    %162 = math.exp %161 : vector<17x17xf32>
    %cst_70 = arith.constant dense<0.000000e+00> : vector<17xf32>
    %163 = vector.multi_reduction <add>, %162, %cst_70 [1] : vector<17x17xf32> to vector<17xf32>
    %164 = vector.shape_cast %163 : vector<17xf32> to vector<17x1xf32>
    %165 = vector.broadcast %164 : vector<17x1xf32> to vector<17x17xf32>
    %166 = arith.divf %162, %165 : vector<17x17xf32>
    %167 = vector.extract_strided_slice %114 {offsets = [0, 96], sizes = [17, 32], strides = [1, 1]} : vector<17x128xf32> to vector<17x32xf32>
    %cst_71 = arith.constant dense<0.000000e+00> : vector<17x32xf32>
    %168 = tpu.matmul %166, %167, %cst_71 {dimension_numbers = #tpu.dot_dimension_numbers<[1], [0], [0], [1], [0, 0, 1, 1], [], []>} : vector<17x17xf32>, vector<17x32xf32>, vector<17x32xf32> -> vector<17x32xf32>
    %169 = arith.addf %155, %168 : vector<17x32xf32>
    %c17_72 = arith.constant 17 : index
    %c0_73 = arith.constant 0 : index
    %170 = vector.load %arg22[%c17_72, %c0_73] : memref<34x32xf32, #tpu.memory_space<vmem>>, vector<17x32xf32>
    tpu.vector_store %arg22[%c17_72, %c0_73], %169 {strides = array<i32>} : memref<34x32xf32, #tpu.memory_space<vmem>>, vector<17x32xf32>,
    %c0_74 = arith.constant 0 : index
    %c0_75 = arith.constant 0 : index
    %171 = vector.load %arg22[%c0_74, %c0_75] : memref<34x32xf32, #tpu.memory_space<vmem>>, vector<34x32xf32>
    %172 = arith.addf %16, %171 : vector<34x32xf32>
    %c0_76 = arith.constant 0 : index
    %c0_77 = arith.constant 0 : index
    %c0_78 = arith.constant 0 : index
    %173 = vector.load %arg12[%c0_76, %c0_77, %c0_78] : memref<2x1x32xf32, #tpu.memory_space<vmem>>, vector<1x1x32xf32>
    %174 = vector.shape_cast %173 : vector<1x1x32xf32> to vector<1x32xf32>
    %175 = vector.broadcast %174 : vector<1x32xf32> to vector<34x32xf32>
    %176 = arith.addf %172, %175 : vector<34x32xf32>
    %c0_79 = arith.constant 0 : index
    %c0_80 = arith.constant 0 : index
    %c0_81 = arith.constant 0 : index
    %177 = vector.load %arg13[%c0_79, %c0_80, %c0_81] : memref<2x1x32xf32, #tpu.memory_space<vmem>>, vector<1x1x32xf32>
    %178 = vector.shape_cast %177 : vector<1x1x32xf32> to vector<1x32xf32>
    %c0_82 = arith.constant 0 : index
    %c0_83 = arith.constant 0 : index
    %c0_84 = arith.constant 0 : index
    %179 = vector.load %arg14[%c0_82, %c0_83, %c0_84] : memref<2x1x32xf32, #tpu.memory_space<vmem>>, vector<1x1x32xf32>
    %180 = vector.shape_cast %179 : vector<1x1x32xf32> to vector<1x32xf32>
    %cst_85 = arith.constant dense<0.000000e+00> : vector<34xf32>
    %181 = vector.multi_reduction <add>, %176, %cst_85 [1] : vector<34x32xf32> to vector<34xf32>
    %182 = vector.shape_cast %181 : vector<34xf32> to vector<34x1xf32>
    %cst_86 = arith.constant 3.200000e+01 : f32
    %183 = vector.broadcast %cst_86 : f32 to vector<34x1xf32>
    %184 = arith.divf %182, %183 : vector<34x1xf32>
    %185 = vector.broadcast %184 : vector<34x1xf32> to vector<34x32xf32>
    %186 = arith.subf %176, %185 : vector<34x32xf32>
    %187 = arith.mulf %186, %186 : vector<34x32xf32>
    %cst_87 = arith.constant dense<0.000000e+00> : vector<34xf32>
    %188 = vector.multi_reduction <add>, %187, %cst_87 [1] : vector<34x32xf32> to vector<34xf32>
    %189 = vector.shape_cast %188 : vector<34xf32> to vector<34x1xf32>
    %cst_88 = arith.constant 3.200000e+01 : f32
    %190 = vector.broadcast %cst_88 : f32 to vector<34x1xf32>
    %191 = arith.divf %189, %190 : vector<34x1xf32>
    %192 = vector.broadcast %184 : vector<34x1xf32> to vector<34x32xf32>
    %193 = arith.subf %176, %192 : vector<34x32xf32>
    %cst_89 = arith.constant 9.99999974E-6 : f32
    %194 = vector.broadcast %cst_89 : f32 to vector<34x1xf32>
    %195 = arith.addf %191, %194 : vector<34x1xf32>
    %196 = math.rsqrt %195 : vector<34x1xf32>
    %197 = vector.broadcast %196 : vector<34x1xf32> to vector<34x32xf32>
    %198 = arith.mulf %193, %197 : vector<34x32xf32>
    %199 = vector.broadcast %178 : vector<1x32xf32> to vector<34x32xf32>
    %200 = arith.mulf %198, %199 : vector<34x32xf32>
    %201 = vector.broadcast %180 : vector<1x32xf32> to vector<34x32xf32>
    %202 = arith.addf %200, %201 : vector<34x32xf32>
    %c0_90 = arith.constant 0 : index
    %c0_91 = arith.constant 0 : index
    %c0_92 = arith.constant 0 : index
    %203 = vector.load %arg15[%c0_90, %c0_91, %c0_92] : memref<2x32x64xf32, #tpu.memory_space<vmem>>, vector<1x32x64xf32>
    %204 = vector.shape_cast %203 : vector<1x32x64xf32> to vector<32x64xf32>
    %cst_93 = arith.constant dense<0.000000e+00> : vector<34x64xf32>
    %205 = tpu.matmul %202, %204, %cst_93 {dimension_numbers = #tpu.dot_dimension_numbers<[1], [0], [0], [1], [0, 0, 1, 1], [], []>} : vector<34x32xf32>, vector<32x64xf32>, vector<34x64xf32> -> vector<34x64xf32>
    %c0_94 = arith.constant 0 : index
    %c0_95 = arith.constant 0 : index
    %c0_96 = arith.constant 0 : index
    %206 = vector.load %arg16[%c0_94, %c0_95, %c0_96] : memref<2x1x64xf32, #tpu.memory_space<vmem>>, vector<1x1x64xf32>
    %207 = vector.shape_cast %206 : vector<1x1x64xf32> to vector<1x64xf32>
    %208 = vector.broadcast %207 : vector<1x64xf32> to vector<34x64xf32>
    %209 = arith.addf %205, %208 : vector<34x64xf32>
    %c0_97 = arith.constant 0 : index
    %c0_98 = arith.constant 0 : index
    %c0_99 = arith.constant 0 : index
    %210 = vector.load %arg17[%c0_97, %c0_98, %c0_99] : memref<2x1x64xf32, #tpu.memory_space<vmem>>, vector<1x1x64xf32>
    %211 = vector.shape_cast %210 : vector<1x1x64xf32> to vector<1x64xf32>
    %c0_100 = arith.constant 0 : index
    %c0_101 = arith.constant 0 : index
    %c0_102 = arith.constant 0 : index
    %212 = vector.load %arg18[%c0_100, %c0_101, %c0_102] : memref<2x1x64xf32, #tpu.memory_space<vmem>>, vector<1x1x64xf32>
    %213 = vector.shape_cast %212 : vector<1x1x64xf32> to vector<1x64xf32>
    %cst_103 = arith.constant dense<0.000000e+00> : vector<34xf32>
    %214 = vector.multi_reduction <add>, %209, %cst_103 [1] : vector<34x64xf32> to vector<34xf32>
    %215 = vector.shape_cast %214 : vector<34xf32> to vector<34x1xf32>
    %cst_104 = arith.constant 6.400000e+01 : f32
    %216 = vector.broadcast %cst_104 : f32 to vector<34x1xf32>
    %217 = arith.divf %215, %216 : vector<34x1xf32>
    %218 = vector.broadcast %217 : vector<34x1xf32> to vector<34x64xf32>
    %219 = arith.subf %209, %218 : vector<34x64xf32>
    %220 = arith.mulf %219, %219 : vector<34x64xf32>
    %cst_105 = arith.constant dense<0.000000e+00> : vector<34xf32>
    %221 = vector.multi_reduction <add>, %220, %cst_105 [1] : vector<34x64xf32> to vector<34xf32>
    %222 = vector.shape_cast %221 : vector<34xf32> to vector<34x1xf32>
    %cst_106 = arith.constant 6.400000e+01 : f32
    %223 = vector.broadcast %cst_106 : f32 to vector<34x1xf32>
    %224 = arith.divf %222, %223 : vector<34x1xf32>
    %225 = vector.broadcast %217 : vector<34x1xf32> to vector<34x64xf32>
    %226 = arith.subf %209, %225 : vector<34x64xf32>
    %cst_107 = arith.constant 9.99999974E-6 : f32
    %227 = vector.broadcast %cst_107 : f32 to vector<34x1xf32>
    %228 = arith.addf %224, %227 : vector<34x1xf32>
    %229 = math.rsqrt %228 : vector<34x1xf32>
    %230 = vector.broadcast %229 : vector<34x1xf32> to vector<34x64xf32>
    %231 = arith.mulf %226, %230 : vector<34x64xf32>
    %232 = vector.broadcast %211 : vector<1x64xf32> to vector<34x64xf32>
    %233 = arith.mulf %231, %232 : vector<34x64xf32>
    %234 = vector.broadcast %213 : vector<1x64xf32> to vector<34x64xf32>
    %235 = arith.addf %233, %234 : vector<34x64xf32>
    %cst_108 = arith.constant 0.000000e+00 : f32
    %236 = vector.broadcast %cst_108 : f32 to vector<34x64xf32>
    %237 = arith.cmpf ogt, %235, %236 : vector<34x64xf32>
    %cst_109 = arith.constant 0.000000e+00 : f32
    %238 = vector.broadcast %cst_109 : f32 to vector<34x64xf32>
    %239 = arith.minimumf %235, %238 : vector<34x64xf32>
    %240 = math.exp %239 : vector<34x64xf32>
    %cst_110 = arith.constant 1.000000e+00 : f32
    %241 = vector.broadcast %cst_110 : f32 to vector<34x64xf32>
    %242 = arith.subf %240, %241 : vector<34x64xf32>
    %243 = arith.select %237, %235, %242 : vector<34x64xi1>, vector<34x64xf32>
    %c0_111 = arith.constant 0 : index
    %c0_112 = arith.constant 0 : index
    %c0_113 = arith.constant 0 : index
    %244 = vector.load %arg19[%c0_111, %c0_112, %c0_113] : memref<2x64x32xf32, #tpu.memory_space<vmem>>, vector<1x64x32xf32>
    %245 = vector.shape_cast %244 : vector<1x64x32xf32> to vector<64x32xf32>
    %cst_114 = arith.constant dense<0.000000e+00> : vector<34x32xf32>
    %246 = tpu.matmul %243, %245, %cst_114 {dimension_numbers = #tpu.dot_dimension_numbers<[1], [0], [0], [1], [0, 0, 1, 1], [], []>} : vector<34x64xf32>, vector<64x32xf32>, vector<34x32xf32> -> vector<34x32xf32>
    %247 = arith.addf %176, %246 : vector<34x32xf32>
    %c0_115 = arith.constant 0 : index
    %c0_116 = arith.constant 0 : index
    %c0_117 = arith.constant 0 : index
    %248 = vector.load %arg20[%c0_115, %c0_116, %c0_117] : memref<2x1x32xf32, #tpu.memory_space<vmem>>, vector<1x1x32xf32>
    %249 = vector.shape_cast %248 : vector<1x1x32xf32> to vector<1x32xf32>
    %250 = vector.broadcast %249 : vector<1x32xf32> to vector<34x32xf32>
    %251 = arith.addf %247, %250 : vector<34x32xf32>
    %c1_118 = arith.constant 1 : index
    %c0_119 = arith.constant 0 : index
    %c0_120 = arith.constant 0 : index
    %252 = vector.load %arg7[%c1_118, %c0_119, %c0_120] : memref<2x1x32xf32, #tpu.memory_space<vmem>>, vector<1x1x32xf32>
    %253 = vector.shape_cast %252 : vector<1x1x32xf32> to vector<1x32xf32>
    %c1_121 = arith.constant 1 : index
    %c0_122 = arith.constant 0 : index
    %c0_123 = arith.constant 0 : index
    %254 = vector.load %arg8[%c1_121, %c0_122, %c0_123] : memref<2x1x32xf32, #tpu.memory_space<vmem>>, vector<1x1x32xf32>
    %255 = vector.shape_cast %254 : vector<1x1x32xf32> to vector<1x32xf32>
    %cst_124 = arith.constant dense<0.000000e+00> : vector<34xf32>
    %256 = vector.multi_reduction <add>, %251, %cst_124 [1] : vector<34x32xf32> to vector<34xf32>
    %257 = vector.shape_cast %256 : vector<34xf32> to vector<34x1xf32>
    %cst_125 = arith.constant 3.200000e+01 : f32
    %258 = vector.broadcast %cst_125 : f32 to vector<34x1xf32>
    %259 = arith.divf %257, %258 : vector<34x1xf32>
    %260 = vector.broadcast %259 : vector<34x1xf32> to vector<34x32xf32>
    %261 = arith.subf %251, %260 : vector<34x32xf32>
    %262 = arith.mulf %261, %261 : vector<34x32xf32>
    %cst_126 = arith.constant dense<0.000000e+00> : vector<34xf32>
    %263 = vector.multi_reduction <add>, %262, %cst_126 [1] : vector<34x32xf32> to vector<34xf32>
    %264 = vector.shape_cast %263 : vector<34xf32> to vector<34x1xf32>
    %cst_127 = arith.constant 3.200000e+01 : f32
    %265 = vector.broadcast %cst_127 : f32 to vector<34x1xf32>
    %266 = arith.divf %264, %265 : vector<34x1xf32>
    %267 = vector.broadcast %259 : vector<34x1xf32> to vector<34x32xf32>
    %268 = arith.subf %251, %267 : vector<34x32xf32>
    %cst_128 = arith.constant 9.99999974E-6 : f32
    %269 = vector.broadcast %cst_128 : f32 to vector<34x1xf32>
    %270 = arith.addf %266, %269 : vector<34x1xf32>
    %271 = math.rsqrt %270 : vector<34x1xf32>
    %272 = vector.broadcast %271 : vector<34x1xf32> to vector<34x32xf32>
    %273 = arith.mulf %268, %272 : vector<34x32xf32>
    %274 = vector.broadcast %253 : vector<1x32xf32> to vector<34x32xf32>
    %275 = arith.mulf %273, %274 : vector<34x32xf32>
    %276 = vector.broadcast %255 : vector<1x32xf32> to vector<34x32xf32>
    %277 = arith.addf %275, %276 : vector<34x32xf32>
    %c1_129 = arith.constant 1 : index
    %c0_130 = arith.constant 0 : index
    %c0_131 = arith.constant 0 : index
    %278 = vector.load %arg9[%c1_129, %c0_130, %c0_131] : memref<2x32x128xf32, #tpu.memory_space<vmem>>, vector<1x32x128xf32>
    %279 = vector.shape_cast %278 : vector<1x32x128xf32> to vector<32x128xf32>
    %cst_132 = arith.constant dense<0.000000e+00> : vector<34x128xf32>
    %280 = tpu.matmul %277, %279, %cst_132 {dimension_numbers = #tpu.dot_dimension_numbers<[1], [0], [0], [1], [0, 0, 1, 1], [], []>} : vector<34x32xf32>, vector<32x128xf32>, vector<34x128xf32> -> vector<34x128xf32>
    %c1_133 = arith.constant 1 : index
    %c0_134 = arith.constant 0 : index
    %c0_135 = arith.constant 0 : index
    %281 = vector.load %arg10[%c1_133, %c0_134, %c0_135] : memref<2x1x128xf32, #tpu.memory_space<vmem>>, vector<1x1x128xf32>
    %282 = vector.shape_cast %281 : vector<1x1x128xf32> to vector<1x128xf32>
    %283 = vector.broadcast %282 : vector<1x128xf32> to vector<34x128xf32>
    %284 = arith.addf %280, %283 : vector<34x128xf32>
    %c1_136 = arith.constant 1 : index
    %c0_137 = arith.constant 0 : index
    %c0_138 = arith.constant 0 : index
    %285 = vector.load %arg11[%c1_136, %c0_137, %c0_138] : memref<2x32x128xf32, #tpu.memory_space<vmem>>, vector<1x32x128xf32>
    %286 = vector.shape_cast %285 : vector<1x32x128xf32> to vector<32x128xf32>
    %cst_139 = arith.constant dense<0.000000e+00> : vector<34x128xf32>
    %287 = tpu.matmul %277, %286, %cst_139 {dimension_numbers = #tpu.dot_dimension_numbers<[1], [0], [0], [1], [0, 0, 1, 1], [], []>} : vector<34x32xf32>, vector<32x128xf32>, vector<34x128xf32> -> vector<34x128xf32>
    %288 = vector.extract_strided_slice %277 {offsets = [0, 0], sizes = [17, 32], strides = [1, 1]} : vector<34x32xf32> to vector<17x32xf32>
    %289 = vector.extract_strided_slice %284 {offsets = [0, 0], sizes = [17, 128], strides = [1, 1]} : vector<34x128xf32> to vector<17x128xf32>
    %290 = vector.extract_strided_slice %287 {offsets = [0, 0], sizes = [17, 128], strides = [1, 1]} : vector<34x128xf32> to vector<17x128xf32>
    %291 = vector.extract_strided_slice %289 {offsets = [0, 0], sizes = [17, 32], strides = [1, 1]} : vector<17x128xf32> to vector<17x32xf32>
    %cst_140 = arith.constant dense<0.000000e+00> : vector<17x17xf32>
    %292 = tpu.matmul %291, %288, %cst_140 {dimension_numbers = #tpu.dot_dimension_numbers<[1], [1], [0], [0], [0, 0, 1, 0], [], []>} : vector<17x32xf32>, vector<17x32xf32>, vector<17x17xf32> -> vector<17x17xf32>
    %cst_141 = arith.constant dense<0xFF800000> : vector<17xf32>
    %293 = vector.multi_reduction <maximumf>, %292, %cst_141 [1] : vector<17x17xf32> to vector<17xf32>
    %294 = vector.shape_cast %293 : vector<17xf32> to vector<17x1xf32>
    %295 = vector.broadcast %294 : vector<17x1xf32> to vector<17x17xf32>
    %296 = arith.subf %292, %295 : vector<17x17xf32>
    %297 = math.exp %296 : vector<17x17xf32>
    %cst_142 = arith.constant dense<0.000000e+00> : vector<17xf32>
    %298 = vector.multi_reduction <add>, %297, %cst_142 [1] : vector<17x17xf32> to vector<17xf32>
    %299 = vector.shape_cast %298 : vector<17xf32> to vector<17x1xf32>
    %300 = vector.broadcast %299 : vector<17x1xf32> to vector<17x17xf32>
    %301 = arith.divf %297, %300 : vector<17x17xf32>
    %302 = vector.extract_strided_slice %290 {offsets = [0, 0], sizes = [17, 32], strides = [1, 1]} : vector<17x128xf32> to vector<17x32xf32>
    %cst_143 = arith.constant dense<0.000000e+00> : vector<17x32xf32>
    %303 = tpu.matmul %301, %302, %cst_143 {dimension_numbers = #tpu.dot_dimension_numbers<[1], [0], [0], [1], [0, 0, 1, 1], [], []>} : vector<17x17xf32>, vector<17x32xf32>, vector<17x32xf32> -> vector<17x32xf32>
    %304 = vector.extract_strided_slice %289 {offsets = [0, 32], sizes = [17, 32], strides = [1, 1]} : vector<17x128xf32> to vector<17x32xf32>
    %cst_144 = arith.constant dense<0.000000e+00> : vector<17x17xf32>
    %305 = tpu.matmul %304, %288, %cst_144 {dimension_numbers = #tpu.dot_dimension_numbers<[1], [1], [0], [0], [0, 0, 1, 0], [], []>} : vector<17x32xf32>, vector<17x32xf32>, vector<17x17xf32> -> vector<17x17xf32>
    %cst_145 = arith.constant dense<0xFF800000> : vector<17xf32>
    %306 = vector.multi_reduction <maximumf>, %305, %cst_145 [1] : vector<17x17xf32> to vector<17xf32>
    %307 = vector.shape_cast %306 : vector<17xf32> to vector<17x1xf32>
    %308 = vector.broadcast %307 : vector<17x1xf32> to vector<17x17xf32>
    %309 = arith.subf %305, %308 : vector<17x17xf32>
    %310 = math.exp %309 : vector<17x17xf32>
    %cst_146 = arith.constant dense<0.000000e+00> : vector<17xf32>
    %311 = vector.multi_reduction <add>, %310, %cst_146 [1] : vector<17x17xf32> to vector<17xf32>
    %312 = vector.shape_cast %311 : vector<17xf32> to vector<17x1xf32>
    %313 = vector.broadcast %312 : vector<17x1xf32> to vector<17x17xf32>
    %314 = arith.divf %310, %313 : vector<17x17xf32>
    %315 = vector.extract_strided_slice %290 {offsets = [0, 32], sizes = [17, 32], strides = [1, 1]} : vector<17x128xf32> to vector<17x32xf32>
    %cst_147 = arith.constant dense<0.000000e+00> : vector<17x32xf32>
    %316 = tpu.matmul %314, %315, %cst_147 {dimension_numbers = #tpu.dot_dimension_numbers<[1], [0], [0], [1], [0, 0, 1, 1], [], []>} : vector<17x17xf32>, vector<17x32xf32>, vector<17x32xf32> -> vector<17x32xf32>
    %317 = arith.addf %303, %316 : vector<17x32xf32>
    %318 = vector.extract_strided_slice %289 {offsets = [0, 64], sizes = [17, 32], strides = [1, 1]} : vector<17x128xf32> to vector<17x32xf32>
    %cst_148 = arith.constant dense<0.000000e+00> : vector<17x17xf32>
    %319 = tpu.matmul %318, %288, %cst_148 {dimension_numbers = #tpu.dot_dimension_numbers<[1], [1], [0], [0], [0, 0, 1, 0], [], []>} : vector<17x32xf32>, vector<17x32xf32>, vector<17x17xf32> -> vector<17x17xf32>
    %cst_149 = arith.constant dense<0xFF800000> : vector<17xf32>
    %320 = vector.multi_reduction <maximumf>, %319, %cst_149 [1] : vector<17x17xf32> to vector<17xf32>
    %321 = vector.shape_cast %320 : vector<17xf32> to vector<17x1xf32>
    %322 = vector.broadcast %321 : vector<17x1xf32> to vector<17x17xf32>
    %323 = arith.subf %319, %322 : vector<17x17xf32>
    %324 = math.exp %323 : vector<17x17xf32>
    %cst_150 = arith.constant dense<0.000000e+00> : vector<17xf32>
    %325 = vector.multi_reduction <add>, %324, %cst_150 [1] : vector<17x17xf32> to vector<17xf32>
    %326 = vector.shape_cast %325 : vector<17xf32> to vector<17x1xf32>
    %327 = vector.broadcast %326 : vector<17x1xf32> to vector<17x17xf32>
    %328 = arith.divf %324, %327 : vector<17x17xf32>
    %329 = vector.extract_strided_slice %290 {offsets = [0, 64], sizes = [17, 32], strides = [1, 1]} : vector<17x128xf32> to vector<17x32xf32>
    %cst_151 = arith.constant dense<0.000000e+00> : vector<17x32xf32>
    %330 = tpu.matmul %328, %329, %cst_151 {dimension_numbers = #tpu.dot_dimension_numbers<[1], [0], [0], [1], [0, 0, 1, 1], [], []>} : vector<17x17xf32>, vector<17x32xf32>, vector<17x32xf32> -> vector<17x32xf32>
    %331 = arith.addf %317, %330 : vector<17x32xf32>
    %332 = vector.extract_strided_slice %289 {offsets = [0, 96], sizes = [17, 32], strides = [1, 1]} : vector<17x128xf32> to vector<17x32xf32>
    %cst_152 = arith.constant dense<0.000000e+00> : vector<17x17xf32>
    %333 = tpu.matmul %332, %288, %cst_152 {dimension_numbers = #tpu.dot_dimension_numbers<[1], [1], [0], [0], [0, 0, 1, 0], [], []>} : vector<17x32xf32>, vector<17x32xf32>, vector<17x17xf32> -> vector<17x17xf32>
    %cst_153 = arith.constant dense<0xFF800000> : vector<17xf32>
    %334 = vector.multi_reduction <maximumf>, %333, %cst_153 [1] : vector<17x17xf32> to vector<17xf32>
    %335 = vector.shape_cast %334 : vector<17xf32> to vector<17x1xf32>
    %336 = vector.broadcast %335 : vector<17x1xf32> to vector<17x17xf32>
    %337 = arith.subf %333, %336 : vector<17x17xf32>
    %338 = math.exp %337 : vector<17x17xf32>
    %cst_154 = arith.constant dense<0.000000e+00> : vector<17xf32>
    %339 = vector.multi_reduction <add>, %338, %cst_154 [1] : vector<17x17xf32> to vector<17xf32>
    %340 = vector.shape_cast %339 : vector<17xf32> to vector<17x1xf32>
    %341 = vector.broadcast %340 : vector<17x1xf32> to vector<17x17xf32>
    %342 = arith.divf %338, %341 : vector<17x17xf32>
    %343 = vector.extract_strided_slice %290 {offsets = [0, 96], sizes = [17, 32], strides = [1, 1]} : vector<17x128xf32> to vector<17x32xf32>
    %cst_155 = arith.constant dense<0.000000e+00> : vector<17x32xf32>
    %344 = tpu.matmul %342, %343, %cst_155 {dimension_numbers = #tpu.dot_dimension_numbers<[1], [0], [0], [1], [0, 0, 1, 1], [], []>} : vector<17x17xf32>, vector<17x32xf32>, vector<17x32xf32> -> vector<17x32xf32>
    %345 = arith.addf %331, %344 : vector<17x32xf32>
    %c0_156 = arith.constant 0 : index
    %c0_157 = arith.constant 0 : index
    %346 = vector.load %arg22[%c0_156, %c0_157] : memref<34x32xf32, #tpu.memory_space<vmem>>, vector<17x32xf32>
    tpu.vector_store %arg22[%c0_156, %c0_157], %345 {strides = array<i32>} : memref<34x32xf32, #tpu.memory_space<vmem>>, vector<17x32xf32>,
    %347 = vector.extract_strided_slice %277 {offsets = [17, 0], sizes = [17, 32], strides = [1, 1]} : vector<34x32xf32> to vector<17x32xf32>
    %348 = vector.extract_strided_slice %284 {offsets = [17, 0], sizes = [17, 128], strides = [1, 1]} : vector<34x128xf32> to vector<17x128xf32>
    %349 = vector.extract_strided_slice %287 {offsets = [17, 0], sizes = [17, 128], strides = [1, 1]} : vector<34x128xf32> to vector<17x128xf32>
    %350 = vector.extract_strided_slice %348 {offsets = [0, 0], sizes = [17, 32], strides = [1, 1]} : vector<17x128xf32> to vector<17x32xf32>
    %cst_158 = arith.constant dense<0.000000e+00> : vector<17x17xf32>
    %351 = tpu.matmul %350, %347, %cst_158 {dimension_numbers = #tpu.dot_dimension_numbers<[1], [1], [0], [0], [0, 0, 1, 0], [], []>} : vector<17x32xf32>, vector<17x32xf32>, vector<17x17xf32> -> vector<17x17xf32>
    %cst_159 = arith.constant dense<0xFF800000> : vector<17xf32>
    %352 = vector.multi_reduction <maximumf>, %351, %cst_159 [1] : vector<17x17xf32> to vector<17xf32>
    %353 = vector.shape_cast %352 : vector<17xf32> to vector<17x1xf32>
    %354 = vector.broadcast %353 : vector<17x1xf32> to vector<17x17xf32>
    %355 = arith.subf %351, %354 : vector<17x17xf32>
    %356 = math.exp %355 : vector<17x17xf32>
    %cst_160 = arith.constant dense<0.000000e+00> : vector<17xf32>
    %357 = vector.multi_reduction <add>, %356, %cst_160 [1] : vector<17x17xf32> to vector<17xf32>
    %358 = vector.shape_cast %357 : vector<17xf32> to vector<17x1xf32>
    %359 = vector.broadcast %358 : vector<17x1xf32> to vector<17x17xf32>
    %360 = arith.divf %356, %359 : vector<17x17xf32>
    %361 = vector.extract_strided_slice %349 {offsets = [0, 0], sizes = [17, 32], strides = [1, 1]} : vector<17x128xf32> to vector<17x32xf32>
    %cst_161 = arith.constant dense<0.000000e+00> : vector<17x32xf32>
    %362 = tpu.matmul %360, %361, %cst_161 {dimension_numbers = #tpu.dot_dimension_numbers<[1], [0], [0], [1], [0, 0, 1, 1], [], []>} : vector<17x17xf32>, vector<17x32xf32>, vector<17x32xf32> -> vector<17x32xf32>
    %363 = vector.extract_strided_slice %348 {offsets = [0, 32], sizes = [17, 32], strides = [1, 1]} : vector<17x128xf32> to vector<17x32xf32>
    %cst_162 = arith.constant dense<0.000000e+00> : vector<17x17xf32>
    %364 = tpu.matmul %363, %347, %cst_162 {dimension_numbers = #tpu.dot_dimension_numbers<[1], [1], [0], [0], [0, 0, 1, 0], [], []>} : vector<17x32xf32>, vector<17x32xf32>, vector<17x17xf32> -> vector<17x17xf32>
    %cst_163 = arith.constant dense<0xFF800000> : vector<17xf32>
    %365 = vector.multi_reduction <maximumf>, %364, %cst_163 [1] : vector<17x17xf32> to vector<17xf32>
    %366 = vector.shape_cast %365 : vector<17xf32> to vector<17x1xf32>
    %367 = vector.broadcast %366 : vector<17x1xf32> to vector<17x17xf32>
    %368 = arith.subf %364, %367 : vector<17x17xf32>
    %369 = math.exp %368 : vector<17x17xf32>
    %cst_164 = arith.constant dense<0.000000e+00> : vector<17xf32>
    %370 = vector.multi_reduction <add>, %369, %cst_164 [1] : vector<17x17xf32> to vector<17xf32>
    %371 = vector.shape_cast %370 : vector<17xf32> to vector<17x1xf32>
    %372 = vector.broadcast %371 : vector<17x1xf32> to vector<17x17xf32>
    %373 = arith.divf %369, %372 : vector<17x17xf32>
    %374 = vector.extract_strided_slice %349 {offsets = [0, 32], sizes = [17, 32], strides = [1, 1]} : vector<17x128xf32> to vector<17x32xf32>
    %cst_165 = arith.constant dense<0.000000e+00> : vector<17x32xf32>
    %375 = tpu.matmul %373, %374, %cst_165 {dimension_numbers = #tpu.dot_dimension_numbers<[1], [0], [0], [1], [0, 0, 1, 1], [], []>} : vector<17x17xf32>, vector<17x32xf32>, vector<17x32xf32> -> vector<17x32xf32>
    %376 = arith.addf %362, %375 : vector<17x32xf32>
    %377 = vector.extract_strided_slice %348 {offsets = [0, 64], sizes = [17, 32], strides = [1, 1]} : vector<17x128xf32> to vector<17x32xf32>
    %cst_166 = arith.constant dense<0.000000e+00> : vector<17x17xf32>
    %378 = tpu.matmul %377, %347, %cst_166 {dimension_numbers = #tpu.dot_dimension_numbers<[1], [1], [0], [0], [0, 0, 1, 0], [], []>} : vector<17x32xf32>, vector<17x32xf32>, vector<17x17xf32> -> vector<17x17xf32>
    %cst_167 = arith.constant dense<0xFF800000> : vector<17xf32>
    %379 = vector.multi_reduction <maximumf>, %378, %cst_167 [1] : vector<17x17xf32> to vector<17xf32>
    %380 = vector.shape_cast %379 : vector<17xf32> to vector<17x1xf32>
    %381 = vector.broadcast %380 : vector<17x1xf32> to vector<17x17xf32>
    %382 = arith.subf %378, %381 : vector<17x17xf32>
    %383 = math.exp %382 : vector<17x17xf32>
    %cst_168 = arith.constant dense<0.000000e+00> : vector<17xf32>
    %384 = vector.multi_reduction <add>, %383, %cst_168 [1] : vector<17x17xf32> to vector<17xf32>
    %385 = vector.shape_cast %384 : vector<17xf32> to vector<17x1xf32>
    %386 = vector.broadcast %385 : vector<17x1xf32> to vector<17x17xf32>
    %387 = arith.divf %383, %386 : vector<17x17xf32>
    %388 = vector.extract_strided_slice %349 {offsets = [0, 64], sizes = [17, 32], strides = [1, 1]} : vector<17x128xf32> to vector<17x32xf32>
    %cst_169 = arith.constant dense<0.000000e+00> : vector<17x32xf32>
    %389 = tpu.matmul %387, %388, %cst_169 {dimension_numbers = #tpu.dot_dimension_numbers<[1], [0], [0], [1], [0, 0, 1, 1], [], []>} : vector<17x17xf32>, vector<17x32xf32>, vector<17x32xf32> -> vector<17x32xf32>
    %390 = arith.addf %376, %389 : vector<17x32xf32>
    %391 = vector.extract_strided_slice %348 {offsets = [0, 96], sizes = [17, 32], strides = [1, 1]} : vector<17x128xf32> to vector<17x32xf32>
    %cst_170 = arith.constant dense<0.000000e+00> : vector<17x17xf32>
    %392 = tpu.matmul %391, %347, %cst_170 {dimension_numbers = #tpu.dot_dimension_numbers<[1], [1], [0], [0], [0, 0, 1, 0], [], []>} : vector<17x32xf32>, vector<17x32xf32>, vector<17x17xf32> -> vector<17x17xf32>
    %cst_171 = arith.constant dense<0xFF800000> : vector<17xf32>
    %393 = vector.multi_reduction <maximumf>, %392, %cst_171 [1] : vector<17x17xf32> to vector<17xf32>
    %394 = vector.shape_cast %393 : vector<17xf32> to vector<17x1xf32>
    %395 = vector.broadcast %394 : vector<17x1xf32> to vector<17x17xf32>
    %396 = arith.subf %392, %395 : vector<17x17xf32>
    %397 = math.exp %396 : vector<17x17xf32>
    %cst_172 = arith.constant dense<0.000000e+00> : vector<17xf32>
    %398 = vector.multi_reduction <add>, %397, %cst_172 [1] : vector<17x17xf32> to vector<17xf32>
    %399 = vector.shape_cast %398 : vector<17xf32> to vector<17x1xf32>
    %400 = vector.broadcast %399 : vector<17x1xf32> to vector<17x17xf32>
    %401 = arith.divf %397, %400 : vector<17x17xf32>
    %402 = vector.extract_strided_slice %349 {offsets = [0, 96], sizes = [17, 32], strides = [1, 1]} : vector<17x128xf32> to vector<17x32xf32>
    %cst_173 = arith.constant dense<0.000000e+00> : vector<17x32xf32>
    %403 = tpu.matmul %401, %402, %cst_173 {dimension_numbers = #tpu.dot_dimension_numbers<[1], [0], [0], [1], [0, 0, 1, 1], [], []>} : vector<17x17xf32>, vector<17x32xf32>, vector<17x32xf32> -> vector<17x32xf32>
    %404 = arith.addf %390, %403 : vector<17x32xf32>
    %c17_174 = arith.constant 17 : index
    %c0_175 = arith.constant 0 : index
    %405 = vector.load %arg22[%c17_174, %c0_175] : memref<34x32xf32, #tpu.memory_space<vmem>>, vector<17x32xf32>
    tpu.vector_store %arg22[%c17_174, %c0_175], %404 {strides = array<i32>} : memref<34x32xf32, #tpu.memory_space<vmem>>, vector<17x32xf32>,
    %c0_176 = arith.constant 0 : index
    %c0_177 = arith.constant 0 : index
    %406 = vector.load %arg22[%c0_176, %c0_177] : memref<34x32xf32, #tpu.memory_space<vmem>>, vector<34x32xf32>
    %407 = arith.addf %251, %406 : vector<34x32xf32>
    %c1_178 = arith.constant 1 : index
    %c0_179 = arith.constant 0 : index
    %c0_180 = arith.constant 0 : index
    %408 = vector.load %arg12[%c1_178, %c0_179, %c0_180] : memref<2x1x32xf32, #tpu.memory_space<vmem>>, vector<1x1x32xf32>
    %409 = vector.shape_cast %408 : vector<1x1x32xf32> to vector<1x32xf32>
    %410 = vector.broadcast %409 : vector<1x32xf32> to vector<34x32xf32>
    %411 = arith.addf %407, %410 : vector<34x32xf32>
    %c1_181 = arith.constant 1 : index
    %c0_182 = arith.constant 0 : index
    %c0_183 = arith.constant 0 : index
    %412 = vector.load %arg13[%c1_181, %c0_182, %c0_183] : memref<2x1x32xf32, #tpu.memory_space<vmem>>, vector<1x1x32xf32>
    %413 = vector.shape_cast %412 : vector<1x1x32xf32> to vector<1x32xf32>
    %c1_184 = arith.constant 1 : index
    %c0_185 = arith.constant 0 : index
    %c0_186 = arith.constant 0 : index
    %414 = vector.load %arg14[%c1_184, %c0_185, %c0_186] : memref<2x1x32xf32, #tpu.memory_space<vmem>>, vector<1x1x32xf32>
    %415 = vector.shape_cast %414 : vector<1x1x32xf32> to vector<1x32xf32>
    %cst_187 = arith.constant dense<0.000000e+00> : vector<34xf32>
    %416 = vector.multi_reduction <add>, %411, %cst_187 [1] : vector<34x32xf32> to vector<34xf32>
    %417 = vector.shape_cast %416 : vector<34xf32> to vector<34x1xf32>
    %cst_188 = arith.constant 3.200000e+01 : f32
    %418 = vector.broadcast %cst_188 : f32 to vector<34x1xf32>
    %419 = arith.divf %417, %418 : vector<34x1xf32>
    %420 = vector.broadcast %419 : vector<34x1xf32> to vector<34x32xf32>
    %421 = arith.subf %411, %420 : vector<34x32xf32>
    %422 = arith.mulf %421, %421 : vector<34x32xf32>
    %cst_189 = arith.constant dense<0.000000e+00> : vector<34xf32>
    %423 = vector.multi_reduction <add>, %422, %cst_189 [1] : vector<34x32xf32> to vector<34xf32>
    %424 = vector.shape_cast %423 : vector<34xf32> to vector<34x1xf32>
    %cst_190 = arith.constant 3.200000e+01 : f32
    %425 = vector.broadcast %cst_190 : f32 to vector<34x1xf32>
    %426 = arith.divf %424, %425 : vector<34x1xf32>
    %427 = vector.broadcast %419 : vector<34x1xf32> to vector<34x32xf32>
    %428 = arith.subf %411, %427 : vector<34x32xf32>
    %cst_191 = arith.constant 9.99999974E-6 : f32
    %429 = vector.broadcast %cst_191 : f32 to vector<34x1xf32>
    %430 = arith.addf %426, %429 : vector<34x1xf32>
    %431 = math.rsqrt %430 : vector<34x1xf32>
    %432 = vector.broadcast %431 : vector<34x1xf32> to vector<34x32xf32>
    %433 = arith.mulf %428, %432 : vector<34x32xf32>
    %434 = vector.broadcast %413 : vector<1x32xf32> to vector<34x32xf32>
    %435 = arith.mulf %433, %434 : vector<34x32xf32>
    %436 = vector.broadcast %415 : vector<1x32xf32> to vector<34x32xf32>
    %437 = arith.addf %435, %436 : vector<34x32xf32>
    %c1_192 = arith.constant 1 : index
    %c0_193 = arith.constant 0 : index
    %c0_194 = arith.constant 0 : index
    %438 = vector.load %arg15[%c1_192, %c0_193, %c0_194] : memref<2x32x64xf32, #tpu.memory_space<vmem>>, vector<1x32x64xf32>
    %439 = vector.shape_cast %438 : vector<1x32x64xf32> to vector<32x64xf32>
    %cst_195 = arith.constant dense<0.000000e+00> : vector<34x64xf32>
    %440 = tpu.matmul %437, %439, %cst_195 {dimension_numbers = #tpu.dot_dimension_numbers<[1], [0], [0], [1], [0, 0, 1, 1], [], []>} : vector<34x32xf32>, vector<32x64xf32>, vector<34x64xf32> -> vector<34x64xf32>
    %c1_196 = arith.constant 1 : index
    %c0_197 = arith.constant 0 : index
    %c0_198 = arith.constant 0 : index
    %441 = vector.load %arg16[%c1_196, %c0_197, %c0_198] : memref<2x1x64xf32, #tpu.memory_space<vmem>>, vector<1x1x64xf32>
    %442 = vector.shape_cast %441 : vector<1x1x64xf32> to vector<1x64xf32>
    %443 = vector.broadcast %442 : vector<1x64xf32> to vector<34x64xf32>
    %444 = arith.addf %440, %443 : vector<34x64xf32>
    %c1_199 = arith.constant 1 : index
    %c0_200 = arith.constant 0 : index
    %c0_201 = arith.constant 0 : index
    %445 = vector.load %arg17[%c1_199, %c0_200, %c0_201] : memref<2x1x64xf32, #tpu.memory_space<vmem>>, vector<1x1x64xf32>
    %446 = vector.shape_cast %445 : vector<1x1x64xf32> to vector<1x64xf32>
    %c1_202 = arith.constant 1 : index
    %c0_203 = arith.constant 0 : index
    %c0_204 = arith.constant 0 : index
    %447 = vector.load %arg18[%c1_202, %c0_203, %c0_204] : memref<2x1x64xf32, #tpu.memory_space<vmem>>, vector<1x1x64xf32>
    %448 = vector.shape_cast %447 : vector<1x1x64xf32> to vector<1x64xf32>
    %cst_205 = arith.constant dense<0.000000e+00> : vector<34xf32>
    %449 = vector.multi_reduction <add>, %444, %cst_205 [1] : vector<34x64xf32> to vector<34xf32>
    %450 = vector.shape_cast %449 : vector<34xf32> to vector<34x1xf32>
    %cst_206 = arith.constant 6.400000e+01 : f32
    %451 = vector.broadcast %cst_206 : f32 to vector<34x1xf32>
    %452 = arith.divf %450, %451 : vector<34x1xf32>
    %453 = vector.broadcast %452 : vector<34x1xf32> to vector<34x64xf32>
    %454 = arith.subf %444, %453 : vector<34x64xf32>
    %455 = arith.mulf %454, %454 : vector<34x64xf32>
    %cst_207 = arith.constant dense<0.000000e+00> : vector<34xf32>
    %456 = vector.multi_reduction <add>, %455, %cst_207 [1] : vector<34x64xf32> to vector<34xf32>
    %457 = vector.shape_cast %456 : vector<34xf32> to vector<34x1xf32>
    %cst_208 = arith.constant 6.400000e+01 : f32
    %458 = vector.broadcast %cst_208 : f32 to vector<34x1xf32>
    %459 = arith.divf %457, %458 : vector<34x1xf32>
    %460 = vector.broadcast %452 : vector<34x1xf32> to vector<34x64xf32>
    %461 = arith.subf %444, %460 : vector<34x64xf32>
    %cst_209 = arith.constant 9.99999974E-6 : f32
    %462 = vector.broadcast %cst_209 : f32 to vector<34x1xf32>
    %463 = arith.addf %459, %462 : vector<34x1xf32>
    %464 = math.rsqrt %463 : vector<34x1xf32>
    %465 = vector.broadcast %464 : vector<34x1xf32> to vector<34x64xf32>
    %466 = arith.mulf %461, %465 : vector<34x64xf32>
    %467 = vector.broadcast %446 : vector<1x64xf32> to vector<34x64xf32>
    %468 = arith.mulf %466, %467 : vector<34x64xf32>
    %469 = vector.broadcast %448 : vector<1x64xf32> to vector<34x64xf32>
    %470 = arith.addf %468, %469 : vector<34x64xf32>
    %cst_210 = arith.constant 0.000000e+00 : f32
    %471 = vector.broadcast %cst_210 : f32 to vector<34x64xf32>
    %472 = arith.cmpf ogt, %470, %471 : vector<34x64xf32>
    %cst_211 = arith.constant 0.000000e+00 : f32
    %473 = vector.broadcast %cst_211 : f32 to vector<34x64xf32>
    %474 = arith.minimumf %470, %473 : vector<34x64xf32>
    %475 = math.exp %474 : vector<34x64xf32>
    %cst_212 = arith.constant 1.000000e+00 : f32
    %476 = vector.broadcast %cst_212 : f32 to vector<34x64xf32>
    %477 = arith.subf %475, %476 : vector<34x64xf32>
    %478 = arith.select %472, %470, %477 : vector<34x64xi1>, vector<34x64xf32>
    %c1_213 = arith.constant 1 : index
    %c0_214 = arith.constant 0 : index
    %c0_215 = arith.constant 0 : index
    %479 = vector.load %arg19[%c1_213, %c0_214, %c0_215] : memref<2x64x32xf32, #tpu.memory_space<vmem>>, vector<1x64x32xf32>
    %480 = vector.shape_cast %479 : vector<1x64x32xf32> to vector<64x32xf32>
    %cst_216 = arith.constant dense<0.000000e+00> : vector<34x32xf32>
    %481 = tpu.matmul %478, %480, %cst_216 {dimension_numbers = #tpu.dot_dimension_numbers<[1], [0], [0], [1], [0, 0, 1, 1], [], []>} : vector<34x64xf32>, vector<64x32xf32>, vector<34x32xf32> -> vector<34x32xf32>
    %482 = arith.addf %411, %481 : vector<34x32xf32>
    %c1_217 = arith.constant 1 : index
    %c0_218 = arith.constant 0 : index
    %c0_219 = arith.constant 0 : index
    %483 = vector.load %arg20[%c1_217, %c0_218, %c0_219] : memref<2x1x32xf32, #tpu.memory_space<vmem>>, vector<1x1x32xf32>
    %484 = vector.shape_cast %483 : vector<1x1x32xf32> to vector<1x32xf32>
    %485 = vector.broadcast %484 : vector<1x32xf32> to vector<34x32xf32>
    %486 = arith.addf %482, %485 : vector<34x32xf32>
    %487 = vector.extract_strided_slice %486 {offsets = [0, 0], sizes = [1, 32], strides = [1, 1]} : vector<34x32xf32> to vector<1x32xf32>
    %c0_220 = arith.constant 0 : index
    %c0_221 = arith.constant 0 : index
    %488 = vector.load %arg5[%c0_220, %c0_221] : memref<32x128xf32, #tpu.memory_space<vmem>>, vector<32x128xf32>
    %cst_222 = arith.constant dense<0.000000e+00> : vector<1x128xf32>
    %489 = tpu.matmul %487, %488, %cst_222 {dimension_numbers = #tpu.dot_dimension_numbers<[1], [0], [0], [1], [0, 0, 1, 1], [], []>} : vector<1x32xf32>, vector<32x128xf32>, vector<1x128xf32> -> vector<1x128xf32>
    %c0_223 = arith.constant 0 : index
    %c0_224 = arith.constant 0 : index
    %490 = vector.load %arg6[%c0_223, %c0_224] : memref<1x128xf32, #tpu.memory_space<vmem>>, vector<1x128xf32>
    %491 = arith.addf %489, %490 : vector<1x128xf32>
    %c0_225 = arith.constant 0 : index
    %c0_226 = arith.constant 0 : index
    %492 = vector.load %arg21[%c0_225, %c0_226] : memref<2x128xf32, #tpu.memory_space<vmem>>, vector<1x128xf32>
    tpu.vector_store %arg21[%c0_225, %c0_226], %491 {strides = array<i32>} : memref<2x128xf32, #tpu.memory_space<vmem>>, vector<1x128xf32>,
    %493 = vector.extract_strided_slice %486 {offsets = [17, 0], sizes = [1, 32], strides = [1, 1]} : vector<34x32xf32> to vector<1x32xf32>
    %c0_227 = arith.constant 0 : index
    %c0_228 = arith.constant 0 : index
    %494 = vector.load %arg5[%c0_227, %c0_228] : memref<32x128xf32, #tpu.memory_space<vmem>>, vector<32x128xf32>
    %cst_229 = arith.constant dense<0.000000e+00> : vector<1x128xf32>
    %495 = tpu.matmul %493, %494, %cst_229 {dimension_numbers = #tpu.dot_dimension_numbers<[1], [0], [0], [1], [0, 0, 1, 1], [], []>} : vector<1x32xf32>, vector<32x128xf32>, vector<1x128xf32> -> vector<1x128xf32>
    %c0_230 = arith.constant 0 : index
    %c0_231 = arith.constant 0 : index
    %496 = vector.load %arg6[%c0_230, %c0_231] : memref<1x128xf32, #tpu.memory_space<vmem>>, vector<1x128xf32>
    %497 = arith.addf %495, %496 : vector<1x128xf32>
    %c1_232 = arith.constant 1 : index
    %c0_233 = arith.constant 0 : index
    %498 = vector.load %arg21[%c1_232, %c0_233] : memref<2x128xf32, #tpu.memory_space<vmem>>, vector<1x128xf32>
    tpu.vector_store %arg21[%c1_232, %c0_233], %497 {strides = array<i32>} : memref<2x128xf32, #tpu.memory_space<vmem>>, vector<1x128xf32>,
    return
  }
}

</mosaic_0001>

<bundles_post_ra>
// kernel: vit_forward.1
= control target key start
LH: loop header
LB: loop body
LE: loop exit
PB: predicated region body
PF: predicated region fallthrough
CT: control target
= control target key end

     0   :  { %s9148_s0 = inlined_call_operand.vmem [shape: f32[32,64], index: 0, kind: input, shape index: {}]   ;;  %s9149_s1 = inlined_call_operand.vmem [shape: f32[64,32], index: 1, kind: input, shape index: {}]   ;;  %s9150_s2 = inlined_call_operand.vmem [shape: f32[1,32], index: 2, kind: input, shape index: {}]   ;;  %s9151_s3 = inlined_call_operand.vmem [shape: f32[16,32], index: 3, kind: input, shape index: {}]   ;;  %s9152_s4 = inlined_call_operand.vmem [shape: f32[1,32], index: 4, kind: input, shape index: {}]   ;;  %s9153_s5 = inlined_call_operand.vmem [shape: f32[32,128], index: 5, kind: input, shape index: {}]   ;;  %s9154_s6 = inlined_call_operand.vmem [shape: f32[1,128], index: 6, kind: input, shape index: {}]   ;;  %s9155_s7 = inlined_call_operand.vmem [shape: f32[2,1,32], index: 7, kind: input, shape index: {}]   ;;  %s9156_s8 = inlined_call_operand.vmem [shape: f32[2,1,32], index: 8, kind: input, shape index: {}]   ;;  %s9157_s9 = inlined_call_operand.vmem [shape: f32[2,32,128], index: 9, kind: input, shape index: {}]   ;;  %s9158_s10 = inlined_call_operand.vmem [shape: f32[2,1,128], index: 10, kind: input, shape index: {}]   ;;  %s9159_s11 = inlined_call_operand.vmem [shape: f32[2,32,128], index: 11, kind: input, shape index: {}]   ;;  %s9160_s12 = inlined_call_operand.vmem [shape: f32[2,1,32], index: 12, kind: input, shape index: {}]   ;;  %s9161_s13 = inlined_call_operand.vmem [shape: f32[2,1,32], index: 13, kind: input, shape index: {}]   ;;  %s9162_s14 = inlined_call_operand.vmem [shape: f32[2,1,32], index: 14, kind: input, shape index: {}]   ;;  %s9163_s15 = inlined_call_operand.vmem [shape: f32[2,32,64], index: 15, kind: input, shape index: {}]   ;;  %s9164_s16 = inlined_call_operand.vmem [shape: f32[2,1,64], index: 16, kind: input, shape index: {}]   ;;  %s9165_s17 = inlined_call_operand.vmem [shape: f32[2,1,64], index: 17, kind: input, shape index: {}]   ;;  %s9166_s18 = inlined_call_operand.vmem [shape: f32[2,1,64], index: 18, kind: input, shape index: {}]   ;;  %s9167_s19 = inlined_call_operand.vmem [shape: f32[2,64,32], index: 19, kind: input, shape index: {}]   ;;  %s9168_s20 = inlined_call_operand.vmem [shape: f32[2,1,32], index: 20, kind: input, shape index: {}]   ;;  %s9169_s21 = inlined_call_operand.hbm [shape: f32[2,128], index: 21, kind: output, shape index: {}]  }
   0x1   :  { %9174 = sst [smem:[#allocation6_spill]] %s9148_s0 }
   0x2   :  { %9175 = sst [smem:[#allocation7_spill]] %s9149_s1 }
   0x3   :  { %9176 = sst [smem:[#allocation8_spill]] %s9150_s2 }
   0x4   :  { %9177 = sst [smem:[#allocation9_spill]] %s9151_s3 }
   0x5   :  { %9178 = sst [smem:[#allocation10_spill]] %s9152_s4 }
   0x6   :  { %9179 = sst [smem:[#allocation11_spill]] %s9153_s5 }
   0x7   :  { %s9180_s26 = sld [smem:[#allocation7_spill]]  ;;  %vm88_vm0 = vcmask 523264  }
   0x8   :  { %s9181_s30 = sld [smem:[#allocation6_spill]] }
   0xd   :  { %v80_v0 = vld [vmem:[%s9180_s26 + $0x38] sm:$0xff]  ;;  %v79_v1 = vld [vmem:[%s9180_s26 + $0x30] sm:$0xff]  ;;  %v78_v2 = vld [vmem:[%s9180_s26 + $0x28] sm:$0xff] }
   0xe   :  { %6133 = vmatprep.subr.mxu0 %v80_v0  ;;  %v69_v3 = vld [vmem:[%s9181_s30] sm:$0xff] }
   0xf   :  { %6134 = vmatpush3.msra.mxu0 %v80_v0  ;;  %6149 = vmatprep.mubr.msk.f32.mxu0 %vm88_vm0, %v69_v3  ;;  %v77_v4 = vld [vmem:[%s9180_s26 + $0x20] sm:$0xff] }
  0x10   :  { %6135 = vmatprep.subr.mxu0 %v79_v1 }
  0x11   :  { %6136 = vmatpush3.msra.mxu0 %v79_v1 }
  0x12   :  { %26 = vsyncpa [#allocation4], 0  ;;  %6137 = vmatprep.subr.mxu0 %v78_v2  ;;  %v76_v5 = vld [vmem:[%s9180_s26 + $0x18] sm:$0xff]  ;;  %v75_v6 = vld [vmem:[%s9180_s26 + $0x10] sm:$0xff]  ;;  %s9182_s24 = sld [smem:[#allocation10_spill]]  ;;  %vm189_vm1 = vcmask 253952  }
  0x13   :  { %6138 = vmatpush3.msra.mxu0 %v78_v2  ;;  %v74_v7 = vld [vmem:[%s9180_s26 + $0x8] sm:$0xff]  ;;  %v73_v8 = vld [vmem:[%s9180_s26] sm:$0xff]  ;;  %v71_v10 = vld [vmem:[%s9181_s30 + $0x10] sm:$0xff]  ;;  %s9183_s27 = sld [smem:[#allocation8_spill]]  ;;  %vm193_vm2 = vcmask 261120   ;;  %vm220_vm3 = vcmask 254976  }
  0x14   :  { %6139 = vmatprep.subr.mxu0 %v77_v4  ;;  %v70_v9 = vld [vmem:[%s9181_s30 + $0x8] sm:$0xff]  ;;  %v72_v11 = vld [vmem:[%s9181_s30 + $0x18] sm:$0xff]  ;;  %s9184_s29 = sld [smem:[#allocation9_spill]]  ;;  %v7157_v53 = vmov 0.0   ;;  %v299_v56 = vld [vmem:[%s9157_s9 + $0x10] sm:$0xff]  ;;  %vm7158_vm4 = vmmov 0  }
  0x15   :  { %6140 = vmatpush3.msra.mxu0 %v77_v4  ;;  %6155 = vmatprep.subr.mxu1 %v7157_v53  ;;  %v300_v54 = vld [vmem:[%s9157_s9 + $0x18] sm:$0xff]  ;;  %v415_v57 = vld [vmem:[%s9159_s11 + $0x10] sm:$0xff]  ;;  %v298_v58 = vld [vmem:[%s9157_s9 + $0x8] sm:$0xff]  ;;  %s7159_s2 = smov 96   ;;  %vm776_vm5 = vcmask 1040384   ;;  %vm596_vm6 = vcmask 138240  }
  0x16   :  { %6141 = vmatprep.subr.mxu0 %v76_v5  ;;  %v416_v55 = vld [vmem:[%s9159_s11 + $0x18] sm:$0xff]  ;;  %6156 = vmatpush3.msra.mxu1 %v300_v54  ;;  %v414_v59 = vld [vmem:[%s9159_s11 + $0x8] sm:$0xff]  ;;  %v297_v60 = vld [vmem:[%s9157_s9] sm:$0xff]  ;;  %vm603_vm7 = vcmask 131072   ;;  %s7160_s25 = smov 64   ;;  %vm1409_vm8 = vcmask 1046528  }
  0x17   :  { %6142 = vmatpush3.msra.mxu0 %v76_v5  ;;  %6157 = vmatprep.subr.mxu1 %v7157_v53  ;;  %v413_v61 = vld [vmem:[%s9159_s11] sm:$0xff]  ;;  %vm2567_vm11 = vcmask 517120   ;;  %s7162_s22 = smov [#allocation3]  }
  0x18   :  { %6143 = vmatprep.subr.mxu0 %v75_v6  ;;  %v188_v12 = vld [vmem:[%s9182_s24] sm:$0x1]  ;;  %6158 = vmatpush3.msra.mxu1 %v299_v56 }
  0x19   :  { %6144 = vmatpush3.msra.mxu0 %v75_v6  ;;  %190 = vst.msk [vmem:[#allocation2] sm:$0x1] %vm189_vm1, %v188_v12  ;;  %196 = vst.msk [vmem:[#allocation2 + $0x11] sm:$0x1] %vm189_vm1, %v188_v12  ;;  %v5572_v13 = vld [vmem:[%s9183_s27] ss:$0 sm:$0xff]  ;;  %6159 = vmatprep.subr.mxu1 %v7157_v53 }
  0x1a   :  { %6145 = vmatprep.subr.mxu0 %v74_v7  ;;  %v187_v15 = vld [vmem:[%s9184_s29 + $0x8] sm:$0xff]  ;;  %v186_v18 = vld [vmem:[%s9184_s29] sm:$0xff]  ;;  %6160 = vmatpush3.msra.mxu1 %v298_v58  ;;  %s7161_s27 = smov 32  }
  0x1b   :  { %6146 = vmatpush3.msra.mxu0 %v74_v7  ;;  %6161 = vmatprep.subr.mxu1 %v7157_v53 }
  0x1c   :  { %6147 = vmatprep.subr.mxu0 %v73_v8  ;;  %6162 = vmatpush3.msra.mxu1 %v297_v60 }
  0x1d   :  { %6148 = vmatpush3.msra.mxu0 %v73_v8  ;;  %6163 = vmatprep.mubr.msk.f32.mxu1 %vm7158_vm4, %v7157_v53 }
  0x1e   :  { %6150 = vmatmul.mubr.msk.f32.vlgmr.msra.gmra.mxu0 %vm88_vm0, %v70_v9  ;;  %6178 = vmatprep.subr.mxu0 %v7157_v53 }
  0x1f   :  { %6152 = vmatprep.mubr.msk.f32.mxu0 %vm88_vm0, %v71_v10  ;;  %6179 = vmatpush3.msra.mxu0 %v416_v55 }
  0x20   :  { %6180 = vmatprep.subr.mxu0 %v7157_v53  ;;  %6201 = vmatprep.subr.mxu1 %v7157_v53 }
  0x21   :  { %6181 = vmatpush3.msra.mxu0 %v415_v57 }
  0x22   :  { %6153 = vmatmul.mubr.msk.f32.gmra.mxu0 %vm88_vm0, %v72_v11  ;;  %6182 = vmatprep.subr.mxu0 %v7157_v53 }
  0x23   :  { %6183 = vmatpush3.msra.mxu0 %v414_v59  ;;  %6186 = vmatprep.mubr.msk.f32.mxu0 %vm7158_vm4, %v7157_v53 }
  0x24   :  { %6184 = vmatprep.subr.mxu0 %v7157_v53 }
  0x25   :  { %6185 = vmatpush3.msra.mxu0 %v413_v61 }
  0x26   :  { %6231 = vmatprep.subr.mxu0 %v7157_v53 }
  0xde   :  { %v6151_v14 = vpop.f32.mrf.mxu0 }
  0xdf   :  { %v173_v16 = vadd.f32 %v6151_v14, %v5572_v13 }
  0xe0   :  { %v167_v17 = vpop.f32.mrf.mxu0 }
  0xe1   :  { %v192_v19 = vadd.f32 %v187_v15, %v173_v16  ;;  %v168_v20 = vadd.f32 %v5572_v13, %v167_v17 }
  0xe2   :  { %v6154_v21 = vpop.f32.mrf.mxu0 }
  0xe3   :  { %195 = vst.msk [vmem:[#allocation2 + $0x9] sm:$0xff] %vm193_vm2, %v192_v19  ;;  %v191_v22 = vadd.f32 %v186_v18, %v168_v20  ;;  %v183_v23 = vadd.f32 %v6154_v21, %v5572_v13  ;;  %v5578_v20 = vld [vmem:[%s9156_s8] ss:$0 sm:$0xff] }
  0xe4   :  { %v177_v24 = vpop.f32.mrf.mxu0 }
  0xe5   :  { %194 = vst.msk [vmem:[#allocation2 + $0x1] sm:$0xff] %vm193_vm2, %v191_v22  ;;  %v198_v25 = vadd.f32 %v187_v15, %v183_v23  ;;  %v178_v26 = vadd.f32 %v5572_v13, %v177_v24 }
  0xe7   :  { %200 = vst.msk [vmem:[#allocation2 + $0x1a] sm:$0xff] %vm193_vm2, %v198_v25  ;;  %v197_v27 = vadd.f32 %v186_v18, %v178_v26  ;;  %v5577_v18 = vld [vmem:[%s9155_s7] ss:$0 sm:$0xff] }
  0xe9   :  { %199 = vst.msk [vmem:[#allocation2 + $0x12] sm:$0xff] %vm193_vm2, %v197_v27 }
  0xec   :  { %v7331_v28 = vld [vmem:[#allocation2] sm:$0xff]  ;;  %v7335_v30 = vld [vmem:[#allocation2 + $0x8] sm:$0xff] }
  0xed   :  { %v208_v29 = vsel %vm193_vm2, %v7331_v28, 0.0  ;;  %v211_v33 = vsel %vm193_vm2, %v7335_v30, 0.0 }
  0xee   :  { %209 = vadd.xlane.f32.xlu0 %v208_v29  ;;  %v7361_v49 = vld [vmem:[#allocation2 + $0x20] sm:$0x3] }
  0xef   :  { %v221_v51 = vsel %vm220_vm3, %v7361_v49, 0.0 }
  0xf0   :  { %v7337_v31 = vld [vmem:[#allocation2 + $0x10] sm:$0xff]  ;;  %v7363_v50 = vld [vmem:[#allocation2 + $0x18] sm:$0xff] }
  0xf1   :  { %v214_v32 = vsel %vm193_vm2, %v7337_v31, 0.0  ;;  %v217_v52 = vsel %vm193_vm2, %v7363_v50, 0.0 }
  0xf2   :  { %215 = vadd.xlane.f32.xlu1 %v214_v32  ;;  %212 = vadd.xlane.f32.xlu0 %v211_v33 }
 0x177   :  { %v210_v34 = vpop.xlane.xlu0 %209 }
 0x178   :  { %v225_v35 = vmul.f32 0.03125, %v210_v34 }
 0x17a   :  { %v7344_v36 = vsub.f32 %v7331_v28, %v225_v35 }
 0x17b   :  { %v216_v37 = vpop.xlane.xlu1 %215  ;;  %v213_v38 = vpop.xlane.xlu0 %212 }
 0x17c   :  { %v227_v39 = vmul.f32 0.03125, %v216_v37  ;;  %v226_v40 = vmul.f32 0.03125, %v213_v38  ;;  %v235_v41 = vmul.f32 %v7344_v36, %v7344_v36 }
 0x17e   :  { %v7349_v42 = vsub.f32 %v7337_v31, %v227_v39  ;;  %v7352_v43 = vsub.f32 %v7335_v30, %v226_v40  ;;  %v240_v44 = vsel %vm193_vm2, %v235_v41, 0.0 }
 0x17f   :  { %241 = vadd.xlane.f32.xlu1 %v240_v44 }
 0x180   :  { %v237_v45 = vmul.f32 %v7349_v42, %v7349_v42  ;;  %v236_v46 = vmul.f32 %v7352_v43, %v7352_v43 }
 0x182   :  { %v246_v47 = vsel %vm193_vm2, %v237_v45, 0.0  ;;  %v243_v48 = vsel %vm193_vm2, %v236_v46, 0.0 }
 0x183   :  { %247 = vadd.xlane.f32.xlu1 %v246_v47  ;;  %244 = vadd.xlane.f32.xlu0 %v243_v48  ;;  %v7482_v48 = vld [vmem:[%s9158_s10] ss:$0 sm:$0xff] }
 0x187   :  { %222 = vadd.xlane.f32.xlu1 %v221_v51  ;;  %218 = vadd.xlane.f32.xlu0 %v217_v52 }
 0x208   :  { %v242_v62 = vpop.xlane.xlu1 %241 }
 0x209   :  { %v255_v63 = vmul.f32 0.03125, %v242_v62 }
 0x20b   :  { %v260_v0 = vadd.f32 1e-05, %v255_v63 }
 0x20c   :  { %v248_v1 = vpop.xlane.xlu1 %247  ;;  %v245_v2 = vpop.xlane.xlu0 %244 }
 0x20d   :  { %6863 = vrsqrt.f32 %v260_v0  ;;  %v257_v3 = vmul.f32 0.03125, %v248_v1  ;;  %v256_v4 = vmul.f32 0.03125, %v245_v2 }
 0x20f   :  { %v262_v5 = vadd.f32 1e-05, %v257_v3  ;;  %v261_v6 = vadd.f32 1e-05, %v256_v4 }
 0x210   :  { %v223_v7 = vpop.xlane.xlu1 %222  ;;  %v219_v8 = vpop.xlane.xlu0 %218 }
 0x211   :  { %6865 = vrsqrt.f32 %v262_v5  ;;  %v229_v9 = vmul.f32 0.03125, %v223_v7  ;;  %v228_v10 = vmul.f32 0.03125, %v219_v8 }
 0x212   :  { %6867 = vrsqrt.f32 %v261_v6 }
 0x213   :  { %v234_v11 = vsub.f32 %v7361_v49, %v229_v9  ;;  %v233_v12 = vsub.f32 %v7363_v50, %v228_v10 }
 0x215   :  { %v239_v13 = vmul.f32 %v234_v11, %v234_v11  ;;  %v238_v14 = vmul.f32 %v233_v12, %v233_v12 }
 0x217   :  { %v252_v15 = vsel %vm220_vm3, %v239_v13, 0.0  ;;  %v249_v16 = vsel %vm193_vm2, %v238_v14, 0.0 }
 0x218   :  { %253 = vadd.xlane.f32.xlu1 %v252_v15  ;;  %250 = vadd.xlane.f32.xlu0 %v249_v16 }
 0x21a   :  { %v6864_v17 = vpop.eup %6863 }
 0x21b   :  { %v270_v19 = vmul.f32 %v6864_v17, %v7344_v36 }
 0x21d   :  { %v281_v21 = vmul.f32 %v5577_v18, %v270_v19 }
 0x21e   :  { %v6866_v22 = vpop.eup %6865 }
 0x21f   :  { %v6868_v23 = vpop.eup %6867  ;;  %v272_v24 = vmul.f32 %v6866_v22, %v7349_v42  ;;  %v7419_v25 = vadd.f32 %v5578_v20, %v281_v21 }
 0x220   :  { %v271_v26 = vmul.f32 %v6868_v23, %v7352_v43 }
 0x221   :  { %v283_v27 = vmul.f32 %v5577_v18, %v272_v24  ;;  %6164 = vmatmul.mubr.msk.f32.vlgmr.msra.gmra.mxu1 %vm193_vm2, %v7419_v25  ;;  %6187 = vmatmul.mubr.msk.f32.vlgmr.msra.gmra.mxu0 %vm193_vm2, %v7419_v25 }
 0x222   :  { %v282_v29 = vmul.f32 %v5577_v18, %v271_v26  ;;  %6166 = vmatprep.mubr.msk.f32.mxu1 %vm7158_vm4, %v7157_v53  ;;  %6189 = vmatprep.mubr.msk.f32.mxu0 %vm7158_vm4, %v7157_v53 }
 0x223   :  { %v7430_v32 = vadd.f32 %v5578_v20, %v283_v27 }
 0x224   :  { %v7432_v33 = vadd.f32 %v5578_v20, %v282_v29 }
 0x225   :  { %6202 = vmatpush3.xpose.msk.msra.mxu1 %vm193_vm2, %v7430_v32 }
 0x226   :  { %6167 = vmatmul.mubr.msk.f32.gmra.mxu1 %vm193_vm2, %v7432_v33  ;;  %6190 = vmatmul.mubr.msk.f32.gmra.mxu0 %vm193_vm2, %v7432_v33 }
 0x227   :  { %6169 = vmatprep.mubr.msk.f32.mxu1 %vm7158_vm4, %v7157_v53  ;;  %6192 = vmatprep.mubr.msk.f32.mxu0 %vm7158_vm4, %v7157_v53 }
 0x228   :  { %6203 = vmatprep.subr.mxu1 %v7157_v53 }
 0x229   :  { %6204 = vmatpush3.xpose.msk.msra.mxu1 %vm193_vm2, %v7432_v33 }
 0x22a   :  { %6170 = vmatmul.mubr.msk.f32.gmra.mxu1 %vm193_vm2, %v7430_v32  ;;  %6193 = vmatmul.mubr.msk.f32.gmra.mxu0 %vm193_vm2, %v7430_v32 }
 0x22b   :  { %6205 = vmatprep.subr.mxu1 %v7157_v53  ;;  %6172 = vmatprep.mubr.msk.f32.mxu1 %vm7158_vm4, %v7157_v53 }
 0x22c   :  { %6195 = vmatprep.mubr.msk.f32.mxu0 %vm7158_vm4, %v7157_v53 }
 0x22d   :  { %6206 = vmatpush3.xpose.msk.msra.mxu1 %vm193_vm2, %v7419_v25 }
 0x22e   :  { %6216 = vmatprep.subr.mxu1 %v7157_v53 }
 0x2a1   :  { %v254_v34 = vpop.xlane.xlu1 %253  ;;  %v251_v35 = vpop.xlane.xlu0 %250 }
 0x2a2   :  { %v259_v36 = vmul.f32 0.03125, %v254_v34  ;;  %v258_v37 = vmul.f32 0.03125, %v251_v35 }
 0x2a4   :  { %v264_v38 = vadd.f32 1e-05, %v259_v36  ;;  %v263_v39 = vadd.f32 1e-05, %v258_v37 }
 0x2a6   :  { %6869 = vrsqrt.f32 %v264_v38 }
 0x2a7   :  { %6871 = vrsqrt.f32 %v263_v39 }
 0x2b3   :  { %v6870_v40 = vpop.eup %6869 }
 0x2b4   :  { %v6872_v41 = vpop.eup %6871  ;;  %v274_v43 = vmul.f32 %v6870_v40, %v234_v11 }
 0x2b5   :  { %v273_v42 = vmul.f32 %v6872_v41, %v233_v12 }
 0x2b6   :  { %v285_v46 = vmul.f32 %v5577_v18, %v274_v43 }
 0x2b7   :  { %v284_v44 = vmul.f32 %v5577_v18, %v273_v42 }
 0x2b8   :  { %v7469_v47 = vadd.f32 %v5578_v20, %v285_v46 }
 0x2b9   :  { %v7459_v45 = vadd.f32 %v5578_v20, %v284_v44 }
 0x2bb   :  { %6173 = vmatmul.mubr.msk.f32.gmra.mxu1 %vm193_vm2, %v7459_v45  ;;  %6196 = vmatmul.mubr.msk.f32.gmra.mxu0 %vm193_vm2, %v7459_v45 }
 0x2bc   :  { %6175 = vmatprep.mubr.msk.f32.mxu1 %vm7158_vm4, %v7157_v53  ;;  %6198 = vmatprep.mubr.msk.f32.mxu0 %vm7158_vm4, %v7157_v53 }
 0x2bf   :  { %6176 = vmatmul.mubr.msk.f32.gmra.mxu1 %vm193_vm2, %v7469_v47  ;;  %6199 = vmatmul.mubr.msk.f32.gmra.mxu0 %vm193_vm2, %v7469_v47 }
 0x2c0   :  { %6207 = vmatprep.mubr.msk.f32.mxu1 %vm7158_vm4, %v7157_v53  ;;  %6237 = vmatprep.mubr.msk.f32.mxu0 %vm7158_vm4, %v7157_v53 }
 0x2e1   :  { %v389_v51 = vpop.f32.mrf.mxu1  ;;  %v7484_v52 = vpop.f32.mrf.mxu0 }
 0x2e2   :  { %v7487_v54 = vadd.f32 %v7482_v48, %v389_v51 }
 0x2e3   :  { %v6165_v55 = vpop.f32.mrf.mxu1  ;;  %v6188_v56 = vpop.f32.mrf.mxu0 }
 0x2e4   :  { %631 = vrot.lane.b32.xlu0 %v7487_v54, %s7159_s2  ;;  %6208 = vmatmul.mubr.msk.f32.vlgmr.msra.gmra.mxu1 %vm193_vm2, %v7487_v54 }
 0x2e5   :  { %6217 = vmatpush3.xpose.msk.msra.mxu1 %vm193_vm2, %v7430_v32  ;;  %6210 = vmatprep.mubr.msk.f32.mxu1 %vm7158_vm4, %v7157_v53 }
 0x2e6   :  { %v394_v57 = vpop.f32.mrf.mxu1  ;;  %v7497_v58 = vpop.f32.mrf.mxu0  ;;  %6218 = vmatprep.subr.mxu1 %v7157_v53 }
 0x2e7   :  { %v7501_v59 = vadd.f32 %v7482_v48, %v394_v57 }
 0x2e8   :  { %v6168_v60 = vpop.f32.mrf.mxu1  ;;  %v6191_v61 = vpop.f32.mrf.mxu0 }
 0x2e9   :  { %633 = vrot.lane.b32.xlu1 %v7501_v59, %s7159_s2  ;;  %6211 = vmatmul.mubr.msk.f32.gmra.mxu1 %vm193_vm2, %v7501_v59 }
 0x2ea   :  { %6219 = vmatpush3.xpose.msk.msra.mxu1 %vm193_vm2, %v7432_v33  ;;  %v399_v62 = vpop.f32.mrf.mxu1  ;;  %v7509_v63 = vpop.f32.mrf.mxu0  ;;  %6213 = vmatprep.mubr.msk.f32.mxu1 %vm7158_vm4, %v7157_v53 }
 0x2eb   :  { %v7514_v0 = vadd.f32 %v7482_v48, %v399_v62  ;;  %6220 = vmatprep.subr.mxu1 %v7157_v53 }
 0x2ec   :  { %v6171_v1 = vpop.f32.mrf.mxu1  ;;  %v6194_v2 = vpop.f32.mrf.mxu0 }
 0x2ed   :  { %635 = vrot.lane.b32.xlu1 %v7514_v0, %s7159_s2  ;;  %6214 = vmatmul.mubr.msk.f32.gmra.mxu1 %vm193_vm2, %v7514_v0 }
 0x2ee   :  { %6221 = vmatpush3.xpose.msk.msra.mxu1 %vm193_vm2, %v7419_v25  ;;  %6222 = vmatprep.mubr.msk.f32.mxu1 %vm7158_vm4, %v7157_v53 }
 0x2ef   :  { %6246 = vmatprep.subr.mxu1 %v7157_v53 }
 0x356   :  { %v632_v3 = vpop.permute.xlu0 %631 }
 0x357   :  { %6223 = vmatmul.mubr.msk.f32.vlgmr.msra.gmra.mxu1 %vm193_vm2, %v632_v3 }
 0x358   :  { %6247 = vmatpush3.msk.msra.mxu1 %vm776_vm5, %v7509_v63  ;;  %6225 = vmatprep.mubr.msk.f32.mxu1 %vm7158_vm4, %v7157_v53 }
 0x359   :  { %6248 = vmatprep.subr.mxu1 %v7157_v53 }
 0x35a   :  { %6249 = vmatpush3.msra.mxu1 %v7497_v58 }
 0x35b   :  { %v634_v4 = vpop.permute.xlu1 %633  ;;  %6250 = vmatprep.subr.mxu1 %v7157_v53 }
 0x35c   :  { %6226 = vmatmul.mubr.msk.f32.gmra.mxu1 %vm193_vm2, %v634_v4 }
 0x35d   :  { %6251 = vmatpush3.msra.mxu1 %v7484_v52  ;;  %6228 = vmatprep.mubr.msk.f32.mxu1 %vm7158_vm4, %v7157_v53 }
 0x35e   :  { %6276 = vmatprep.subr.mxu1 %v7157_v53 }
 0x35f   :  { %v636_v5 = vpop.permute.xlu1 %635 }
 0x360   :  { %6229 = vmatmul.mubr.msk.f32.gmra.mxu1 %vm193_vm2, %v636_v5 }
 0x361   :  { %6252 = vmatprep.mubr.msk.f32.mxu1 %vm7158_vm4, %v7157_v53 }
 0x37b   :  { %v7542_v6 = vpop.f32.mrf.mxu1  ;;  %v7544_v7 = vpop.f32.mrf.mxu0 }
 0x37d   :  { %v6174_v8 = vpop.f32.mrf.mxu1  ;;  %v6197_v9 = vpop.f32.mrf.mxu0 }
 0x37f   :  { %v7546_v10 = vpop.f32.mrf.mxu1  ;;  %v7548_v11 = vpop.f32.mrf.mxu0 }
 0x381   :  { %v6177_v12 = vpop.f32.mrf.mxu1  ;;  %v6200_v13 = vpop.f32.mrf.mxu0 }
 0x3a4   :  { %v7550_v14 = vpop.f32.mrf.mxu1 }
 0x3a5   :  { %v597_v61 = vsel %vm596_vm6, %v7550_v14, -inf }
 0x3a6   :  { %v6209_v15 = vpop.f32.mrf.mxu1 }
 0x3a9   :  { %v7552_v16 = vpop.f32.mrf.mxu1 }
 0x3aa   :  { %v600_v62 = vsel %vm596_vm6, %v7552_v16, -inf }
 0x3ab   :  { %v6212_v17 = vpop.f32.mrf.mxu1 }
 0x3ad   :  { %v7554_v18 = vpop.f32.mrf.mxu1 }
 0x3ae   :  { %v604_v1 = vsel %vm603_vm7, %v7554_v18, -inf }
 0x3af   :  { %v6215_v19 = vpop.f32.mrf.mxu1 }
 0x417   :  { %v709_v20 = vpop.f32.mrf.mxu1 }
 0x418   :  { %v723_v21 = vsel %vm596_vm6, %v709_v20, -inf }
 0x419   :  { %724 = vmax.xlane.f32.xlu1 %v723_v21  ;;  %v6224_v22 = vpop.f32.mrf.mxu1 }
 0x41a   :  { %v7627_v22 = vrot.slane %v7469_v47, 1 }
 0x41c   :  { %v714_v23 = vpop.f32.mrf.mxu1 }
 0x41d   :  { %v726_v24 = vsel %vm596_vm6, %v714_v23, -inf }
 0x41e   :  { %727 = vmax.xlane.f32.xlu0 %v726_v24  ;;  %v6227_v26 = vpop.f32.mrf.mxu1 }
 0x420   :  { %v719_v27 = vpop.f32.mrf.mxu1 }
 0x421   :  { %v729_v29 = vsel %vm603_vm7, %v719_v27, -inf }
 0x422   :  { %730 = vmax.xlane.f32.xlu0 %v729_v29  ;;  %v6230_v34 = vpop.f32.mrf.mxu1  ;;  %v1410_v29 = vrot.slane %v7514_v0, 1 }
 0x42a   :  { %763 = vrot.lane.b32.xlu1 %v7509_v63, %s7159_s2 }
 0x4a2   :  { %v725_v35 = vpop.xlane.xlu1 %724 }
 0x4a3   :  { %v732_v36 = vsub.f32 %v709_v20, %v725_v35 }
 0x4a5   :  { %v735_v37 = vmul.f32 1.442695, %v732_v36 }
 0x4a6   :  { %v764_v38 = vpop.permute.xlu1 %763 }
 0x4a7   :  { %6873 = vpow2.f32 %v735_v37  ;;  %v728_v39 = vpop.xlane.xlu0 %727  ;;  %6232 = vmatpush3.msk.msra.mxu0 %vm776_vm5, %v764_v38 }
 0x4a8   :  { %v733_v40 = vsub.f32 %v714_v23, %v728_v39  ;;  %6233 = vmatprep.subr.mxu0 %v7157_v53 }
 0x4aa   :  { %v737_v41 = vmul.f32 1.442695, %v733_v40 }
 0x4ab   :  { %v731_v42 = vpop.xlane.xlu0 %730 }
 0x4ac   :  { %6875 = vpow2.f32 %v737_v41  ;;  %v734_v43 = vsub.f32 %v719_v27, %v731_v42 }
 0x4ae   :  { %v739_v44 = vmul.f32 1.442695, %v734_v43 }
 0x4b0   :  { %6877 = vpow2.f32 %v739_v44 }
 0x4b4   :  { %v6874_v46 = vpop.eup %6873 }
 0x4b5   :  { %v741_v51 = vsel %vm596_vm6, %v6874_v46, 0.0 }
 0x4b6   :  { %742 = vadd.xlane.f32.xlu0 %v741_v51 }
 0x4b9   :  { %v6876_v55 = vpop.eup %6875 }
 0x4ba   :  { %v744_v56 = vsel %vm596_vm6, %v6876_v55, 0.0 }
 0x4bb   :  { %745 = vadd.xlane.f32.xlu1 %v744_v56 }
 0x4bd   :  { %v6878_v57 = vpop.eup %6877 }
 0x4be   :  { %v747_v60 = vsel %vm603_vm7, %v6878_v57, 0.0 }
 0x4bf   :  { %748 = vadd.xlane.f32.xlu0 %v747_v60 }
 0x4cc   :  { %759 = vrot.lane.b32.xlu1 %v7484_v52, %s7159_s2 }
 0x4d0   :  { %950 = vrot.lane.b32.xlu1 %v7487_v54, %s7160_s25 }
 0x4d4   :  { %952 = vrot.lane.b32.xlu1 %v7501_v59, %s7160_s25 }
 0x4d5   :  { %761 = vrot.lane.b32.xlu0 %v7497_v58, %s7159_s2 }
 0x4d8   :  { %1177 = vrot.lane.b32.xlu1 %v7487_v54, %s7161_s27 }
 0x4d9   :  { %954 = vrot.lane.b32.xlu0 %v7514_v0, %s7160_s25 }
 0x4dc   :  { %1181 = vrot.lane.b32.xlu1 %v7514_v0, %s7161_s27 }
 0x4dd   :  { %1179 = vrot.lane.b32.xlu0 %v7501_v59, %s7161_s27 }
 0x4fc   :  { %598 = vmax.xlane.f32.xlu0 %v597_v61 }
 0x500   :  { %601 = vmax.xlane.f32.xlu1 %v600_v62  ;;  %605 = vmax.xlane.f32.xlu0 %v604_v1 }
 0x53f   :  { %v743_v54 = vpop.xlane.xlu0 %742 }
 0x540   :  { %6879 = vrcp.f32 %v743_v54 }
 0x544   :  { %v746_v2 = vpop.xlane.xlu1 %745 }
 0x545   :  { %6881 = vrcp.f32 %v746_v2 }
 0x548   :  { %v749_v3 = vpop.xlane.xlu0 %748  ;;  %v760_v8 = vpop.permute.xlu1 %759 }
 0x549   :  { %6883 = vrcp.f32 %v749_v3 }
 0x54c   :  { %v762_v4 = vpop.permute.xlu0 %761  ;;  %v951_v17 = vpop.permute.xlu1 %950 }
 0x54d   :  { %v6880_v59 = vpop.eup %6879  ;;  %6234 = vmatpush3.msra.mxu0 %v762_v4 }
 0x54e   :  { %v751_v5 = vmul.f32 %v6880_v59, %v6874_v46  ;;  %6235 = vmatprep.subr.mxu0 %v7157_v53 }
 0x54f   :  { %6236 = vmatpush3.msra.mxu0 %v760_v8 }
 0x550   :  { %6261 = vmatprep.subr.mxu0 %v7157_v53  ;;  %6238 = vmatmul.mubr.msk.f32.vlgmr.msra.gmra.mxu0 %vm596_vm6, %v751_v5  ;;  %v953_v19 = vpop.permute.xlu1 %952  ;;  %v955_v20 = vpop.permute.xlu0 %954 }
 0x551   :  { %6262 = vmatpush3.xpose.msk.msra.mxu0 %vm193_vm2, %v7430_v32  ;;  %6240 = vmatprep.mubr.msk.f32.mxu0 %vm7158_vm4, %v7157_v53 }
 0x552   :  { %v6882_v9 = vpop.eup %6881  ;;  %6263 = vmatprep.subr.mxu0 %v7157_v53 }
 0x553   :  { %v753_v12 = vmul.f32 %v6882_v9, %v6876_v55 }
 0x554   :  { %v1178_v21 = vpop.permute.xlu1 %1177  ;;  %v1180_v23 = vpop.permute.xlu0 %1179 }
 0x555   :  { %6241 = vmatmul.mubr.msk.f32.gmra.mxu0 %vm596_vm6, %v753_v12 }
 0x556   :  { %v6884_v13 = vpop.eup %6883  ;;  %6264 = vmatpush3.xpose.msk.msra.mxu0 %vm193_vm2, %v7432_v33  ;;  %6243 = vmatprep.mubr.msk.f32.mxu0 %vm7158_vm4, %v7157_v53 }
 0x557   :  { %6265 = vmatprep.subr.mxu0 %v7157_v53  ;;  %v755_v15 = vmul.f32 %v6884_v13, %v6878_v57 }
 0x558   :  { %v1182_v26 = vpop.permute.xlu1 %1181 }
 0x559   :  { %6244 = vmatmul.mubr.msk.f32.gmra.mxu0 %vm596_vm6, %v755_v15 }
 0x55a   :  { %6266 = vmatpush3.xpose.msk.msra.mxu0 %vm193_vm2, %v7419_v25  ;;  %6267 = vmatprep.mubr.msk.f32.mxu0 %vm7158_vm4, %v7157_v53 }
 0x55b   :  { %6291 = vmatprep.subr.mxu0 %v7157_v53 }
 0x55d   :  { %6268 = vmatmul.mubr.msk.f32.vlgmr.msra.gmra.mxu0 %vm193_vm2, %v951_v17 }
 0x55e   :  { %6292 = vmatpush3.xpose.msk.msra.mxu0 %vm193_vm2, %v7430_v32  ;;  %6270 = vmatprep.mubr.msk.f32.mxu0 %vm7158_vm4, %v7157_v53 }
 0x55f   :  { %6293 = vmatprep.subr.mxu0 %v7157_v53 }
 0x561   :  { %6271 = vmatmul.mubr.msk.f32.gmra.mxu0 %vm193_vm2, %v953_v19 }
 0x562   :  { %6294 = vmatpush3.xpose.msk.msra.mxu0 %vm193_vm2, %v7432_v33  ;;  %6273 = vmatprep.mubr.msk.f32.mxu0 %vm7158_vm4, %v7157_v53  ;;  %v1416_v33 = vrot.slane %v7459_v45, 1  ;;  %v1415_v45 = vrot.slane %v7430_v32, 1 }
 0x563   :  { %6295 = vmatprep.subr.mxu0 %v7157_v53 }
 0x564   :  { %v7641_v47 = vsel %vm1409_vm8, %v1416_v33, %v7627_v22  ;;  %v7653_v27 = vsel %vm1409_vm8, %v1415_v45, %v1416_v33 }
 0x565   :  { %6274 = vmatmul.mubr.msk.f32.gmra.mxu0 %vm193_vm2, %v955_v20 }
 0x566   :  { %6296 = vmatpush3.xpose.msk.msra.mxu0 %vm193_vm2, %v7419_v25  ;;  %6297 = vmatprep.mubr.msk.f32.mxu0 %vm7158_vm4, %v7157_v53  ;;  %v405_v25 = vadd.f32 %v7482_v48, %v7542_v6  ;;  %v410_v6 = vadd.f32 %v7482_v48, %v7546_v10 }
 0x567   :  { %6321 = vmatprep.subr.mxu0 %v7157_v53 }
 0x568   :  { %v1411_v24 = vrot.slane %v405_v25, 1  ;;  %v7664_v48 = vrot.slane %v410_v6, 1 }
 0x569   :  { %6298 = vmatmul.mubr.msk.f32.vlgmr.msra.gmra.mxu0 %vm193_vm2, %v1178_v21 }
 0x56a   :  { %6322 = vmatpush3.xpose.msk.msra.mxu0 %vm193_vm2, %v7627_v22  ;;  %6300 = vmatprep.mubr.msk.f32.mxu0 %vm7158_vm4, %v7157_v53  ;;  %v7662_v32 = vsel %vm1409_vm8, %v1410_v29, %v1411_v24  ;;  %v7672_v0 = vsel %vm1409_vm8, %v1411_v24, %v7664_v48 }
 0x56b   :  { %6323 = vmatprep.subr.mxu0 %v7157_v53 }
 0x56d   :  { %6301 = vmatmul.mubr.msk.f32.gmra.mxu0 %vm193_vm2, %v1180_v23 }
 0x56e   :  { %6324 = vmatpush3.xpose.msk.msra.mxu0 %vm193_vm2, %v7641_v47  ;;  %6303 = vmatprep.mubr.msk.f32.mxu0 %vm7158_vm4, %v7157_v53 }
 0x56f   :  { %6325 = vmatprep.subr.mxu0 %v7157_v53 }
 0x571   :  { %6304 = vmatmul.mubr.msk.f32.gmra.mxu0 %vm193_vm2, %v1182_v26 }
 0x572   :  { %6326 = vmatpush3.xpose.msk.msra.mxu0 %vm193_vm2, %v7653_v27  ;;  %6327 = vmatprep.mubr.msk.f32.mxu0 %vm7158_vm4, %v7157_v53 }
 0x573   :  { %6351 = vmatprep.subr.mxu0 %v7157_v53 }
 0x575   :  { %6328 = vmatmul.mubr.msk.f32.vlgmr.msra.gmra.mxu0 %vm193_vm2, %v7662_v32 }
 0x576   :  { %6330 = vmatprep.mubr.msk.f32.mxu0 %vm7158_vm4, %v7157_v53 }
 0x579   :  { %6331 = vmatmul.mubr.msk.f32.gmra.mxu0 %vm193_vm2, %v7672_v0 }
 0x57a   :  { %6333 = vmatprep.mubr.msk.f32.mxu0 %vm7158_vm4, %v7157_v53 }
 0x57d   :  { %6334 = vmatmul.mubr.msk.f32.gmra.mxu0 %vm193_vm2, %v7664_v48 }
 0x57e   :  { %6357 = vmatprep.mubr.msk.f32.mxu0 %vm7158_vm4, %v7157_v53 }
 0x585   :  { %v599_v35 = vpop.xlane.xlu0 %598 }
 0x586   :  { %v607_v39 = vsub.f32 %v7550_v14, %v599_v35 }
 0x588   :  { %v610_v46 = vmul.f32 1.442695, %v607_v39 }
 0x589   :  { %v602_v40 = vpop.xlane.xlu1 %601  ;;  %v606_v41 = vpop.xlane.xlu0 %605 }
 0x58a   :  { %v608_v43 = vsub.f32 %v7552_v16, %v602_v40  ;;  %v609_v51 = vsub.f32 %v7554_v18, %v606_v41  ;;  %6885 = vpow2.f32 %v610_v46 }
 0x58c   :  { %v612_v57 = vmul.f32 1.442695, %v608_v43  ;;  %v614_v61 = vmul.f32 1.442695, %v609_v51 }
 0x58e   :  { %6887 = vpow2.f32 %v612_v57 }
 0x58f   :  { %6889 = vpow2.f32 %v614_v61 }
 0x597   :  { %v7696_v5 = vpop.eup %6885 }
 0x598   :  { %v616_v15 = vsel %vm596_vm6, %v7696_v5, 0.0 }
 0x59b   :  { %v7700_v12 = vpop.eup %6887 }
 0x59c   :  { %v7706_v17 = vpop.eup %6889  ;;  %v619_v21 = vsel %vm596_vm6, %v7700_v12, 0.0 }
 0x59d   :  { %v622_v33 = vsel %vm603_vm7, %v7706_v17, 0.0 }
 0x610   :  { %v7682_v10 = vpop.f32.mrf.mxu0 }
 0x612   :  { %v6239_v34 = vpop.f32.mrf.mxu0 }
 0x615   :  { %v7684_v36 = vpop.f32.mrf.mxu0 }
 0x617   :  { %v6242_v37 = vpop.f32.mrf.mxu0 }
 0x619   :  { %v7686_v38 = vpop.f32.mrf.mxu0 }
 0x61b   :  { %v6245_v42 = vpop.f32.mrf.mxu0 }
 0x61d   :  { %v1028_v44 = vpop.f32.mrf.mxu0 }
 0x61e   :  { %v1042_v55 = vsel %vm596_vm6, %v1028_v44, -inf }
 0x61f   :  { %1043 = vmax.xlane.f32.xlu0 %v1042_v55  ;;  %v6269_v56 = vpop.f32.mrf.mxu0 }
 0x621   :  { %v1033_v60 = vpop.f32.mrf.mxu0 }
 0x622   :  { %v1045_v62 = vsel %vm596_vm6, %v1033_v60, -inf }
 0x623   :  { %1046 = vmax.xlane.f32.xlu0 %v1045_v62  ;;  %v6272_v14 = vpop.f32.mrf.mxu0 }
 0x625   :  { %v1038_v1 = vpop.f32.mrf.mxu0 }
 0x626   :  { %v1048_v16 = vsel %vm603_vm7, %v1038_v1, -inf }
 0x627   :  { %1049 = vmax.xlane.f32.xlu1 %v1048_v16  ;;  %v6275_v54 = vpop.f32.mrf.mxu0 }
 0x629   :  { %v1255_v18 = vpop.f32.mrf.mxu0 }
 0x62a   :  { %v1269_v2 = vsel %vm596_vm6, %v1255_v18, -inf }
 0x62b   :  { %1270 = vmax.xlane.f32.xlu0 %v1269_v2  ;;  %v6299_v3 = vpop.f32.mrf.mxu0 }
 0x62d   :  { %v1260_v4 = vpop.f32.mrf.mxu0 }
 0x62e   :  { %v1272_v59 = vsel %vm596_vm6, %v1260_v4, -inf }
 0x62f   :  { %1273 = vmax.xlane.f32.xlu1 %v1272_v59  ;;  %v6302_v8 = vpop.f32.mrf.mxu0 }
 0x631   :  { %v7698_v9 = vpop.f32.mrf.mxu0 }
 0x632   :  { %v1275_v13 = vsel %vm603_vm7, %v7698_v9, -inf }
 0x633   :  { %1276 = vmax.xlane.f32.xlu0 %v1275_v13  ;;  %v6305_v19 = vpop.f32.mrf.mxu0  ;;  %617 = vadd.xlane.f32.xlu1 %v616_v15 }
 0x635   :  { %v7708_v20 = vpop.f32.mrf.mxu0 }
 0x637   :  { %620 = vadd.xlane.f32.xlu0 %v619_v21  ;;  %v6329_v25 = vpop.f32.mrf.mxu0  ;;  %623 = vadd.xlane.f32.xlu1 %v622_v33 }
 0x639   :  { %v7714_v23 = vpop.f32.mrf.mxu0 }
 0x63b   :  { %v6332_v45 = vpop.f32.mrf.mxu0 }
 0x63d   :  { %v7716_v24 = vpop.f32.mrf.mxu0 }
 0x63f   :  { %v6335_v6 = vpop.f32.mrf.mxu0 }
 0x648   :  { %1077 = vrot.lane.b32.xlu1 %v7497_v58, %s7160_s25 }
 0x64c   :  { %1075 = vrot.lane.b32.xlu1 %v7484_v52, %s7160_s25 }
 0x64d   :  { %1079 = vrot.lane.b32.xlu0 %v7509_v63, %s7160_s25 }
 0x650   :  { %1306 = vrot.lane.b32.xlu1 %v7509_v63, %s7161_s27 }
 0x6a8   :  { %v1044_v26 = vpop.xlane.xlu0 %1043 }
 0x6a9   :  { %v1051_v29 = vsub.f32 %v1028_v44, %v1044_v26 }
 0x6ab   :  { %v1054_v34 = vmul.f32 1.442695, %v1051_v29 }
 0x6ac   :  { %v1047_v35 = vpop.xlane.xlu0 %1046 }
 0x6ad   :  { %6891 = vpow2.f32 %v1054_v34  ;;  %v1052_v37 = vsub.f32 %v1033_v60, %v1047_v35 }
 0x6af   :  { %v1056_v39 = vmul.f32 1.442695, %v1052_v37 }
 0x6b0   :  { %v1050_v40 = vpop.xlane.xlu1 %1049 }
 0x6b1   :  { %6893 = vpow2.f32 %v1056_v39  ;;  %v1053_v41 = vsub.f32 %v1038_v1, %v1050_v40 }
 0x6b3   :  { %v1058_v42 = vmul.f32 1.442695, %v1053_v41 }
 0x6b4   :  { %v1271_v43 = vpop.xlane.xlu0 %1270 }
 0x6b5   :  { %6895 = vpow2.f32 %v1058_v42  ;;  %v1278_v46 = vsub.f32 %v1255_v18, %v1271_v43 }
 0x6b7   :  { %v1281_v51 = vmul.f32 1.442695, %v1278_v46 }
 0x6b8   :  { %v1274_v55 = vpop.xlane.xlu1 %1273 }
 0x6b9   :  { %6897 = vpow2.f32 %v1281_v51  ;;  %v1279_v56 = vsub.f32 %v1260_v4, %v1274_v55 }
 0x6ba   :  { %v7726_v57 = vpop.eup %6891 }
 0x6bb   :  { %v1283_v61 = vmul.f32 1.442695, %v1279_v56  ;;  %v1060_v44 = vsel %vm596_vm6, %v7726_v57, 0.0 }
 0x6bc   :  { %v618_v62 = vpop.xlane.xlu1 %617  ;;  %1061 = vadd.xlane.f32.xlu0 %v1060_v44  ;;  %v1277_v60 = vpop.xlane.xlu0 %1276 }
 0x6bd   :  { %6899 = vpow2.f32 %v1283_v61 }
 0x6be   :  { %v7730_v14 = vpop.eup %6893  ;;  %6901 = vrcp.f32 %v618_v62 }
 0x6bf   :  { %v1063_v1 = vsel %vm596_vm6, %v7730_v14, 0.0 }
 0x6c0   :  { %1064 = vadd.xlane.f32.xlu1 %v1063_v1  ;;  %v621_v16 = vpop.xlane.xlu0 %620  ;;  %v624_v18 = vpop.xlane.xlu1 %623 }
 0x6c1   :  { %6903 = vrcp.f32 %v621_v16 }
 0x6c2   :  { %v7734_v54 = vpop.eup %6895  ;;  %6905 = vrcp.f32 %v624_v18 }
 0x6c3   :  { %v1066_v2 = vsel %vm603_vm7, %v7734_v54, 0.0 }
 0x6c4   :  { %1067 = vadd.xlane.f32.xlu0 %v1066_v2  ;;  %v1078_v19 = vpop.permute.xlu1 %1077  ;;  %v1080_v21 = vpop.permute.xlu0 %1079 }
 0x6c6   :  { %v7738_v3 = vpop.eup %6897 }
 0x6c7   :  { %v1287_v4 = vsel %vm596_vm6, %v7738_v3, 0.0 }
 0x6c8   :  { %1288 = vadd.xlane.f32.xlu1 %v1287_v4 }
 0x6ca   :  { %v7742_v59 = vpop.eup %6899 }
 0x6cb   :  { %v6902_v8 = vpop.eup %6901  ;;  %v1290_v13 = vsel %vm596_vm6, %v7742_v59, 0.0 }
 0x6cc   :  { %v626_v15 = vmul.f32 %v6902_v8, %v7696_v5  ;;  %1291 = vadd.xlane.f32.xlu0 %v1290_v13  ;;  %v1076_v5 = vpop.permute.xlu1 %1075  ;;  %v1673_v8 = vrot.slane %v7544_v7, 1 }
 0x6ce   :  { %6253 = vmatmul.mubr.msk.f32.vlgmr.msra.gmra.mxu1 %vm596_vm6, %v626_v15  ;;  %v6904_v33 = vpop.eup %6903 }
 0x6cf   :  { %6277 = vmatpush3.msk.msra.mxu1 %vm776_vm5, %v1080_v21  ;;  %6255 = vmatprep.mubr.msk.f32.mxu1 %vm7158_vm4, %v7157_v53  ;;  %v628_v25 = vmul.f32 %v6904_v33, %v7700_v12  ;;  %v6906_v45 = vpop.eup %6905  ;;  %v1280_v12 = vsub.f32 %v7698_v9, %v1277_v60 }
 0x6d0   :  { %6278 = vmatprep.subr.mxu1 %v7157_v53  ;;  %v630_v6 = vmul.f32 %v6906_v45, %v7706_v17 }
 0x6d1   :  { %6279 = vmatpush3.msra.mxu1 %v1078_v19  ;;  %v1285_v26 = vmul.f32 1.442695, %v1280_v12 }
 0x6d2   :  { %6280 = vmatprep.subr.mxu1 %v7157_v53  ;;  %6256 = vmatmul.mubr.msk.f32.gmra.mxu1 %vm596_vm6, %v628_v25 }
 0x6d3   :  { %6281 = vmatpush3.msra.mxu1 %v1076_v5  ;;  %6258 = vmatprep.mubr.msk.f32.mxu1 %vm7158_vm4, %v7157_v53  ;;  %6907 = vpow2.f32 %v1285_v26 }
 0x6d4   :  { %6306 = vmatprep.subr.mxu1 %v7157_v53 }
 0x6d6   :  { %6259 = vmatmul.mubr.msk.f32.gmra.mxu1 %vm596_vm6, %v630_v6 }
 0x6d7   :  { %6282 = vmatprep.mubr.msk.f32.mxu1 %vm7158_vm4, %v7157_v53 }
 0x6d9   :  { %1302 = vrot.lane.b32.xlu1 %v7484_v52, %s7161_s27  ;;  %v1307_v52 = vpop.permute.xlu1 %1306 }
 0x6e0   :  { %v6908_v17 = vpop.eup %6907 }
 0x6e1   :  { %v1293_v29 = vsel %vm603_vm7, %v6908_v17, 0.0 }
 0x6e2   :  { %1304 = vrot.lane.b32.xlu0 %v7497_v58, %s7161_s27 }
 0x6e6   :  { %1545 = vrot.lane.b32.xlu0 %v7662_v32, %s7159_s2 }
 0x6ea   :  { %1549 = vrot.lane.b32.xlu0 %v7664_v48, %s7159_s2 }
 0x6fd   :  { %1294 = vadd.xlane.f32.xlu1 %v1293_v29 }
 0x70e   :  { %1547 = vrot.lane.b32.xlu1 %v7672_v0, %s7159_s2 }
 0x745   :  { %v1062_v34 = vpop.xlane.xlu0 %1061 }
 0x746   :  { %6909 = vrcp.f32 %v1062_v34 }
 0x749   :  { %v1065_v58 = vpop.xlane.xlu1 %1064 }
 0x74a   :  { %6911 = vrcp.f32 %v1065_v58 }
 0x74d   :  { %v1068_v9 = vpop.xlane.xlu0 %1067 }
 0x74e   :  { %6913 = vrcp.f32 %v1068_v9 }
 0x751   :  { %v1289_v35 = vpop.xlane.xlu1 %1288 }
 0x752   :  { %6915 = vrcp.f32 %v1289_v35 }
 0x753   :  { %v6910_v37 = vpop.eup %6909 }
 0x754   :  { %v1070_v39 = vmul.f32 %v6910_v37, %v7726_v57 }
 0x755   :  { %v1292_v40 = vpop.xlane.xlu0 %1291  ;;  %v1303_v51 = vpop.permute.xlu1 %1302 }
 0x756   :  { %6917 = vrcp.f32 %v1292_v40  ;;  %6283 = vmatmul.mubr.msk.f32.vlgmr.msra.gmra.mxu1 %vm596_vm6, %v1070_v39 }
 0x757   :  { %v6912_v41 = vpop.eup %6911  ;;  %6307 = vmatpush3.msk.msra.mxu1 %vm776_vm5, %v1307_v52  ;;  %6285 = vmatprep.mubr.msk.f32.mxu1 %vm7158_vm4, %v7157_v53 }
 0x758   :  { %6308 = vmatprep.subr.mxu1 %v7157_v53  ;;  %v1072_v42 = vmul.f32 %v6912_v41, %v7730_v14 }
 0x759   :  { %v1305_v43 = vpop.permute.xlu0 %1304 }
 0x75a   :  { %6286 = vmatmul.mubr.msk.f32.gmra.mxu1 %vm596_vm6, %v1072_v42 }
 0x75b   :  { %v6914_v46 = vpop.eup %6913  ;;  %6309 = vmatpush3.msra.mxu1 %v1305_v43  ;;  %6288 = vmatprep.mubr.msk.f32.mxu1 %vm7158_vm4, %v7157_v53 }
 0x75c   :  { %6310 = vmatprep.subr.mxu1 %v7157_v53  ;;  %v1074_v55 = vmul.f32 %v6914_v46, %v7734_v54 }
 0x75d   :  { %6311 = vmatpush3.msra.mxu1 %v1303_v51 }
 0x75e   :  { %6289 = vmatmul.mubr.msk.f32.gmra.mxu1 %vm596_vm6, %v1074_v55  ;;  %6336 = vmatprep.subr.mxu1 %v7157_v53 }
 0x75f   :  { %v6916_v56 = vpop.eup %6915  ;;  %6312 = vmatprep.mubr.msk.f32.mxu1 %vm7158_vm4, %v7157_v53 }
 0x760   :  { %v1297_v57 = vmul.f32 %v6916_v56, %v7738_v3  ;;  %v7811_v3 = vrot.slane %v7548_v11, 1  ;;  %v1672_v11 = vrot.slane %v7509_v63, 1 }
 0x762   :  { %6313 = vmatmul.mubr.msk.f32.vlgmr.msra.gmra.mxu1 %vm596_vm6, %v1297_v57  ;;  %v7822_v13 = vsel %vm1409_vm8, %v1673_v8, %v7811_v3  ;;  %v7829_v7 = vsel %vm1409_vm8, %v1672_v11, %v1673_v8 }
 0x763   :  { %v6918_v61 = vpop.eup %6917  ;;  %6337 = vmatpush3.xpose.msk.msra.mxu1 %vm193_vm2, %v7627_v22  ;;  %6315 = vmatprep.mubr.msk.f32.mxu1 %vm7158_vm4, %v7157_v53 }
 0x764   :  { %6338 = vmatprep.subr.mxu1 %v7157_v53  ;;  %v1299_v44 = vmul.f32 %v6918_v61, %v7742_v59  ;;  %v1546_v59 = vpop.permute.xlu0 %1545 }
 0x766   :  { %6316 = vmatmul.mubr.msk.f32.gmra.mxu1 %vm596_vm6, %v1299_v44 }
 0x767   :  { %6339 = vmatpush3.xpose.msk.msra.mxu1 %vm193_vm2, %v7641_v47  ;;  %6318 = vmatprep.mubr.msk.f32.mxu1 %vm7158_vm4, %v7157_v53 }
 0x768   :  { %6340 = vmatprep.subr.mxu1 %v7157_v53  ;;  %v1550_v19 = vpop.permute.xlu0 %1549 }
 0x76b   :  { %6341 = vmatpush3.xpose.msk.msra.mxu1 %vm193_vm2, %v7653_v27 }
 0x76c   :  { %6366 = vmatprep.subr.mxu1 %v7157_v53 }
 0x786   :  { %v1295_v62 = vpop.xlane.xlu1 %1294 }
 0x787   :  { %6919 = vrcp.f32 %v1295_v62 }
 0x78a   :  { %v1548_v15 = vpop.permute.xlu1 %1547 }
 0x78e   :  { %v936_v60 = vpop.f32.mrf.mxu1 }
 0x78f   :  { %v937_v5 = vadd.f32 %v936_v60, %v7682_v10 }
 0x790   :  { %v6254_v14 = vpop.f32.mrf.mxu1 }
 0x792   :  { %v941_v1 = vpop.f32.mrf.mxu1 }
 0x794   :  { %v6920_v16 = vpop.eup %6919  ;;  %v6257_v54 = vpop.f32.mrf.mxu1 }
 0x795   :  { %v1301_v18 = vmul.f32 %v6920_v16, %v6908_v17  ;;  %v942_v17 = vadd.f32 %v941_v1, %v7684_v36 }
 0x796   :  { %v946_v2 = vpop.f32.mrf.mxu1 }
 0x797   :  { %6319 = vmatmul.mubr.msk.f32.gmra.mxu1 %vm596_vm6, %v1301_v18  ;;  %v947_v37 = vadd.f32 %v946_v2, %v7686_v38 }
 0x798   :  { %6342 = vmatprep.mubr.msk.f32.mxu1 %vm7158_vm4, %v7157_v53  ;;  %v6260_v4 = vpop.f32.mrf.mxu1 }
 0x79b   :  { %6343 = vmatmul.mubr.msk.f32.vlgmr.msra.gmra.mxu1 %vm193_vm2, %v1546_v59 }
 0x79c   :  { %6367 = vmatpush3.msk.msra.mxu1 %vm776_vm5, %v7811_v3  ;;  %6345 = vmatprep.mubr.msk.f32.mxu1 %vm7158_vm4, %v7157_v53 }
 0x79d   :  { %6368 = vmatprep.subr.mxu1 %v7157_v53 }
 0x79e   :  { %6369 = vmatpush3.msra.mxu1 %v7822_v13 }
 0x79f   :  { %6370 = vmatprep.subr.mxu1 %v7157_v53  ;;  %6346 = vmatmul.mubr.msk.f32.gmra.mxu1 %vm193_vm2, %v1548_v15 }
 0x7a0   :  { %6371 = vmatpush3.msra.mxu1 %v7829_v7  ;;  %6348 = vmatprep.mubr.msk.f32.mxu1 %vm7158_vm4, %v7157_v53 }
 0x7a1   :  { %6396 = vmatprep.subr.mxu1 %v7157_v53 }
 0x7a3   :  { %6349 = vmatmul.mubr.msk.f32.gmra.mxu1 %vm193_vm2, %v1550_v19 }
 0x7a4   :  { %6372 = vmatprep.mubr.msk.f32.mxu1 %vm7158_vm4, %v7157_v53 }
 0x816   :  { %v1160_v63 = vpop.f32.mrf.mxu1 }
 0x817   :  { %v1174_v12 = vadd.f32 %v1160_v63, %v937_v5  ;;  %v1512_v63 = vsel %vm596_vm6, %v7708_v20, -inf }
 0x818   :  { %v6284_v21 = vpop.f32.mrf.mxu1 }
 0x819   :  { %v1515_v21 = vsel %vm596_vm6, %v7714_v23, -inf }
 0x81a   :  { %v1165_v33 = vpop.f32.mrf.mxu1 }
 0x81b   :  { %v1175_v34 = vadd.f32 %v1165_v33, %v942_v17 }
 0x81c   :  { %v6287_v25 = vpop.f32.mrf.mxu1 }
 0x81e   :  { %v1170_v45 = vpop.f32.mrf.mxu1 }
 0x81f   :  { %v1176_v39 = vadd.f32 %v1170_v45, %v947_v37 }
 0x820   :  { %v6290_v6 = vpop.f32.mrf.mxu1 }
 0x822   :  { %v1387_v26 = vpop.f32.mrf.mxu1 }
 0x823   :  { %v1401_v29 = vadd.f32 %v1387_v26, %v1174_v12 }
 0x824   :  { %v6314_v52 = vpop.f32.mrf.mxu1 }
 0x825   :  { %1404 = vst.msk [vmem:[#allocation2] sm:$0xff] %vm193_vm2, %v1401_v29 }
 0x826   :  { %v1392_v58 = vpop.f32.mrf.mxu1 }
 0x827   :  { %v1402_v9 = vadd.f32 %v1392_v58, %v1175_v34 }
 0x828   :  { %v6317_v35 = vpop.f32.mrf.mxu1 }
 0x829   :  { %1405 = vst.msk [vmem:[#allocation2 + $0x8] sm:$0xff] %vm193_vm2, %v1402_v9 }
 0x857   :  { %v1397_v40 = vpop.f32.mrf.mxu1 }
 0x858   :  { %v1403_v10 = vadd.f32 %v1397_v40, %v1176_v39 }
 0x859   :  { %v6320_v41 = vpop.f32.mrf.mxu1 }
 0x85a   :  { %1406 = vst.msk [vmem:[#allocation2 + $0x10] sm:$0x1] %vm189_vm1, %v1403_v10 }
 0x85b   :  { %v1623_v42 = vpop.f32.mrf.mxu1 }
 0x85c   :  { %v1637_v36 = vsel %vm596_vm6, %v1623_v42, -inf }
 0x85d   :  { %1638 = vmax.xlane.f32.xlu1 %v1637_v36  ;;  %v6344_v43 = vpop.f32.mrf.mxu1 }
 0x85f   :  { %v1628_v46 = vpop.f32.mrf.mxu1 }
 0x860   :  { %v1640_v51 = vsel %vm596_vm6, %v1628_v46, -inf }
 0x861   :  { %1641 = vmax.xlane.f32.xlu0 %v1640_v51  ;;  %v6347_v55 = vpop.f32.mrf.mxu1 }
 0x863   :  { %v1633_v56 = vpop.f32.mrf.mxu1 }
 0x864   :  { %v1643_v57 = vsel %vm603_vm7, %v1633_v56, -inf }
 0x865   :  { %1644 = vmax.xlane.f32.xlu0 %v1643_v57  ;;  %v6350_v38 = vpop.f32.mrf.mxu1 }
 0x86e   :  { %1681 = vrot.lane.b32.xlu1 %v7811_v3, %s7159_s2 }
 0x8e6   :  { %v1639_v61 = vpop.xlane.xlu1 %1638 }
 0x8e7   :  { %v1646_v44 = vsub.f32 %v1623_v42, %v1639_v61 }
 0x8e9   :  { %v1649_v62 = vmul.f32 1.442695, %v1646_v44 }
 0x8ea   :  { %v1682_v60 = vpop.permute.xlu1 %1681  ;;  %v1642_v14 = vpop.xlane.xlu0 %1641 }
 0x8eb   :  { %6921 = vpow2.f32 %v1649_v62  ;;  %v1647_v1 = vsub.f32 %v1628_v46, %v1642_v14  ;;  %6352 = vmatpush3.msk.msra.mxu0 %vm776_vm5, %v1682_v60 }
 0x8ec   :  { %6353 = vmatprep.subr.mxu0 %v7157_v53 }
 0x8ed   :  { %v1651_v16 = vmul.f32 1.442695, %v1647_v1 }
 0x8ee   :  { %v1645_v54 = vpop.xlane.xlu0 %1644 }
 0x8ef   :  { %6923 = vpow2.f32 %v1651_v16  ;;  %v1648_v18 = vsub.f32 %v1633_v56, %v1645_v54 }
 0x8f1   :  { %v1653_v2 = vmul.f32 1.442695, %v1648_v18 }
 0x8f3   :  { %6925 = vpow2.f32 %v1653_v2 }
 0x8f8   :  { %v6922_v4 = vpop.eup %6921 }
 0x8f9   :  { %v1655_v59 = vsel %vm596_vm6, %v6922_v4, 0.0 }
 0x8fa   :  { %1656 = vadd.xlane.f32.xlu0 %v1655_v59 }
 0x8fc   :  { %v6924_v8 = vpop.eup %6923 }
 0x8fd   :  { %v1658_v11 = vsel %vm596_vm6, %v6924_v8, 0.0 }
 0x8fe   :  { %1659 = vadd.xlane.f32.xlu1 %v1658_v11 }
 0x900   :  { %v6926_v15 = vpop.eup %6925 }
 0x901   :  { %v1661_v19 = vsel %vm603_vm7, %v6926_v15, 0.0 }
 0x902   :  { %1662 = vadd.xlane.f32.xlu0 %v1661_v19 }
 0x90f   :  { %1677 = vrot.lane.b32.xlu1 %v7829_v7, %s7159_s2 }
 0x913   :  { %1869 = vrot.lane.b32.xlu1 %v7662_v32, %s7160_s25 }
 0x917   :  { %1871 = vrot.lane.b32.xlu1 %v7672_v0, %s7160_s25 }
 0x918   :  { %1679 = vrot.lane.b32.xlu0 %v7822_v13, %s7159_s2 }
 0x91b   :  { %2096 = vrot.lane.b32.xlu1 %v7662_v32, %s7161_s27  ;;  %v1518_v32 = vsel %vm603_vm7, %v7716_v24, -inf }
 0x91c   :  { %1873 = vrot.lane.b32.xlu0 %v7664_v48, %s7160_s25 }
 0x920   :  { %2098 = vrot.lane.b32.xlu0 %v7672_v0, %s7161_s27 }
 0x924   :  { %2100 = vrot.lane.b32.xlu0 %v7664_v48, %s7161_s27 }
 0x93f   :  { %1513 = vmax.xlane.f32.xlu1 %v1512_v63 }
 0x943   :  { %1516 = vmax.xlane.f32.xlu0 %v1515_v21 }
 0x947   :  { %1519 = vmax.xlane.f32.xlu0 %v1518_v32 }
 0x983   :  { %v1657_v33 = vpop.xlane.xlu0 %1656 }
 0x984   :  { %6927 = vrcp.f32 %v1657_v33 }
 0x987   :  { %v1660_v25 = vpop.xlane.xlu1 %1659 }
 0x988   :  { %6929 = vrcp.f32 %v1660_v25 }
 0x98b   :  { %v1663_v0 = vpop.xlane.xlu0 %1662  ;;  %v1678_v5 = vpop.permute.xlu1 %1677 }
 0x98c   :  { %6931 = vrcp.f32 %v1663_v0 }
 0x98f   :  { %v1680_v45 = vpop.permute.xlu0 %1679  ;;  %v1870_v52 = vpop.permute.xlu1 %1869 }
 0x990   :  { %6354 = vmatpush3.msra.mxu0 %v1680_v45 }
 0x991   :  { %v6928_v48 = vpop.eup %6927  ;;  %6355 = vmatprep.subr.mxu0 %v7157_v53 }
 0x992   :  { %v1665_v6 = vmul.f32 %v6928_v48, %v6922_v4  ;;  %6356 = vmatpush3.msra.mxu0 %v1678_v5 }
 0x993   :  { %6381 = vmatprep.subr.mxu0 %v7157_v53  ;;  %v1872_v34 = vpop.permute.xlu1 %1871  ;;  %v1874_v58 = vpop.permute.xlu0 %1873 }
 0x994   :  { %6358 = vmatmul.mubr.msk.f32.vlgmr.msra.gmra.mxu0 %vm596_vm6, %v1665_v6 }
 0x995   :  { %v6930_v12 = vpop.eup %6929  ;;  %6382 = vmatpush3.xpose.msk.msra.mxu0 %vm193_vm2, %v7627_v22  ;;  %6360 = vmatprep.mubr.msk.f32.mxu0 %vm7158_vm4, %v7157_v53 }
 0x996   :  { %6383 = vmatprep.subr.mxu0 %v7157_v53  ;;  %v1667_v26 = vmul.f32 %v6930_v12, %v6924_v8 }
 0x998   :  { %6361 = vmatmul.mubr.msk.f32.gmra.mxu0 %vm596_vm6, %v1667_v26 }
 0x999   :  { %v6932_v17 = vpop.eup %6931  ;;  %6384 = vmatpush3.xpose.msk.msra.mxu0 %vm193_vm2, %v7641_v47  ;;  %6363 = vmatprep.mubr.msk.f32.mxu0 %vm7158_vm4, %v7157_v53 }
 0x99a   :  { %6385 = vmatprep.subr.mxu0 %v7157_v53  ;;  %v1669_v29 = vmul.f32 %v6932_v17, %v6926_v15 }
 0x99c   :  { %6364 = vmatmul.mubr.msk.f32.gmra.mxu0 %vm596_vm6, %v1669_v29 }
 0x99d   :  { %6386 = vmatpush3.xpose.msk.msra.mxu0 %vm193_vm2, %v7653_v27  ;;  %6387 = vmatprep.mubr.msk.f32.mxu0 %vm7158_vm4, %v7157_v53 }
 0x99e   :  { %6411 = vmatprep.subr.mxu0 %v7157_v53 }
 0x9a0   :  { %6388 = vmatmul.mubr.msk.f32.vlgmr.msra.gmra.mxu0 %vm193_vm2, %v1870_v52 }
 0x9a1   :  { %6412 = vmatpush3.xpose.msk.msra.mxu0 %vm193_vm2, %v7627_v22  ;;  %6390 = vmatprep.mubr.msk.f32.mxu0 %vm7158_vm4, %v7157_v53  ;;  %v2097_v22 = vpop.permute.xlu1 %2096 }
 0x9a2   :  { %6413 = vmatprep.subr.mxu0 %v7157_v53 }
 0x9a4   :  { %6391 = vmatmul.mubr.msk.f32.gmra.mxu0 %vm193_vm2, %v1872_v34 }
 0x9a5   :  { %6414 = vmatpush3.xpose.msk.msra.mxu0 %vm193_vm2, %v7641_v47  ;;  %6393 = vmatprep.mubr.msk.f32.mxu0 %vm7158_vm4, %v7157_v53  ;;  %v2099_v47 = vpop.permute.xlu0 %2098 }
 0x9a6   :  { %6415 = vmatprep.subr.mxu0 %v7157_v53 }
 0x9a8   :  { %6394 = vmatmul.mubr.msk.f32.gmra.mxu0 %vm193_vm2, %v1874_v58 }
 0x9a9   :  { %6416 = vmatpush3.xpose.msk.msra.mxu0 %vm193_vm2, %v7653_v27  ;;  %6417 = vmatprep.mubr.msk.f32.mxu0 %vm7158_vm4, %v7157_v53  ;;  %v2101_v9 = vpop.permute.xlu0 %2100 }
 0x9aa   :  { %6441 = vmatprep.subr.mxu0 %v7157_v53 }
 0x9ac   :  { %6418 = vmatmul.mubr.msk.f32.vlgmr.msra.gmra.mxu0 %vm193_vm2, %v2097_v22 }
 0x9ad   :  { %6420 = vmatprep.mubr.msk.f32.mxu0 %vm7158_vm4, %v7157_v53 }
 0x9b0   :  { %6421 = vmatmul.mubr.msk.f32.gmra.mxu0 %vm193_vm2, %v2099_v47 }
 0x9b1   :  { %6423 = vmatprep.mubr.msk.f32.mxu0 %vm7158_vm4, %v7157_v53 }
 0x9b4   :  { %6424 = vmatmul.mubr.msk.f32.gmra.mxu0 %vm193_vm2, %v2101_v9 }
 0x9b5   :  { %6449 = vmatprep.mubr.msk.f32.mxu0 %vm7158_vm4, %v7157_v53 }
 0x9c8   :  { %v1514_v35 = vpop.xlane.xlu1 %1513 }
 0x9c9   :  { %v1521_v39 = vsub.f32 %v7708_v20, %v1514_v35 }
 0x9cb   :  { %v1524_v36 = vmul.f32 1.442695, %v1521_v39 }
 0x9cc   :  { %v1517_v27 = vpop.xlane.xlu0 %1516 }
 0x9cd   :  { %v1522_v41 = vsub.f32 %v7714_v23, %v1517_v27  ;;  %6933 = vpow2.f32 %v1524_v36 }
 0x9cf   :  { %v1526_v51 = vmul.f32 1.442695, %v1522_v41 }
 0x9d0   :  { %v1520_v40 = vpop.xlane.xlu0 %1519 }
 0x9d1   :  { %v1523_v43 = vsub.f32 %v7716_v24, %v1520_v40  ;;  %6935 = vpow2.f32 %v1526_v51 }
 0x9d3   :  { %v1528_v56 = vmul.f32 1.442695, %v1523_v43 }
 0x9d5   :  { %6937 = vpow2.f32 %v1528_v56 }
 0x9da   :  { %v6934_v14 = vpop.eup %6933 }
 0x9db   :  { %v1530_v18 = vsel %vm596_vm6, %v6934_v14, 0.0 }
 0x9de   :  { %v6936_v54 = vpop.eup %6935 }
 0x9df   :  { %v1533_v11 = vsel %vm596_vm6, %v6936_v54, 0.0 }
 0x9e2   :  { %v6938_v4 = vpop.eup %6937 }
 0x9e3   :  { %v1536_v15 = vsel %vm603_vm7, %v6938_v4, 0.0 }
 0xa54   :  { %v7923_v37 = vpop.f32.mrf.mxu0 }
 0xa56   :  { %v6359_v10 = vpop.f32.mrf.mxu0 }
 0xa58   :  { %v7927_v42 = vpop.f32.mrf.mxu0 }
 0xa5a   :  { %v6362_v46 = vpop.f32.mrf.mxu0 }
 0xa5c   :  { %v7930_v55 = vpop.f32.mrf.mxu0 }
 0xa5e   :  { %v6365_v57 = vpop.f32.mrf.mxu0 }
 0xa5f   :  { %v2327_v57 = vld [vmem:[#allocation2 + $0x8] sm:$0xff] }
 0xa60   :  { %v1947_v38 = vpop.f32.mrf.mxu0 }
 0xa61   :  { %v1961_v20 = vsel %vm596_vm6, %v1947_v38, -inf }
 0xa62   :  { %1962 = vmax.xlane.f32.xlu1 %v1961_v20  ;;  %v6389_v61 = vpop.f32.mrf.mxu0  ;;  %v7977_v20 = vld [vmem:[%s9160_s12] ss:$0 sm:$0xff] }
 0xa64   :  { %v1952_v23 = vpop.f32.mrf.mxu0 }
 0xa65   :  { %v1964_v44 = vsel %vm596_vm6, %v1952_v23, -inf }
 0xa66   :  { %1965 = vmax.xlane.f32.xlu0 %v1964_v44  ;;  %v6392_v62 = vpop.f32.mrf.mxu0 }
 0xa68   :  { %v7934_v24 = vpop.f32.mrf.mxu0 }
 0xa69   :  { %v1967_v60 = vsel %vm603_vm7, %v7934_v24, -inf }
 0xa6a   :  { %1968 = vmax.xlane.f32.xlu1 %v1967_v60  ;;  %v6395_v1 = vpop.f32.mrf.mxu0 }
 0xa6c   :  { %v2174_v16 = vpop.f32.mrf.mxu0 }
 0xa6d   :  { %v2188_v2 = vsel %vm596_vm6, %v2174_v16, -inf }
 0xa6e   :  { %1531 = vadd.xlane.f32.xlu1 %v1530_v18  ;;  %2189 = vmax.xlane.f32.xlu0 %v2188_v2  ;;  %v6419_v59 = vpop.f32.mrf.mxu0 }
 0xa70   :  { %v7940_v8 = vpop.f32.mrf.mxu0 }
 0xa72   :  { %v6422_v19 = vpop.f32.mrf.mxu0  ;;  %1534 = vadd.xlane.f32.xlu0 %v1533_v11  ;;  %1537 = vadd.xlane.f32.xlu1 %v1536_v15 }
 0xa74   :  { %v7944_v63 = vpop.f32.mrf.mxu0 }
 0xa76   :  { %v6425_v21 = vpop.f32.mrf.mxu0 }
 0xa83   :  { %1996 = vrot.lane.b32.xlu1 %v7822_v13, %s7160_s25 }
 0xa87   :  { %1994 = vrot.lane.b32.xlu1 %v7829_v7, %s7160_s25 }
 0xa8b   :  { %2225 = vrot.lane.b32.xlu1 %v7811_v3, %s7161_s27 }
 0xaeb   :  { %v1963_v32 = vpop.xlane.xlu1 %1962 }
 0xaec   :  { %v1970_v33 = vsub.f32 %v1947_v38, %v1963_v32  ;;  %v2332_v38 = vadd.f32 %v2327_v57, %v7335_v30  ;;  %v2191_v30 = vsel %vm596_vm6, %v7940_v8, -inf }
 0xaee   :  { %v1973_v25 = vmul.f32 1.442695, %v1970_v33  ;;  %v7982_v61 = vadd.f32 %v7977_v20, %v2332_v38 }
 0xaef   :  { %v1966_v0 = vpop.xlane.xlu0 %1965 }
 0xaf0   :  { %6939 = vpow2.f32 %v1973_v25  ;;  %v1971_v45 = vsub.f32 %v1952_v23, %v1966_v0 }
 0xaf2   :  { %v1975_v48 = vmul.f32 1.442695, %v1971_v45 }
 0xaf3   :  { %v1969_v5 = vpop.xlane.xlu1 %1968 }
 0xaf4   :  { %6941 = vpow2.f32 %v1975_v48  ;;  %v1972_v43 = vsub.f32 %v7934_v24, %v1969_v5 }
 0xaf6   :  { %v1977_v46 = vmul.f32 1.442695, %v1972_v43 }
 0xaf7   :  { %v1532_v6 = vpop.xlane.xlu1 %1531  ;;  %v2190_v12 = vpop.xlane.xlu0 %2189 }
 0xaf8   :  { %v2197_v26 = vsub.f32 %v2174_v16, %v2190_v12  ;;  %6943 = vrcp.f32 %v1532_v6 }
 0xafa   :  { %v2200_v17 = vmul.f32 1.442695, %v2197_v26 }
 0xafb   :  { %v1535_v29 = vpop.xlane.xlu0 %1534  ;;  %v1538_v34 = vpop.xlane.xlu1 %1537 }
 0xafc   :  { %6945 = vpow2.f32 %v2200_v17 }
 0xafd   :  { %v6940_v52 = vpop.eup %6939  ;;  %6947 = vrcp.f32 %v1535_v29 }
 0xafe   :  { %v1979_v58 = vsel %vm596_vm6, %v6940_v52, 0.0  ;;  %6949 = vrcp.f32 %v1538_v34 }
 0xaff   :  { %1980 = vadd.xlane.f32.xlu0 %v1979_v58  ;;  %6951 = vpow2.f32 %v1977_v46  ;;  %v1997_v23 = vpop.permute.xlu1 %1996 }
 0xb01   :  { %v6942_v22 = vpop.eup %6941 }
 0xb02   :  { %v1982_v47 = vsel %vm596_vm6, %v6942_v22, 0.0 }
 0xb03   :  { %1983 = vadd.xlane.f32.xlu1 %v1982_v47  ;;  %v1995_v44 = vpop.permute.xlu1 %1994 }
 0xb05   :  { %v6944_v9 = vpop.eup %6943 }
 0xb06   :  { %v1540_v27 = vmul.f32 %v6944_v9, %v6934_v14 }
 0xb07   :  { %v2226_v62 = vpop.permute.xlu1 %2225 }
 0xb08   :  { %6373 = vmatmul.mubr.msk.f32.vlgmr.msra.gmra.mxu1 %vm596_vm6, %v1540_v27 }
 0xb09   :  { %v7954_v35 = vpop.eup %6945  ;;  %6375 = vmatprep.mubr.msk.f32.mxu1 %vm7158_vm4, %v7157_v53 }
 0xb0a   :  { %v2206_v39 = vsel %vm596_vm6, %v7954_v35, 0.0  ;;  %v6948_v40 = vpop.eup %6947 }
 0xb0b   :  { %2207 = vadd.xlane.f32.xlu1 %v2206_v39  ;;  %v1542_v10 = vmul.f32 %v6948_v40, %v6936_v54  ;;  %v6950_v41 = vpop.eup %6949 }
 0xb0c   :  { %v1544_v36 = vmul.f32 %v6950_v41, %v6938_v4  ;;  %v6952_v51 = vpop.eup %6951 }
 0xb0d   :  { %6376 = vmatmul.mubr.msk.f32.gmra.mxu1 %vm596_vm6, %v1542_v10  ;;  %v1985_v56 = vsel %vm603_vm7, %v6952_v51, 0.0 }
 0xb0e   :  { %6378 = vmatprep.mubr.msk.f32.mxu1 %vm7158_vm4, %v7157_v53 }
 0xb11   :  { %6379 = vmatmul.mubr.msk.f32.gmra.mxu1 %vm596_vm6, %v1544_v36 }
 0xb12   :  { %6402 = vmatprep.mubr.msk.f32.mxu1 %vm7158_vm4, %v7157_v53 }
 0xb15   :  { %1998 = vrot.lane.b32.xlu0 %v7811_v3, %s7160_s25  ;;  %v2194_v3 = vsel %vm603_vm7, %v7944_v63, -inf }
 0xb1c   :  { %2221 = vrot.lane.b32.xlu1 %v7829_v7, %s7161_s27  ;;  %v2353_v7 = vsel %vm193_vm2, %v7982_v61, 0.0 }
 0xb34   :  { %1986 = vadd.xlane.f32.xlu0 %v1985_v56 }
 0xb40   :  { %2195 = vmax.xlane.f32.xlu1 %v2194_v3 }
 0xb44   :  { %2354 = vadd.xlane.f32.xlu1 %v2353_v7 }
 0xb4a   :  { %2223 = vrot.lane.b32.xlu0 %v7822_v13, %s7161_s27 }
 0xb69   :  { %2192 = vmax.xlane.f32.xlu0 %v2191_v30 }
 0xb88   :  { %v1981_v24 = vpop.xlane.xlu0 %1980 }
 0xb89   :  { %6953 = vrcp.f32 %v1981_v24 }
 0xb8c   :  { %v1984_v60 = vpop.xlane.xlu1 %1983  ;;  %v1999_v14 = vpop.permute.xlu0 %1998 }
 0xb8d   :  { %6955 = vrcp.f32 %v1984_v60  ;;  %6397 = vmatpush3.msk.msra.mxu1 %vm776_vm5, %v1999_v14 }
 0xb8e   :  { %6398 = vmatprep.subr.mxu1 %v7157_v53 }
 0xb8f   :  { %6399 = vmatpush3.msra.mxu1 %v1997_v23 }
 0xb90   :  { %6400 = vmatprep.subr.mxu1 %v7157_v53 }
 0xb91   :  { %6401 = vmatpush3.msra.mxu1 %v1995_v44 }
 0xb92   :  { %6426 = vmatprep.subr.mxu1 %v7157_v53 }
 0xb94   :  { %v2208_v18 = vpop.xlane.xlu1 %2207 }
 0xb96   :  { %v6954_v13 = vpop.eup %6953 }
 0xb97   :  { %v1989_v1 = vmul.f32 %v6954_v13, %v6940_v52  ;;  %v2326_v52 = vld [vmem:[#allocation2] sm:$0xff] }
 0xb98   :  { %v2222_v59 = vpop.permute.xlu1 %2221 }
 0xb99   :  { %6403 = vmatmul.mubr.msk.f32.vlgmr.msra.gmra.mxu1 %vm596_vm6, %v1989_v1 }
 0xb9a   :  { %v6956_v16 = vpop.eup %6955  ;;  %6427 = vmatpush3.msk.msra.mxu1 %vm776_vm5, %v2226_v62  ;;  %6405 = vmatprep.mubr.msk.f32.mxu1 %vm7158_vm4, %v7157_v53 }
 0xb9b   :  { %v1991_v54 = vmul.f32 %v6956_v16, %v6942_v22  ;;  %6428 = vmatprep.subr.mxu1 %v7157_v53  ;;  %v2331_v22 = vadd.f32 %v2326_v52, %v7331_v28  ;;  %v8066_v52 = vld [vmem:[%s9161_s13] ss:$0 sm:$0xff] }
 0xb9d   :  { %6406 = vmatmul.mubr.msk.f32.gmra.mxu1 %vm596_vm6, %v1991_v54  ;;  %v8017_v27 = vadd.f32 %v7977_v20, %v2331_v22 }
 0xb9e   :  { %6408 = vmatprep.mubr.msk.f32.mxu1 %vm7158_vm4, %v7157_v53 }
 0xbbd   :  { %v1987_v2 = vpop.xlane.xlu0 %1986 }
 0xbbe   :  { %6957 = vrcp.f32 %v1987_v2 }
 0xbbf   :  { %6959 = vrcp.f32 %v2208_v18 }
 0xbc1   :  { %v2224_v4 = vpop.permute.xlu0 %2223 }
 0xbc2   :  { %6429 = vmatpush3.msra.mxu1 %v2224_v4 }
 0xbc3   :  { %6430 = vmatprep.subr.mxu1 %v7157_v53 }
 0xbc4   :  { %6431 = vmatpush3.msra.mxu1 %v2222_v59 }
 0xbc5   :  { %6464 = vmatprep.subr.mxu1 %v7157_v53 }
 0xbc8   :  { %v1855_v11 = vpop.f32.mrf.mxu1 }
 0xbc9   :  { %v2196_v5 = vpop.xlane.xlu1 %2195  ;;  %v1856_v43 = vadd.f32 %v1855_v11, %v7923_v37  ;;  %v2440_v11 = vld [vmem:[%s9163_s15 + $0x18] sm:$0xff] }
 0xbca   :  { %v6374_v19 = vpop.f32.mrf.mxu1  ;;  %v2199_v6 = vsub.f32 %v7944_v63, %v2196_v5  ;;  %6442 = vmatpush3.msra.mxu0 %v2440_v11 }
 0xbcb   :  { %v6958_v15 = vpop.eup %6957  ;;  %6443 = vmatprep.subr.mxu0 %v7157_v53  ;;  %v2438_v19 = vld [vmem:[%s9163_s15 + $0x8] sm:$0xff] }
 0xbcc   :  { %v1993_v21 = vmul.f32 %v6958_v15, %v6952_v51  ;;  %v6960_v32 = vpop.eup %6959  ;;  %v2204_v17 = vmul.f32 1.442695, %v2199_v6  ;;  %v2439_v15 = vld [vmem:[%s9163_s15 + $0x10] sm:$0xff] }
 0xbcd   :  { %v1860_v33 = vpop.f32.mrf.mxu1  ;;  %v2216_v25 = vmul.f32 %v6960_v32, %v7954_v35  ;;  %v2355_v30 = vpop.xlane.xlu1 %2354  ;;  %6444 = vmatpush3.msra.mxu0 %v2439_v15 }
 0xbce   :  { %6409 = vmatmul.mubr.msk.f32.gmra.mxu1 %vm596_vm6, %v1993_v21  ;;  %v1861_v39 = vadd.f32 %v1860_v33, %v7927_v42  ;;  %6445 = vmatprep.subr.mxu0 %v7157_v53  ;;  %v2437_v21 = vld [vmem:[%s9163_s15] sm:$0xff] }
 0xbcf   :  { %6432 = vmatprep.mubr.msk.f32.mxu1 %vm7158_vm4, %v7157_v53  ;;  %v6377_v0 = vpop.f32.mrf.mxu1  ;;  %6446 = vmatpush3.msra.mxu0 %v2438_v19 }
 0xbd0   :  { %6447 = vmatprep.subr.mxu0 %v7157_v53 }
 0xbd1   :  { %v1865_v45 = vpop.f32.mrf.mxu1  ;;  %6448 = vmatpush3.msra.mxu0 %v2437_v21 }
 0xbd2   :  { %6433 = vmatmul.mubr.msk.f32.vlgmr.msra.gmra.mxu1 %vm596_vm6, %v2216_v25  ;;  %v1866_v41 = vadd.f32 %v1865_v45, %v7930_v55  ;;  %v2366_v55 = vmul.f32 0.03125, %v2355_v30  ;;  %6495 = vmatprep.subr.mxu0 %v7157_v53 }
 0xbd3   :  { %6435 = vmatprep.mubr.msk.f32.mxu1 %vm7158_vm4, %v7157_v53  ;;  %v6380_v48 = vpop.f32.mrf.mxu1 }
 0xbd4   :  { %v2371_v14 = vsub.f32 %v7982_v61, %v2366_v55 }
 0xbd6   :  { %v2376_v4 = vmul.f32 %v2371_v14, %v2371_v14 }
 0xbf2   :  { %v2193_v12 = vpop.xlane.xlu0 %2192 }
 0xbf3   :  { %v2198_v26 = vsub.f32 %v7940_v8, %v2193_v12  ;;  %v2350_v8 = vsel %vm193_vm2, %v8017_v27, 0.0 }
 0xbf5   :  { %v2202_v29 = vmul.f32 1.442695, %v2198_v26 }
 0xbf7   :  { %6961 = vpow2.f32 %v2202_v29 }
 0xbf8   :  { %6963 = vpow2.f32 %v2204_v17 }
 0xc04   :  { %v6962_v34 = vpop.eup %6961 }
 0xc05   :  { %v2209_v58 = vsel %vm596_vm6, %v6962_v34, 0.0  ;;  %v6964_v47 = vpop.eup %6963 }
 0xc06   :  { %2210 = vadd.xlane.f32.xlu0 %v2209_v58  ;;  %v2212_v9 = vsel %vm603_vm7, %v6964_v47, 0.0  ;;  %v8071_v58 = vld [vmem:[%s9162_s14] ss:$0 sm:$0xff] }
 0xc0a   :  { %2213 = vadd.xlane.f32.xlu0 %v2212_v9 }
 0xc0e   :  { %2351 = vadd.xlane.f32.xlu0 %v2350_v8 }
 0xc59   :  { %v2079_v63 = vpop.f32.mrf.mxu1 }
 0xc5a   :  { %v2093_v57 = vadd.f32 %v2079_v63, %v1856_v43 }
 0xc5b   :  { %v6404_v35 = vpop.f32.mrf.mxu1 }
 0xc5d   :  { %v2084_v40 = vpop.f32.mrf.mxu1 }
 0xc5e   :  { %v8022_v10 = vadd.f32 %v2084_v40, %v1861_v39 }
 0xc5f   :  { %v6407_v28 = vpop.f32.mrf.mxu1 }
 0xc8e   :  { %v2089_v36 = vpop.f32.mrf.mxu1 }
 0xc8f   :  { %v8026_v46 = vadd.f32 %v2089_v36, %v1866_v41  ;;  %v2211_v51 = vpop.xlane.xlu0 %2210 }
 0xc90   :  { %6965 = vrcp.f32 %v2211_v51  ;;  %v6410_v56 = vpop.f32.mrf.mxu1 }
 0xc92   :  { %v2306_v38 = vpop.f32.mrf.mxu1 }
 0xc93   :  { %v2320_v3 = vadd.f32 %v2306_v38, %v2093_v57  ;;  %v2214_v7 = vpop.xlane.xlu0 %2213 }
 0xc94   :  { %6967 = vrcp.f32 %v2214_v7  ;;  %v6434_v42 = vpop.f32.mrf.mxu1 }
 0xc95   :  { %2323 = vst.msk [vmem:[#allocation2 + $0x11] sm:$0xff] %vm193_vm2, %v2320_v3 }
 0xc97   :  { %v2352_v23 = vpop.xlane.xlu0 %2351 }
 0xc98   :  { %v2365_v44 = vmul.f32 0.03125, %v2352_v23 }
 0xc9a   :  { %v2370_v62 = vsub.f32 %v8017_v27, %v2365_v44 }
 0xc9c   :  { %v2375_v37 = vmul.f32 %v2370_v62, %v2370_v62  ;;  %v2328_v24 = vld [vmem:[#allocation2 + $0x10] sm:$0xff] }
 0xc9d   :  { %v6966_v60 = vpop.eup %6965  ;;  %v2333_v13 = vadd.f32 %v2328_v24, %v7337_v31  ;;  %v2383_v31 = vsel %vm193_vm2, %v2376_v4, 0.0 }
 0xc9e   :  { %v2380_v1 = vsel %vm193_vm2, %v2375_v37, 0.0  ;;  %v2218_v16 = vmul.f32 %v6966_v60, %v6962_v34 }
 0xc9f   :  { %2381 = vadd.xlane.f32.xlu1 %v2380_v1  ;;  %v8034_v54 = vadd.f32 %v7977_v20, %v2333_v13  ;;  %v8108_v13 = vld [vmem:[%s9164_s16] ss:$0 sm:$0xff] }
 0xca0   :  { %6436 = vmatmul.mubr.msk.f32.gmra.mxu1 %vm596_vm6, %v2218_v16 }
 0xca1   :  { %v6968_v18 = vpop.eup %6967  ;;  %v2356_v2 = vsel %vm193_vm2, %v8034_v54, 0.0  ;;  %6438 = vmatprep.mubr.msk.f32.mxu1 %vm7158_vm4, %v7157_v53 }
 0xca2   :  { %2357 = vadd.xlane.f32.xlu0 %v2356_v2  ;;  %v2220_v59 = vmul.f32 %v6968_v18, %v6964_v47 }
 0xca4   :  { %6439 = vmatmul.mubr.msk.f32.gmra.mxu1 %vm596_vm6, %v2220_v59 }
 0xca5   :  { %6480 = vmatprep.mubr.msk.f32.mxu1 %vm7158_vm4, %v7157_v53 }
 0xca6   :  { %2384 = vadd.xlane.f32.xlu0 %v2383_v31 }
 0xd28   :  { %v2382_v32 = vpop.xlane.xlu1 %2381 }
 0xd29   :  { %v2395_v33 = vmul.f32 0.03125, %v2382_v32 }
 0xd2b   :  { %v2400_v25 = vadd.f32 1e-05, %v2395_v33  ;;  %v2358_v0 = vpop.xlane.xlu0 %2357 }
 0xd2c   :  { %v2367_v45 = vmul.f32 0.03125, %v2358_v0 }
 0xd2d   :  { %6969 = vrsqrt.f32 %v2400_v25 }
 0xd2e   :  { %v2372_v48 = vsub.f32 %v8034_v54, %v2367_v45 }
 0xd2f   :  { %v2385_v5 = vpop.xlane.xlu0 %2384 }
 0xd30   :  { %v2396_v6 = vmul.f32 0.03125, %v2385_v5  ;;  %v2377_v12 = vmul.f32 %v2372_v48, %v2372_v48 }
 0xd32   :  { %v2401_v26 = vadd.f32 1e-05, %v2396_v6  ;;  %v2386_v17 = vsel %vm193_vm2, %v2377_v12, 0.0 }
 0xd33   :  { %2387 = vadd.xlane.f32.xlu1 %v2386_v17 }
 0xd34   :  { %6971 = vrsqrt.f32 %v2401_v26 }
 0xd3a   :  { %v6970_v29 = vpop.eup %6969 }
 0xd3b   :  { %v2410_v34 = vmul.f32 %v6970_v29, %v2370_v62 }
 0xd3d   :  { %v2421_v22 = vmul.f32 %v8066_v52, %v2410_v34 }
 0xd3f   :  { %v2432_v47 = vadd.f32 %v8071_v58, %v2421_v22 }
 0xd41   :  { %v6972_v9 = vpop.eup %6971  ;;  %6450 = vmatmul.mubr.msk.f32.vlgmr.msra.gmra.mxu0 %vm193_vm2, %v2432_v47 }
 0xd42   :  { %6452 = vmatprep.mubr.msk.f32.mxu0 %vm7158_vm4, %v7157_v53  ;;  %v2411_v8 = vmul.f32 %v6972_v9, %v2371_v14 }
 0xd44   :  { %v2422_v63 = vmul.f32 %v8066_v52, %v2411_v8 }
 0xd46   :  { %v2433_v35 = vadd.f32 %v8071_v58, %v2422_v63 }
 0xd48   :  { %6453 = vmatmul.mubr.msk.f32.gmra.mxu0 %vm193_vm2, %v2433_v35 }
 0xd49   :  { %6455 = vmatprep.mubr.msk.f32.mxu0 %vm7158_vm4, %v7157_v53 }
 0xd60   :  { %v2311_v39 = vpop.f32.mrf.mxu1 }
 0xd61   :  { %v2321_v40 = vadd.f32 %v2311_v39, %v8022_v10 }
 0xd62   :  { %v6437_v28 = vpop.f32.mrf.mxu1 }
 0xd63   :  { %2324 = vst.msk [vmem:[#allocation2 + $0x19] sm:$0xff] %vm193_vm2, %v2321_v40 }
 0xd64   :  { %v2316_v41 = vpop.f32.mrf.mxu1 }
 0xd65   :  { %v2322_v36 = vadd.f32 %v2316_v41, %v8026_v46 }
 0xd66   :  { %v6440_v43 = vpop.f32.mrf.mxu1 }
 0xd67   :  { %2325 = vst.msk [vmem:[#allocation2 + $0x21] sm:$0x1] %vm189_vm1, %v2322_v36 }
 0xd6a   :  { %v2329_v51 = vld [vmem:[#allocation2 + $0x18] sm:$0xff] }
 0xd6b   :  { %v2334_v56 = vadd.f32 %v2329_v51, %v7363_v50 }
 0xd6d   :  { %v8089_v57 = vadd.f32 %v7977_v20, %v2334_v56 }
 0xd6e   :  { %v2330_v38 = vld [vmem:[#allocation2 + $0x20] sm:$0x3] }
 0xd6f   :  { %v2359_v3 = vsel %vm193_vm2, %v8089_v57, 0.0  ;;  %v2335_v10 = vadd.f32 %v2330_v38, %v7361_v49 }
 0xd70   :  { %2360 = vadd.xlane.f32.xlu0 %v2359_v3 }
 0xd71   :  { %v8095_v7 = vadd.f32 %v7977_v20, %v2335_v10  ;;  %v2681_v10 = vld [vmem:[%s9167_s19 + $0x38] sm:$0xff] }
 0xd72   :  { %6465 = vmatpush3.msra.mxu1 %v2681_v10 }
 0xd73   :  { %v2362_v46 = vsel %vm220_vm3, %v8095_v7, 0.0  ;;  %6466 = vmatprep.subr.mxu1 %v7157_v53 }
 0xd74   :  { %2363 = vadd.xlane.f32.xlu1 %v2362_v46  ;;  %v2680_v46 = vld [vmem:[%s9167_s19 + $0x30] sm:$0xff] }
 0xd75   :  { %6467 = vmatpush3.msra.mxu1 %v2680_v46 }
 0xd76   :  { %6468 = vmatprep.subr.mxu1 %v7157_v53 }
 0xdbc   :  { %v2388_v42 = vpop.xlane.xlu1 %2387 }
 0xdbd   :  { %v2397_v30 = vmul.f32 0.03125, %v2388_v42  ;;  %v2677_v42 = vld [vmem:[%s9167_s19 + $0x18] sm:$0xff] }
 0xdbf   :  { %v2402_v50 = vadd.f32 1e-05, %v2397_v30  ;;  %v2676_v30 = vld [vmem:[%s9167_s19 + $0x10] sm:$0xff] }
 0xdc1   :  { %6973 = vrsqrt.f32 %v2402_v50  ;;  %v2675_v50 = vld [vmem:[%s9167_s19 + $0x8] sm:$0xff] }
 0xdce   :  { %v6974_v23 = vpop.eup %6973 }
 0xdcf   :  { %v2412_v44 = vmul.f32 %v6974_v23, %v2372_v48  ;;  %v2674_v23 = vld [vmem:[%s9167_s19] sm:$0xff] }
 0xdd1   :  { %v2423_v55 = vmul.f32 %v8066_v52, %v2412_v44 }
 0xdd3   :  { %v2434_v62 = vadd.f32 %v8071_v58, %v2423_v55 }
 0xdd5   :  { %6456 = vmatmul.mubr.msk.f32.gmra.mxu0 %vm193_vm2, %v2434_v62 }
 0xdd6   :  { %6458 = vmatprep.mubr.msk.f32.mxu0 %vm7158_vm4, %v7157_v53 }
 0xdf9   :  { %v2361_v49 = vpop.xlane.xlu0 %2360 }
 0xdfa   :  { %v2368_v20 = vmul.f32 0.03125, %v2361_v49 }
 0xdfc   :  { %v2373_v37 = vsub.f32 %v8089_v57, %v2368_v20 }
 0xdfd   :  { %v2364_v24 = vpop.xlane.xlu1 %2363 }
 0xdfe   :  { %v2369_v60 = vmul.f32 0.03125, %v2364_v24  ;;  %v2378_v14 = vmul.f32 %v2373_v37, %v2373_v37 }
 0xe00   :  { %v2374_v1 = vsub.f32 %v8095_v7, %v2369_v60  ;;  %v2389_v16 = vsel %vm193_vm2, %v2378_v14, 0.0 }
 0xe01   :  { %v2529_v18 = vpop.f32.mrf.mxu0  ;;  %2390 = vadd.xlane.f32.xlu0 %v2389_v16 }
 0xe02   :  { %v2530_v2 = vadd.f32 %v8108_v13, %v2529_v18  ;;  %v2379_v4 = vmul.f32 %v2374_v1, %v2374_v1 }
 0xe03   :  { %v6451_v59 = vpop.f32.mrf.mxu0 }
 0xe04   :  { %v2555_v31 = vsel %vm88_vm0, %v2530_v2, 0.0  ;;  %v2392_v11 = vsel %vm220_vm3, %v2379_v4, 0.0  ;;  %v8181_v59 = vld [vmem:[%s9166_s18] ss:$0 sm:$0xff] }
 0xe05   :  { %2556 = vadd.xlane.f32.xlu0 %v2555_v31  ;;  %2393 = vadd.xlane.f32.xlu1 %v2392_v11 }
 0xe08   :  { %v2534_v15 = vpop.f32.mrf.mxu0 }
 0xe09   :  { %v2535_v19 = vadd.f32 %v8108_v13, %v2534_v15 }
 0xe0a   :  { %v6454_v21 = vpop.f32.mrf.mxu0 }
 0xe0b   :  { %v2558_v32 = vsel %vm88_vm0, %v2535_v19, 0.0 }
 0xe0c   :  { %2559 = vadd.xlane.f32.xlu1 %v2558_v32 }
 0xe8a   :  { %v2391_v33 = vpop.xlane.xlu0 %2390 }
 0xe8b   :  { %v2398_v25 = vmul.f32 0.03125, %v2391_v33 }
 0xe8d   :  { %v2403_v0 = vadd.f32 1e-05, %v2398_v25 }
 0xe8e   :  { %v2557_v45 = vpop.xlane.xlu0 %2556  ;;  %v2394_v48 = vpop.xlane.xlu1 %2393 }
 0xe8f   :  { %6975 = vrsqrt.f32 %v2403_v0  ;;  %v2572_v5 = vmul.f32 0.015625, %v2557_v45  ;;  %v2399_v6 = vmul.f32 0.03125, %v2394_v48 }
 0xe91   :  { %v8117_v12 = vsub.f32 %v2530_v2, %v2572_v5  ;;  %v2404_v26 = vadd.f32 1e-05, %v2399_v6  ;;  %v8175_v2 = vld [vmem:[%s9165_s17] ss:$0 sm:$0xff] }
 0xe93   :  { %6977 = vrsqrt.f32 %v2404_v26  ;;  %v2582_v17 = vmul.f32 %v8117_v12, %v8117_v12 }
 0xe95   :  { %v2539_v29 = vpop.f32.mrf.mxu0  ;;  %v2560_v34 = vpop.xlane.xlu1 %2559  ;;  %v2587_v22 = vsel %vm88_vm0, %v2582_v17, 0.0 }
 0xe96   :  { %v2540_v47 = vadd.f32 %v8108_v13, %v2539_v29  ;;  %v2573_v9 = vmul.f32 0.015625, %v2560_v34  ;;  %2588 = vadd.xlane.f32.xlu1 %v2587_v22 }
 0xe97   :  { %v6457_v8 = vpop.f32.mrf.mxu0 }
 0xe98   :  { %v8123_v63 = vsub.f32 %v2535_v19, %v2573_v9  ;;  %v2561_v35 = vsel %vm88_vm0, %v2540_v47, 0.0 }
 0xe99   :  { %2562 = vadd.xlane.f32.xlu0 %v2561_v35 }
 0xe9a   :  { %v2583_v39 = vmul.f32 %v8123_v63, %v8123_v63 }
 0xe9c   :  { %v6976_v40 = vpop.eup %6975  ;;  %v2590_v28 = vsel %vm88_vm0, %v2583_v39, 0.0 }
 0xe9d   :  { %2591 = vadd.xlane.f32.xlu0 %v2590_v28  ;;  %v2413_v41 = vmul.f32 %v6976_v40, %v2373_v37 }
 0xe9f   :  { %v2424_v36 = vmul.f32 %v8066_v52, %v2413_v41 }
 0xea0   :  { %v6978_v43 = vpop.eup %6977 }
 0xea1   :  { %v2435_v51 = vadd.f32 %v8071_v58, %v2424_v36  ;;  %v2414_v56 = vmul.f32 %v6978_v43, %v2374_v1 }
 0xea3   :  { %6459 = vmatmul.mubr.msk.f32.gmra.mxu0 %vm193_vm2, %v2435_v51  ;;  %v2425_v38 = vmul.f32 %v8066_v52, %v2414_v56  ;;  %v2679_v52 = vld [vmem:[%s9167_s19 + $0x28] sm:$0xff] }
 0xea4   :  { %6461 = vmatprep.mubr.msk.f32.mxu0 %vm7158_vm4, %v7157_v53  ;;  %6469 = vmatpush3.msra.mxu1 %v2679_v52 }
 0xea5   :  { %v2436_v3 = vadd.f32 %v8071_v58, %v2425_v38  ;;  %v2678_v58 = vld [vmem:[%s9167_s19 + $0x20] sm:$0xff]  ;;  %6470 = vmatprep.subr.mxu1 %v7157_v53 }
 0xea6   :  { %6471 = vmatpush3.msra.mxu1 %v2678_v58 }
 0xea7   :  { %6462 = vmatmul.mubr.msk.f32.gmra.mxu0 %vm193_vm2, %v2436_v3  ;;  %6472 = vmatprep.subr.mxu1 %v7157_v53 }
 0xea8   :  { %6503 = vmatprep.mubr.msk.f32.mxu0 %vm7158_vm4, %v7157_v53  ;;  %6473 = vmatpush3.msra.mxu1 %v2677_v42 }
 0xea9   :  { %6474 = vmatprep.subr.mxu1 %v7157_v53 }
 0xeaa   :  { %6475 = vmatpush3.msra.mxu1 %v2676_v30 }
 0xeab   :  { %6476 = vmatprep.subr.mxu1 %v7157_v53 }
 0xeac   :  { %6477 = vmatpush3.msra.mxu1 %v2675_v50 }
 0xead   :  { %6478 = vmatprep.subr.mxu1 %v7157_v53 }
 0xeae   :  { %6479 = vmatpush3.msra.mxu1 %v2674_v23 }
 0xeaf   :  { %6518 = vmatprep.subr.mxu1 %v7157_v53 }
 0xf1f   :  { %v2589_v44 = vpop.xlane.xlu1 %2588 }
 0xf20   :  { %v2602_v55 = vmul.f32 0.015625, %v2589_v44 }
 0xf22   :  { %v2607_v62 = vadd.f32 1e-05, %v2602_v55  ;;  %v2563_v49 = vpop.xlane.xlu0 %2562 }
 0xf23   :  { %v2574_v20 = vmul.f32 0.015625, %v2563_v49 }
 0xf24   :  { %6979 = vrsqrt.f32 %v2607_v62 }
 0xf25   :  { %v2579_v37 = vsub.f32 %v2540_v47, %v2574_v20  ;;  %v8208_v20 = vld [vmem:[%s9168_s20] ss:$0 sm:$0xff] }
 0xf26   :  { %v2592_v24 = vpop.xlane.xlu0 %2591 }
 0xf27   :  { %v2603_v60 = vmul.f32 0.015625, %v2592_v24  ;;  %v2584_v14 = vmul.f32 %v2579_v37, %v2579_v37 }
 0xf29   :  { %v2608_v1 = vadd.f32 1e-05, %v2603_v60  ;;  %v2593_v16 = vsel %vm88_vm0, %v2584_v14, 0.0 }
 0xf2a   :  { %2594 = vadd.xlane.f32.xlu1 %v2593_v16 }
 0xf2b   :  { %6981 = vrsqrt.f32 %v2608_v1 }
 0xf31   :  { %v6980_v18 = vpop.eup %6979 }
 0xf32   :  { %v2617_v4 = vmul.f32 %v6980_v18, %v8117_v12 }
 0xf34   :  { %v2628_v31 = vmul.f32 %v8175_v2, %v2617_v4 }
 0xf36   :  { %v2639_v11 = vadd.f32 %v8181_v59, %v2628_v31 }
 0xf38   :  { %v6982_v15 = vpop.eup %6981  ;;  %v2649_v19 = vmin.f32 %v2639_v11, 0.0  ;;  %vm2644_vm9 = vcmp.gt.f32.partialorder %v2639_v11, 0.0 }
 0xf39   :  { %v2618_v21 = vmul.f32 %v6982_v15, %v8123_v63 }
 0xf3a   :  { %v2654_v32 = vmul.f32 1.442695, %v2649_v19 }
 0xf3b   :  { %v2629_v33 = vmul.f32 %v8175_v2, %v2618_v21 }
 0xf3c   :  { %6983 = vpow2.f32 %v2654_v32 }
 0xf3d   :  { %v2640_v25 = vadd.f32 %v8181_v59, %v2629_v33 }
 0xf3f   :  { %v2650_v0 = vmin.f32 %v2640_v25, 0.0  ;;  %vm2645_vm10 = vcmp.gt.f32.partialorder %v2640_v25, 0.0 }
 0xf41   :  { %v2656_v45 = vmul.f32 1.442695, %v2650_v0 }
 0xf43   :  { %6985 = vpow2.f32 %v2656_v45 }
 0xf49   :  { %v6984_v48 = vpop.eup %6983 }
 0xf4a   :  { %v5681_v5 = vadd.f32 -1.0, %v6984_v48 }
 0xf4c   :  { %v2669_v6 = vsel %vm2644_vm9, %v2639_v11, %v5681_v5 }
 0xf4d   :  { %6481 = vmatmul.mubr.msk.f32.vlgmr.msra.gmra.mxu1 %vm88_vm0, %v2669_v6 }
 0xf4e   :  { %6483 = vmatprep.mubr.msk.f32.mxu1 %vm7158_vm4, %v7157_v53 }
 0xf50   :  { %v6986_v12 = vpop.eup %6985 }
 0xf51   :  { %v5682_v26 = vadd.f32 -1.0, %v6986_v12 }
 0xf53   :  { %v2670_v17 = vsel %vm2645_vm10, %v2640_v25, %v5682_v26 }
 0xf54   :  { %6484 = vmatmul.mubr.msk.f32.gmra.mxu1 %vm88_vm0, %v2670_v17 }
 0xf55   :  { %6486 = vmatprep.mubr.msk.f32.mxu1 %vm7158_vm4, %v7157_v53 }
 0xf63   :  { %v2544_v29 = vpop.f32.mrf.mxu0 }
 0xf64   :  { %v2545_v34 = vadd.f32 %v8108_v13, %v2544_v29 }
 0xf65   :  { %v6460_v22 = vpop.f32.mrf.mxu0 }
 0xf66   :  { %v2564_v47 = vsel %vm88_vm0, %v2545_v34, 0.0 }
 0xf67   :  { %v2549_v9 = vpop.f32.mrf.mxu0  ;;  %2565 = vadd.xlane.f32.xlu0 %v2564_v47 }
 0xf68   :  { %v2550_v8 = vadd.f32 %v8108_v13, %v2549_v9 }
 0xf69   :  { %v6463_v63 = vpop.f32.mrf.mxu0 }
 0xf6a   :  { %v2568_v35 = vsel %vm2567_vm11, %v2550_v8, 0.0 }
 0xf6b   :  { %2569 = vadd.xlane.f32.xlu1 %v2568_v35 }
 0xfb3   :  { %v2595_v39 = vpop.xlane.xlu1 %2594 }
 0xfb4   :  { %v2604_v40 = vmul.f32 0.015625, %v2595_v39 }
 0xfb6   :  { %v2609_v28 = vadd.f32 1e-05, %v2604_v40 }
 0xfb8   :  { %6987 = vrsqrt.f32 %v2609_v28 }
 0xfc5   :  { %v6988_v41 = vpop.eup %6987 }
 0xfc6   :  { %v2619_v36 = vmul.f32 %v6988_v41, %v2579_v37 }
 0xfc8   :  { %v2630_v43 = vmul.f32 %v8175_v2, %v2619_v36 }
 0xfca   :  { %v2641_v51 = vadd.f32 %v8181_v59, %v2630_v43 }
 0xfcc   :  { %v2651_v56 = vmin.f32 %v2641_v51, 0.0  ;;  %vm2646_vm12 = vcmp.gt.f32.partialorder %v2641_v51, 0.0 }
 0xfce   :  { %v2658_v38 = vmul.f32 1.442695, %v2651_v56 }
 0xfd0   :  { %6989 = vpow2.f32 %v2658_v38 }
 0xfdd   :  { %v6990_v3 = vpop.eup %6989 }
 0xfde   :  { %v5683_v10 = vadd.f32 -1.0, %v6990_v3 }
 0xfe0   :  { %v2671_v13 = vsel %vm2646_vm12, %v2641_v51, %v5683_v10 }
 0xfe1   :  { %6487 = vmatmul.mubr.msk.f32.gmra.mxu1 %vm88_vm0, %v2671_v13  ;;  %v5699_v13 = vld [vmem:[%s9157_s9 + $0x38] sm:$0xff] }
 0xfe2   :  { %6489 = vmatprep.mubr.msk.f32.mxu1 %vm7158_vm4, %v7157_v53  ;;  %6496 = vmatpush3.msra.mxu0 %v5699_v13 }
 0xfe3   :  { %6497 = vmatprep.subr.mxu0 %v7157_v53 }
 0xff0   :  { %v2566_v46 = vpop.xlane.xlu0 %2565 }
 0xff1   :  { %v2575_v52 = vmul.f32 0.015625, %v2566_v46  ;;  %v5710_v46 = vld [vmem:[%s9159_s11 + $0x38] sm:$0xff] }
 0xff2   :  { %6519 = vmatpush3.msra.mxu1 %v5710_v46 }
 0xff3   :  { %v2580_v58 = vsub.f32 %v2545_v34, %v2575_v52  ;;  %6520 = vmatprep.subr.mxu1 %v7157_v53  ;;  %v5698_v52 = vld [vmem:[%s9157_s9 + $0x30] sm:$0xff] }
 0xff4   :  { %v2570_v42 = vpop.xlane.xlu1 %2569  ;;  %6498 = vmatpush3.msra.mxu0 %v5698_v52 }
 0xff5   :  { %v2576_v30 = vmul.f32 0.015625, %v2570_v42  ;;  %v2585_v50 = vmul.f32 %v2580_v58, %v2580_v58  ;;  %6499 = vmatprep.subr.mxu0 %v7157_v53  ;;  %v5697_v42 = vld [vmem:[%s9157_s9 + $0x28] sm:$0xff] }
 0xff6   :  { %6500 = vmatpush3.msra.mxu0 %v5697_v42  ;;  %v8364_v42 = vld [vmem:[%s9158_s10 + $0x1] ss:$0 sm:$0xff] }
 0xff7   :  { %v2581_v23 = vsub.f32 %v2550_v8, %v2576_v30  ;;  %v2596_v44 = vsel %vm88_vm0, %v2585_v50, 0.0  ;;  %v5708_v30 = vld [vmem:[%s9159_s11 + $0x28] sm:$0xff]  ;;  %6501 = vmatprep.subr.mxu0 %v7157_v53  ;;  %v5696_v50 = vld [vmem:[%s9157_s9 + $0x20] sm:$0xff] }
 0xff8   :  { %2597 = vadd.xlane.f32.xlu0 %v2596_v44  ;;  %6502 = vmatpush3.msra.mxu0 %v5696_v50 }
 0xff9   :  { %v2586_v55 = vmul.f32 %v2581_v23, %v2581_v23  ;;  %6541 = vmatprep.subr.mxu0 %v7157_v53 }
 0xffb   :  { %v2599_v62 = vsel %vm2567_vm11, %v2586_v55, 0.0 }
 0xffc   :  { %2600 = vadd.xlane.f32.xlu1 %v2599_v62 }
0x100d   :  { %v2763_v49 = vpop.f32.mrf.mxu1 }
0x100e   :  { %v2787_v37 = vadd.f32 %v2763_v49, %v8017_v27 }
0x100f   :  { %v6482_v24 = vpop.f32.mrf.mxu1 }
0x1010   :  { %v8212_v60 = vadd.f32 %v8208_v20, %v2787_v37 }
0x1012   :  { %v2808_v14 = vsel %vm193_vm2, %v8212_v60, 0.0 }
0x1013   :  { %2809 = vadd.xlane.f32.xlu0 %v2808_v14 }
0x1014   :  { %v2768_v1 = vpop.f32.mrf.mxu1 }
0x1015   :  { %v2788_v16 = vadd.f32 %v2768_v1, %v7982_v61 }
0x1016   :  { %v6485_v18 = vpop.f32.mrf.mxu1 }
0x1017   :  { %v8218_v4 = vadd.f32 %v8208_v20, %v2788_v16 }
0x1019   :  { %v2811_v31 = vsel %vm193_vm2, %v8218_v4, 0.0 }
0x101a   :  { %2812 = vadd.xlane.f32.xlu1 %v2811_v31 }
0x1081   :  { %v2598_v27 = vpop.xlane.xlu0 %2597 }
0x1082   :  { %v2605_v11 = vmul.f32 0.015625, %v2598_v27 }
0x1084   :  { %v2610_v15 = vadd.f32 1e-05, %v2605_v11  ;;  %v8287_v11 = vld [vmem:[%s9155_s7 + $0x1] ss:$0 sm:$0xff]  ;;  %s5564_s7 = sshll.u32 %s7162_s22, 4  ;;  %s5565_s7 = int_to_ptr.vmem [resolvable:$true] %s5564_s7 }
0x1085   :  { %v2601_v19 = vpop.xlane.xlu1 %2600  ;;  %p7140_p1 = scmp.lt.s32.totalorder %s5565_s7, %s5565_s7 }
0x1086   :  { %6991 = vrsqrt.f32 %v2610_v15  ;;  %v2606_v21 = vmul.f32 0.015625, %v2601_v19  ;;  %v8293_v19 = vld [vmem:[%s9156_s8 + $0x1] ss:$0 sm:$0xff]  ;;  %s7135_s8 = scalar_lea.vmem %s5565_s7, 32 }
0x1087   :  { %p7136_p0 = scmp.ne.s32.totalorder %s5565_s7, %s7135_s8  ;;  %p7141_p2 = scmp.lt.s32.totalorder %s7135_s8, %s7135_s8 }
0x1088   :  { %v2611_v32 = vadd.f32 1e-05, %v2606_v21 }
0x1089   :  { %p7142_p3 = por %p7141_p2, %p7140_p1 }
0x108a   :  { %6993 = vrsqrt.f32 %v2611_v32 }
0x108b   :  { %p7143_p4 = pnand %p7142_p3, %p7136_p0 }
0x1093   :  { %v6992_v33 = vpop.eup %6991 }
0x1094   :  { %v2620_v25 = vmul.f32 %v6992_v33, %v2580_v58  ;;  %v5709_v58 = vld [vmem:[%s9159_s11 + $0x30] sm:$0xff] }
0x1095   :  { %6521 = vmatpush3.msra.mxu1 %v5709_v58 }
0x1096   :  { %v2631_v61 = vmul.f32 %v8175_v2, %v2620_v25  ;;  %6522 = vmatprep.subr.mxu1 %v7157_v53 }
0x1097   :  { %v6994_v0 = vpop.eup %6993  ;;  %6523 = vmatpush3.msra.mxu1 %v5708_v30 }
0x1098   :  { %v2642_v45 = vadd.f32 %v8181_v59, %v2631_v61  ;;  %v2621_v48 = vmul.f32 %v6994_v0, %v2581_v23  ;;  %6524 = vmatprep.subr.mxu1 %v7157_v53  ;;  %v5707_v23 = vld [vmem:[%s9159_s11 + $0x20] sm:$0xff] }
0x1099   :  { %6525 = vmatpush3.msra.mxu1 %v5707_v23 }
0x109a   :  { %v2652_v5 = vmin.f32 %v2642_v45, 0.0  ;;  %v2632_v6 = vmul.f32 %v8175_v2, %v2621_v48  ;;  %vm2647_vm13 = vcmp.gt.f32.partialorder %v2642_v45, 0.0  ;;  %6571 = vmatprep.subr.mxu1 %v7157_v53 }
0x109c   :  { %v2810_v12 = vpop.xlane.xlu0 %2809  ;;  %v2660_v26 = vmul.f32 1.442695, %v2652_v5  ;;  %v2643_v17 = vadd.f32 %v8181_v59, %v2632_v6 }
0x109d   :  { %v2823_v29 = vmul.f32 0.03125, %v2810_v12 }
0x109e   :  { %6995 = vpow2.f32 %v2660_v26  ;;  %v2653_v34 = vmin.f32 %v2643_v17, 0.0  ;;  %vm2648_vm14 = vcmp.gt.f32.partialorder %v2643_v17, 0.0 }
0x109f   :  { %v8227_v22 = vsub.f32 %v8212_v60, %v2823_v29 }
0x10a0   :  { %v2662_v47 = vmul.f32 1.442695, %v2653_v34 }
0x10a1   :  { %v2773_v9 = vpop.f32.mrf.mxu1  ;;  %v2833_v8 = vmul.f32 %v8227_v22, %v8227_v22 }
0x10a2   :  { %v2789_v63 = vadd.f32 %v2773_v9, %v8034_v54  ;;  %6997 = vpow2.f32 %v2662_v47 }
0x10a3   :  { %v2813_v35 = vpop.xlane.xlu1 %2812  ;;  %v6488_v2 = vpop.f32.mrf.mxu1  ;;  %v2838_v39 = vsel %vm193_vm2, %v2833_v8, 0.0 }
0x10a4   :  { %v8234_v59 = vadd.f32 %v8208_v20, %v2789_v63  ;;  %v2824_v40 = vmul.f32 0.03125, %v2813_v35  ;;  %2839 = vadd.xlane.f32.xlu1 %v2838_v39 }
0x10a6   :  { %v8237_v28 = vsub.f32 %v8218_v4, %v2824_v40  ;;  %v2814_v41 = vsel %vm193_vm2, %v8234_v59, 0.0 }
0x10a7   :  { %2815 = vadd.xlane.f32.xlu0 %v2814_v41 }
0x10a8   :  { %v2834_v54 = vmul.f32 %v8237_v28, %v8237_v28 }
0x10aa   :  { %v2841_v36 = vsel %vm193_vm2, %v2834_v54, 0.0 }
0x10ab   :  { %v6996_v43 = vpop.eup %6995  ;;  %2842 = vadd.xlane.f32.xlu0 %v2841_v36 }
0x10ac   :  { %v5684_v51 = vadd.f32 -1.0, %v6996_v43 }
0x10ae   :  { %v2672_v56 = vsel %vm2647_vm13, %v2642_v45, %v5684_v51 }
0x10af   :  { %v6998_v38 = vpop.eup %6997  ;;  %6490 = vmatmul.mubr.msk.f32.gmra.mxu1 %vm88_vm0, %v2672_v56 }
0x10b0   :  { %6492 = vmatprep.mubr.msk.f32.mxu1 %vm7158_vm4, %v7157_v53  ;;  %v5685_v3 = vadd.f32 -1.0, %v6998_v38 }
0x10b2   :  { %v2673_v10 = vsel %vm2648_vm14, %v2643_v17, %v5685_v3 }
0x10b3   :  { %6493 = vmatmul.mubr.msk.f32.gmra.mxu1 %vm88_vm0, %v2673_v10 }
0x10b4   :  { %6526 = vmatprep.mubr.msk.f32.mxu1 %vm7158_vm4, %v7157_v53 }
0x112d   :  { %v2840_v44 = vpop.xlane.xlu1 %2839 }
0x112e   :  { %v2853_v55 = vmul.f32 0.03125, %v2840_v44 }
0x1130   :  { %v2858_v62 = vadd.f32 1e-05, %v2853_v55  ;;  %v2816_v49 = vpop.xlane.xlu0 %2815 }
0x1131   :  { %v2825_v37 = vmul.f32 0.03125, %v2816_v49 }
0x1132   :  { %6999 = vrsqrt.f32 %v2858_v62 }
0x1133   :  { %v2830_v24 = vsub.f32 %v8234_v59, %v2825_v37 }
0x1134   :  { %v2843_v14 = vpop.xlane.xlu0 %2842 }
0x1135   :  { %v2854_v1 = vmul.f32 0.03125, %v2843_v14  ;;  %v2835_v16 = vmul.f32 %v2830_v24, %v2830_v24 }
0x1137   :  { %v2859_v18 = vadd.f32 1e-05, %v2854_v1  ;;  %v2844_v31 = vsel %vm193_vm2, %v2835_v16, 0.0 }
0x1138   :  { %2845 = vadd.xlane.f32.xlu1 %v2844_v31 }
0x1139   :  { %7001 = vrsqrt.f32 %v2859_v18 }
0x113f   :  { %v7000_v27 = vpop.eup %6999 }
0x1140   :  { %v2868_v15 = vmul.f32 %v7000_v27, %v8227_v22 }
0x1142   :  { %v2879_v21 = vmul.f32 %v8287_v11, %v2868_v15 }
0x1144   :  { %v8297_v32 = vadd.f32 %v8293_v19, %v2879_v21 }
0x1146   :  { %v7002_v33 = vpop.eup %7001  ;;  %6504 = vmatmul.mubr.msk.f32.vlgmr.msra.gmra.mxu0 %vm193_vm2, %v8297_v32  ;;  %6527 = vmatmul.mubr.msk.f32.vlgmr.msra.gmra.mxu1 %vm193_vm2, %v8297_v32 }
0x1147   :  { %v2869_v25 = vmul.f32 %v7002_v33, %v8237_v28  ;;  %6506 = vmatprep.mubr.msk.f32.mxu0 %vm7158_vm4, %v7157_v53  ;;  %6529 = vmatprep.mubr.msk.f32.mxu1 %vm7158_vm4, %v7157_v53 }
0x1149   :  { %v2880_v61 = vmul.f32 %v8287_v11, %v2869_v25 }
0x114b   :  { %v8310_v0 = vadd.f32 %v8293_v19, %v2880_v61 }
0x114d   :  { %6507 = vmatmul.mubr.msk.f32.gmra.mxu0 %vm193_vm2, %v8310_v0  ;;  %6530 = vmatmul.mubr.msk.f32.gmra.mxu1 %vm193_vm2, %v8310_v0 }
0x114e   :  { %6509 = vmatprep.mubr.msk.f32.mxu0 %vm7158_vm4, %v7157_v53  ;;  %6532 = vmatprep.mubr.msk.f32.mxu1 %vm7158_vm4, %v7157_v53 }
0x116f   :  { %v2778_v45 = vpop.f32.mrf.mxu1 }
0x1170   :  { %v2790_v48 = vadd.f32 %v2778_v45, %v8089_v57 }
0x1171   :  { %v6491_v5 = vpop.f32.mrf.mxu1 }
0x1172   :  { %v8322_v6 = vadd.f32 %v8208_v20, %v2790_v48 }
0x1173   :  { %v2783_v12 = vpop.f32.mrf.mxu1 }
0x1174   :  { %v2791_v26 = vadd.f32 %v2783_v12, %v8095_v7  ;;  %v2817_v17 = vsel %vm193_vm2, %v8322_v6, 0.0 }
0x1175   :  { %2818 = vadd.xlane.f32.xlu0 %v2817_v17  ;;  %v6494_v29 = vpop.f32.mrf.mxu1 }
0x1176   :  { %v8328_v34 = vadd.f32 %v8208_v20, %v2791_v26 }
0x1178   :  { %v2820_v22 = vsel %vm220_vm3, %v8328_v34, 0.0 }
0x1179   :  { %2821 = vadd.xlane.f32.xlu1 %v2820_v22 }
0x11c1   :  { %v2846_v57 = vpop.xlane.xlu1 %2845 }
0x11c2   :  { %v2855_v47 = vmul.f32 0.03125, %v2846_v57 }
0x11c4   :  { %v2860_v9 = vadd.f32 1e-05, %v2855_v47 }
0x11c6   :  { %7003 = vrsqrt.f32 %v2860_v9 }
0x11d3   :  { %v7004_v8 = vpop.eup %7003 }
0x11d4   :  { %v2870_v63 = vmul.f32 %v7004_v8, %v2830_v24 }
0x11d6   :  { %v2881_v7 = vmul.f32 %v8287_v11, %v2870_v63 }
0x11d8   :  { %v8334_v35 = vadd.f32 %v8293_v19, %v2881_v7 }
0x11da   :  { %6510 = vmatmul.mubr.msk.f32.gmra.mxu0 %vm193_vm2, %v8334_v35  ;;  %6533 = vmatmul.mubr.msk.f32.gmra.mxu1 %vm193_vm2, %v8334_v35 }
0x11db   :  { %6542 = vmatpush3.xpose.msk.msra.mxu0 %vm193_vm2, %v8334_v35  ;;  %6512 = vmatprep.mubr.msk.f32.mxu0 %vm7158_vm4, %v7157_v53 }
0x11dc   :  { %6543 = vmatprep.subr.mxu0 %v7157_v53  ;;  %6535 = vmatprep.mubr.msk.f32.mxu1 %vm7158_vm4, %v7157_v53 }
0x11df   :  { %6544 = vmatpush3.xpose.msk.msra.mxu0 %vm193_vm2, %v8310_v0 }
0x11e0   :  { %6545 = vmatprep.subr.mxu0 %v7157_v53 }
0x11e3   :  { %6546 = vmatpush3.xpose.msk.msra.mxu0 %vm193_vm2, %v8297_v32 }
0x11e4   :  { %6556 = vmatprep.subr.mxu0 %v7157_v53 }
0x11fe   :  { %v2819_v20 = vpop.xlane.xlu0 %2818 }
0x11ff   :  { %v2826_v2 = vmul.f32 0.03125, %v2819_v20 }
0x1201   :  { %v2831_v39 = vsub.f32 %v8322_v6, %v2826_v2 }
0x1202   :  { %v2822_v40 = vpop.xlane.xlu1 %2821 }
0x1203   :  { %v2827_v28 = vmul.f32 0.03125, %v2822_v40  ;;  %v2836_v41 = vmul.f32 %v2831_v39, %v2831_v39 }
0x1205   :  { %v2832_v54 = vsub.f32 %v8328_v34, %v2827_v28  ;;  %v2847_v36 = vsel %vm193_vm2, %v2836_v41, 0.0 }
0x1206   :  { %v2989_v43 = vpop.f32.mrf.mxu0  ;;  %2848 = vadd.xlane.f32.xlu0 %v2847_v36  ;;  %v8356_v51 = vpop.f32.mrf.mxu1 }
0x1207   :  { %v2837_v56 = vmul.f32 %v2832_v54, %v2832_v54  ;;  %v8370_v50 = vadd.f32 %v8364_v42, %v2989_v43 }
0x1208   :  { %v6505_v38 = vpop.f32.mrf.mxu0  ;;  %v6528_v3 = vpop.f32.mrf.mxu1 }
0x1209   :  { %v2850_v10 = vsel %vm220_vm3, %v2837_v56, 0.0 }
0x120a   :  { %2851 = vadd.xlane.f32.xlu1 %v2850_v10 }
0x120d   :  { %v2994_v13 = vpop.f32.mrf.mxu0  ;;  %v8359_v46 = vpop.f32.mrf.mxu1 }
0x120e   :  { %v8367_v30 = vadd.f32 %v8364_v42, %v2994_v13 }
0x120f   :  { %v6508_v52 = vpop.f32.mrf.mxu0  ;;  %v6531_v58 = vpop.f32.mrf.mxu1 }
0x121b   :  { %3232 = vrot.lane.b32.xlu1 %v8367_v30, %s7159_s2 }
0x121c   :  { %3230 = vrot.lane.b32.xlu0 %v8370_v50, %s7159_s2 }
0x128f   :  { %v2849_v23 = vpop.xlane.xlu0 %2848 }
0x1290   :  { %v2856_v44 = vmul.f32 0.03125, %v2849_v23 }
0x1292   :  { %v2861_v55 = vadd.f32 1e-05, %v2856_v44 }
0x1293   :  { %v2852_v62 = vpop.xlane.xlu1 %2851 }
0x1294   :  { %7005 = vrsqrt.f32 %v2861_v55  ;;  %v2857_v49 = vmul.f32 0.03125, %v2852_v62 }
0x1296   :  { %v2862_v37 = vadd.f32 1e-05, %v2857_v49 }
0x1298   :  { %7007 = vrsqrt.f32 %v2862_v37 }
0x129a   :  { %v2999_v24 = vpop.f32.mrf.mxu0  ;;  %v8376_v14 = vpop.f32.mrf.mxu1 }
0x129b   :  { %v8379_v1 = vadd.f32 %v8364_v42, %v2999_v24 }
0x129c   :  { %v6511_v16 = vpop.f32.mrf.mxu0  ;;  %v6534_v18 = vpop.f32.mrf.mxu1 }
0x129d   :  { %3234 = vrot.lane.b32.xlu1 %v8379_v1, %s7159_s2 }
0x12a1   :  { %v7006_v31 = vpop.eup %7005 }
0x12a2   :  { %v2871_v27 = vmul.f32 %v7006_v31, %v2831_v39 }
0x12a4   :  { %v2882_v15 = vmul.f32 %v8287_v11, %v2871_v27 }
0x12a5   :  { %v7008_v21 = vpop.eup %7007 }
0x12a6   :  { %v8385_v33 = vadd.f32 %v8293_v19, %v2882_v15  ;;  %v2872_v25 = vmul.f32 %v7008_v21, %v2832_v54 }
0x12a8   :  { %6513 = vmatmul.mubr.msk.f32.gmra.mxu0 %vm193_vm2, %v8385_v33  ;;  %6536 = vmatmul.mubr.msk.f32.gmra.mxu1 %vm193_vm2, %v8385_v33  ;;  %v2883_v61 = vmul.f32 %v8287_v11, %v2872_v25  ;;  %v3231_v11 = vpop.permute.xlu0 %3230 }
0x12a9   :  { %6515 = vmatprep.mubr.msk.f32.mxu0 %vm7158_vm4, %v7157_v53  ;;  %6538 = vmatprep.mubr.msk.f32.mxu1 %vm7158_vm4, %v7157_v53 }
0x12aa   :  { %v8397_v45 = vadd.f32 %v8293_v19, %v2883_v61  ;;  %v3233_v19 = vpop.permute.xlu1 %3232 }
0x12ac   :  { %6516 = vmatmul.mubr.msk.f32.gmra.mxu0 %vm193_vm2, %v8397_v45  ;;  %6539 = vmatmul.mubr.msk.f32.gmra.mxu1 %vm193_vm2, %v8397_v45 }
0x12ad   :  { %6547 = vmatprep.mubr.msk.f32.mxu0 %vm7158_vm4, %v7157_v53  ;;  %6577 = vmatprep.mubr.msk.f32.mxu1 %vm7158_vm4, %v7157_v53 }
0x12b0   :  { %6548 = vmatmul.mubr.msk.f32.vlgmr.msra.gmra.mxu0 %vm193_vm2, %v8370_v50 }
0x12b1   :  { %6557 = vmatpush3.xpose.msk.msra.mxu0 %vm193_vm2, %v8334_v35  ;;  %6550 = vmatprep.mubr.msk.f32.mxu0 %vm7158_vm4, %v7157_v53 }
0x12b2   :  { %6558 = vmatprep.subr.mxu0 %v7157_v53 }
0x12b4   :  { %6551 = vmatmul.mubr.msk.f32.gmra.mxu0 %vm193_vm2, %v8367_v30 }
0x12b5   :  { %6559 = vmatpush3.xpose.msk.msra.mxu0 %vm193_vm2, %v8310_v0  ;;  %6553 = vmatprep.mubr.msk.f32.mxu0 %vm7158_vm4, %v7157_v53 }
0x12b6   :  { %6560 = vmatprep.subr.mxu0 %v7157_v53 }
0x12b8   :  { %6554 = vmatmul.mubr.msk.f32.gmra.mxu0 %vm193_vm2, %v8379_v1 }
0x12b9   :  { %6561 = vmatpush3.xpose.msk.msra.mxu0 %vm193_vm2, %v8297_v32  ;;  %6562 = vmatprep.mubr.msk.f32.mxu0 %vm7158_vm4, %v7157_v53 }
0x12ba   :  { %6586 = vmatprep.subr.mxu0 %v7157_v53 }
0x12bc   :  { %6563 = vmatmul.mubr.msk.f32.vlgmr.msra.gmra.mxu0 %vm193_vm2, %v3231_v11 }
0x12bd   :  { %6587 = vmatpush3.msk.msra.mxu0 %vm776_vm5, %v8376_v14  ;;  %6565 = vmatprep.mubr.msk.f32.mxu0 %vm7158_vm4, %v7157_v53 }
0x12be   :  { %6588 = vmatprep.subr.mxu0 %v7157_v53 }
0x12bf   :  { %6589 = vmatpush3.msra.mxu0 %v8359_v46 }
0x12c0   :  { %6590 = vmatprep.subr.mxu0 %v7157_v53  ;;  %6566 = vmatmul.mubr.msk.f32.gmra.mxu0 %vm193_vm2, %v3233_v19 }
0x12c1   :  { %6591 = vmatpush3.msra.mxu0 %v8356_v51  ;;  %6568 = vmatprep.mubr.msk.f32.mxu0 %vm7158_vm4, %v7157_v53 }
0x12c2   :  { %6616 = vmatprep.subr.mxu0 %v7157_v53 }
0x130f   :  { %v3235_v48 = vpop.permute.xlu1 %3234 }
0x1310   :  { %6569 = vmatmul.mubr.msk.f32.gmra.mxu0 %vm193_vm2, %v3235_v48 }
0x1311   :  { %6592 = vmatprep.mubr.msk.f32.mxu0 %vm7158_vm4, %v7157_v53 }
0x1368   :  { %v8444_v5 = vpop.f32.mrf.mxu0  ;;  %v8446_v12 = vpop.f32.mrf.mxu1 }
0x136a   :  { %v6514_v26 = vpop.f32.mrf.mxu0  ;;  %v6537_v17 = vpop.f32.mrf.mxu1 }
0x136c   :  { %v8448_v29 = vpop.f32.mrf.mxu0  ;;  %v8450_v22 = vpop.f32.mrf.mxu1 }
0x136e   :  { %v6517_v57 = vpop.f32.mrf.mxu0  ;;  %v6540_v47 = vpop.f32.mrf.mxu1 }
0x1370   :  { %v8452_v9 = vpop.f32.mrf.mxu0 }
0x1372   :  { %v6549_v8 = vpop.f32.mrf.mxu0 }
0x1374   :  { %v8454_v63 = vpop.f32.mrf.mxu0 }
0x1375   :  { %v3200_v31 = vsel %vm596_vm6, %v8454_v63, -inf }
0x1376   :  { %v6552_v7 = vpop.f32.mrf.mxu0 }
0x1378   :  { %v8456_v20 = vpop.f32.mrf.mxu0 }
0x1379   :  { %v3203_v21 = vsel %vm603_vm7, %v8456_v20, -inf }
0x137a   :  { %v6555_v2 = vpop.f32.mrf.mxu0 }
0x137c   :  { %v3308_v39 = vpop.f32.mrf.mxu0 }
0x137d   :  { %v3322_v40 = vsel %vm596_vm6, %v3308_v39, -inf }
0x137e   :  { %3323 = vmax.xlane.f32.xlu1 %v3322_v40  ;;  %v6564_v28 = vpop.f32.mrf.mxu0 }
0x137f   :  { %v8529_v28 = vrot.slane %v8397_v45, 1 }
0x1380   :  { %v3313_v41 = vpop.f32.mrf.mxu0 }
0x1381   :  { %v3325_v54 = vsel %vm596_vm6, %v3313_v41, -inf }
0x1382   :  { %3326 = vmax.xlane.f32.xlu0 %v3325_v54  ;;  %v6567_v36 = vpop.f32.mrf.mxu0 }
0x138f   :  { %3362 = vrot.lane.b32.xlu1 %v8376_v14, %s7159_s2 }
0x13d0   :  { %v3318_v43 = vpop.f32.mrf.mxu0 }
0x13d1   :  { %v3328_v56 = vsel %vm603_vm7, %v3318_v43, -inf }
0x13d2   :  { %3329 = vmax.xlane.f32.xlu0 %v3328_v56  ;;  %v6570_v38 = vpop.f32.mrf.mxu0  ;;  %v4007_v56 = vrot.slane %v8379_v1, 1 }
0x1407   :  { %v3324_v3 = vpop.xlane.xlu1 %3323 }
0x1408   :  { %v3331_v10 = vsub.f32 %v3308_v39, %v3324_v3 }
0x140a   :  { %v3334_v13 = vmul.f32 1.442695, %v3331_v10 }
0x140b   :  { %v3327_v52 = vpop.xlane.xlu0 %3326  ;;  %v3363_v58 = vpop.permute.xlu1 %3362 }
0x140c   :  { %7009 = vpow2.f32 %v3334_v13  ;;  %v3332_v23 = vsub.f32 %v3313_v41, %v3327_v52  ;;  %6572 = vmatpush3.msk.msra.mxu1 %vm776_vm5, %v3363_v58 }
0x140d   :  { %6573 = vmatprep.subr.mxu1 %v7157_v53 }
0x140e   :  { %v3336_v44 = vmul.f32 1.442695, %v3332_v23 }
0x1410   :  { %7011 = vpow2.f32 %v3336_v44 }
0x1419   :  { %v7010_v55 = vpop.eup %7009 }
0x141a   :  { %v3340_v62 = vsel %vm596_vm6, %v7010_v55, 0.0 }
0x141b   :  { %3341 = vadd.xlane.f32.xlu0 %v3340_v62 }
0x141d   :  { %v7012_v49 = vpop.eup %7011 }
0x141e   :  { %v3343_v37 = vsel %vm596_vm6, %v7012_v49, 0.0 }
0x141f   :  { %3344 = vadd.xlane.f32.xlu1 %v3343_v37 }
0x1430   :  { %3358 = vrot.lane.b32.xlu1 %v8356_v51, %s7159_s2 }
0x1434   :  { %3548 = vrot.lane.b32.xlu1 %v8370_v50, %s7160_s25 }
0x1438   :  { %3550 = vrot.lane.b32.xlu1 %v8367_v30, %s7160_s25 }
0x143c   :  { %3775 = vrot.lane.b32.xlu1 %v8370_v50, %s7161_s27  ;;  %v3197_v50 = vsel %vm596_vm6, %v8452_v9, -inf }
0x1440   :  { %3779 = vrot.lane.b32.xlu1 %v8379_v1, %s7161_s27 }
0x145b   :  { %v3330_v24 = vpop.xlane.xlu0 %3329 }
0x145c   :  { %v3333_v16 = vsub.f32 %v3318_v43, %v3330_v24 }
0x145e   :  { %v3338_v18 = vmul.f32 1.442695, %v3333_v16 }
0x1460   :  { %7013 = vpow2.f32 %v3338_v18 }
0x1464   :  { %3201 = vmax.xlane.f32.xlu1 %v3200_v31 }
0x146d   :  { %v7014_v27 = vpop.eup %7013 }
0x146e   :  { %v3346_v15 = vsel %vm603_vm7, %v7014_v27, 0.0 }
0x146f   :  { %3347 = vadd.xlane.f32.xlu0 %v3346_v15 }
0x1485   :  { %3360 = vrot.lane.b32.xlu0 %v8359_v46, %s7159_s2 }
0x1489   :  { %3552 = vrot.lane.b32.xlu0 %v8379_v1, %s7160_s25 }
0x148d   :  { %3777 = vrot.lane.b32.xlu0 %v8367_v30, %s7161_s27 }
0x14a4   :  { %v3342_v25 = vpop.xlane.xlu0 %3341 }
0x14a5   :  { %7015 = vrcp.f32 %v3342_v25 }
0x14a8   :  { %v3345_v61 = vpop.xlane.xlu1 %3344 }
0x14a9   :  { %7017 = vrcp.f32 %v3345_v61 }
0x14ac   :  { %3198 = vmax.xlane.f32.xlu0 %v3197_v50  ;;  %v3359_v17 = vpop.permute.xlu1 %3358 }
0x14b0   :  { %3204 = vmax.xlane.f32.xlu0 %v3203_v21  ;;  %v3549_v7 = vpop.permute.xlu1 %3548 }
0x14b2   :  { %v7016_v19 = vpop.eup %7015 }
0x14b3   :  { %v3350_v26 = vmul.f32 %v7016_v19, %v7010_v55 }
0x14b4   :  { %v3551_v2 = vpop.permute.xlu1 %3550 }
0x14b6   :  { %v7018_v30 = vpop.eup %7017 }
0x14b7   :  { %v3352_v57 = vmul.f32 %v7018_v30, %v7012_v49 }
0x14b8   :  { %v3776_v40 = vpop.permute.xlu1 %3775 }
0x14bc   :  { %v3780_v36 = vpop.permute.xlu1 %3779 }
0x14ed   :  { %v3202_v58 = vpop.xlane.xlu1 %3201 }
0x14ee   :  { %v3207_v62 = vsub.f32 %v8454_v63, %v3202_v58 }
0x14f0   :  { %v3211_v31 = vmul.f32 1.442695, %v3207_v62 }
0x14f8   :  { %v3348_v11 = vpop.xlane.xlu0 %3347 }
0x14f9   :  { %7019 = vrcp.f32 %v3348_v11 }
0x14fc   :  { %v3361_v48 = vpop.permute.xlu0 %3360 }
0x14fd   :  { %6574 = vmatpush3.msra.mxu1 %v3361_v48 }
0x14fe   :  { %6575 = vmatprep.subr.mxu1 %v7157_v53 }
0x14ff   :  { %6576 = vmatpush3.msra.mxu1 %v3359_v17 }
0x1500   :  { %6578 = vmatmul.mubr.msk.f32.vlgmr.msra.gmra.mxu1 %vm596_vm6, %v3350_v26  ;;  %6601 = vmatprep.subr.mxu1 %v7157_v53  ;;  %v3553_v39 = vpop.permute.xlu0 %3552 }
0x1501   :  { %6602 = vmatpush3.xpose.msk.msra.mxu1 %vm193_vm2, %v8334_v35  ;;  %6580 = vmatprep.mubr.msk.f32.mxu1 %vm7158_vm4, %v7157_v53 }
0x1502   :  { %6603 = vmatprep.subr.mxu1 %v7157_v53 }
0x1504   :  { %6581 = vmatmul.mubr.msk.f32.gmra.mxu1 %vm596_vm6, %v3352_v57  ;;  %v3778_v41 = vpop.permute.xlu0 %3777 }
0x1505   :  { %6604 = vmatpush3.xpose.msk.msra.mxu1 %vm193_vm2, %v8310_v0  ;;  %6583 = vmatprep.mubr.msk.f32.mxu1 %vm7158_vm4, %v7157_v53 }
0x1506   :  { %v7020_v47 = vpop.eup %7019  ;;  %6605 = vmatprep.subr.mxu1 %v7157_v53 }
0x1507   :  { %v3354_v8 = vmul.f32 %v7020_v47, %v7014_v27 }
0x1509   :  { %6584 = vmatmul.mubr.msk.f32.gmra.mxu1 %vm596_vm6, %v3354_v8 }
0x150a   :  { %6606 = vmatpush3.xpose.msk.msra.mxu1 %vm193_vm2, %v8297_v32  ;;  %6607 = vmatprep.mubr.msk.f32.mxu1 %vm7158_vm4, %v7157_v53 }
0x150b   :  { %6631 = vmatprep.subr.mxu1 %v7157_v53 }
0x150d   :  { %6608 = vmatmul.mubr.msk.f32.vlgmr.msra.gmra.mxu1 %vm193_vm2, %v3549_v7 }
0x150e   :  { %6632 = vmatpush3.xpose.msk.msra.mxu1 %vm193_vm2, %v8334_v35  ;;  %6610 = vmatprep.mubr.msk.f32.mxu1 %vm7158_vm4, %v7157_v53 }
0x150f   :  { %6633 = vmatprep.subr.mxu1 %v7157_v53 }
0x1511   :  { %6611 = vmatmul.mubr.msk.f32.gmra.mxu1 %vm193_vm2, %v3551_v2 }
0x1512   :  { %6634 = vmatpush3.xpose.msk.msra.mxu1 %vm193_vm2, %v8310_v0  ;;  %6613 = vmatprep.mubr.msk.f32.mxu1 %vm7158_vm4, %v7157_v53  ;;  %v3005_v0 = vadd.f32 %v8364_v42, %v8444_v5  ;;  %v3010_v5 = vadd.f32 %v8364_v42, %v8448_v29 }
0x1513   :  { %6635 = vmatprep.subr.mxu1 %v7157_v53 }
0x1514   :  { %v4008_v54 = vrot.slane %v3005_v0, 1  ;;  %v8566_v42 = vrot.slane %v3010_v5, 1 }
0x1515   :  { %6614 = vmatmul.mubr.msk.f32.gmra.mxu1 %vm193_vm2, %v3553_v39 }
0x1516   :  { %6636 = vmatpush3.xpose.msk.msra.mxu1 %vm193_vm2, %v8297_v32  ;;  %6637 = vmatprep.mubr.msk.f32.mxu1 %vm7158_vm4, %v7157_v53  ;;  %v4013_v32 = vrot.slane %v8385_v33, 1  ;;  %v4012_v33 = vrot.slane %v8334_v35, 1  ;;  %v8564_v35 = vsel %vm1409_vm8, %v4007_v56, %v4008_v54  ;;  %v8574_v1 = vsel %vm1409_vm8, %v4008_v54, %v8566_v42 }
0x1517   :  { %6661 = vmatprep.subr.mxu1 %v7157_v53 }
0x1518   :  { %v8543_v45 = vsel %vm1409_vm8, %v4013_v32, %v8529_v28  ;;  %v8555_v43 = vsel %vm1409_vm8, %v4012_v33, %v4013_v32 }
0x1519   :  { %6638 = vmatmul.mubr.msk.f32.vlgmr.msra.gmra.mxu1 %vm193_vm2, %v3776_v40 }
0x151a   :  { %6662 = vmatpush3.xpose.msk.msra.mxu1 %vm193_vm2, %v8529_v28  ;;  %6640 = vmatprep.mubr.msk.f32.mxu1 %vm7158_vm4, %v7157_v53 }
0x151b   :  { %6663 = vmatprep.subr.mxu1 %v7157_v53 }
0x151d   :  { %6641 = vmatmul.mubr.msk.f32.gmra.mxu1 %vm193_vm2, %v3778_v41 }
0x151e   :  { %6664 = vmatpush3.xpose.msk.msra.mxu1 %vm193_vm2, %v8543_v45  ;;  %6643 = vmatprep.mubr.msk.f32.mxu1 %vm7158_vm4, %v7157_v53 }
0x151f   :  { %6665 = vmatprep.subr.mxu1 %v7157_v53 }
0x1521   :  { %6644 = vmatmul.mubr.msk.f32.gmra.mxu1 %vm193_vm2, %v3780_v36 }
0x1522   :  { %6666 = vmatpush3.xpose.msk.msra.mxu1 %vm193_vm2, %v8555_v43  ;;  %6667 = vmatprep.mubr.msk.f32.mxu1 %vm7158_vm4, %v7157_v53 }
0x1523   :  { %6691 = vmatprep.subr.mxu1 %v7157_v53 }
0x1525   :  { %6668 = vmatmul.mubr.msk.f32.vlgmr.msra.gmra.mxu1 %vm193_vm2, %v8564_v35 }
0x1526   :  { %6670 = vmatprep.mubr.msk.f32.mxu1 %vm7158_vm4, %v7157_v53 }
0x1529   :  { %6671 = vmatmul.mubr.msk.f32.gmra.mxu1 %vm193_vm2, %v8574_v1 }
0x152a   :  { %6673 = vmatprep.mubr.msk.f32.mxu1 %vm7158_vm4, %v7157_v53 }
0x152d   :  { %6674 = vmatmul.mubr.msk.f32.gmra.mxu1 %vm193_vm2, %v8566_v42 }
0x152e   :  { %6697 = vmatprep.mubr.msk.f32.mxu1 %vm7158_vm4, %v7157_v53 }
0x1535   :  { %v3199_v10 = vpop.xlane.xlu0 %3198 }
0x1536   :  { %v3206_v23 = vsub.f32 %v8452_v9, %v3199_v10 }
0x1538   :  { %v3209_v37 = vmul.f32 1.442695, %v3206_v23 }
0x1539   :  { %v3205_v44 = vpop.xlane.xlu0 %3204 }
0x153a   :  { %v3208_v24 = vsub.f32 %v8456_v20, %v3205_v44  ;;  %7021 = vpow2.f32 %v3209_v37 }
0x153b   :  { %7023 = vpow2.f32 %v3211_v31 }
0x153c   :  { %v3213_v15 = vmul.f32 1.442695, %v3208_v24 }
0x153e   :  { %7025 = vpow2.f32 %v3213_v15 }
0x1547   :  { %v8598_v26 = vpop.eup %7021 }
0x1548   :  { %v8602_v57 = vpop.eup %7023  ;;  %v3215_v47 = vsel %vm596_vm6, %v8598_v26, 0.0 }
0x1549   :  { %v3218_v32 = vsel %vm596_vm6, %v8602_v57, 0.0 }
0x154b   :  { %v8608_v7 = vpop.eup %7025 }
0x154c   :  { %v3221_v40 = vsel %vm603_vm7, %v8608_v7, 0.0 }
0x15c0   :  { %v8584_v29 = vpop.f32.mrf.mxu1 }
0x15c2   :  { %v6579_v38 = vpop.f32.mrf.mxu1 }
0x15c4   :  { %v8586_v3 = vpop.f32.mrf.mxu1 }
0x15c6   :  { %v6582_v13 = vpop.f32.mrf.mxu1 }
0x15c9   :  { %v8588_v52 = vpop.f32.mrf.mxu1 }
0x15cb   :  { %v6585_v55 = vpop.f32.mrf.mxu1 }
0x15cd   :  { %v3626_v49 = vpop.f32.mrf.mxu1 }
0x15ce   :  { %v3640_v16 = vsel %vm596_vm6, %v3626_v49, -inf }
0x15cf   :  { %3641 = vmax.xlane.f32.xlu0 %v3640_v16  ;;  %v6609_v18 = vpop.f32.mrf.mxu1 }
0x15d1   :  { %v3631_v27 = vpop.f32.mrf.mxu1 }
0x15d2   :  { %v3643_v50 = vsel %vm596_vm6, %v3631_v27, -inf }
0x15d3   :  { %3644 = vmax.xlane.f32.xlu0 %v3643_v50  ;;  %v6612_v9 = vpop.f32.mrf.mxu1 }
0x15d5   :  { %v3636_v21 = vpop.f32.mrf.mxu1 }
0x15d6   :  { %v3646_v63 = vsel %vm603_vm7, %v3636_v21, -inf }
0x15d7   :  { %3647 = vmax.xlane.f32.xlu1 %v3646_v63  ;;  %v6615_v25 = vpop.f32.mrf.mxu1 }
0x15d9   :  { %v3853_v20 = vpop.f32.mrf.mxu1 }
0x15da   :  { %v3867_v61 = vsel %vm596_vm6, %v3853_v20, -inf }
0x15db   :  { %3868 = vmax.xlane.f32.xlu0 %v3867_v61  ;;  %v6639_v11 = vpop.f32.mrf.mxu1 }
0x15dd   :  { %v3858_v19 = vpop.f32.mrf.mxu1 }
0x15de   :  { %v3870_v48 = vsel %vm596_vm6, %v3858_v19, -inf }
0x15df   :  { %3871 = vmax.xlane.f32.xlu1 %v3870_v48  ;;  %v6642_v17 = vpop.f32.mrf.mxu1 }
0x15e1   :  { %v8600_v30 = vpop.f32.mrf.mxu1 }
0x15e2   :  { %v3873_v8 = vsel %vm603_vm7, %v8600_v30, -inf }
0x15e3   :  { %3216 = vadd.xlane.f32.xlu1 %v3215_v47  ;;  %3874 = vmax.xlane.f32.xlu0 %v3873_v8  ;;  %v6645_v2 = vpop.f32.mrf.mxu1 }
0x15e5   :  { %v8610_v39 = vpop.f32.mrf.mxu1 }
0x15e7   :  { %3222 = vadd.xlane.f32.xlu1 %v3221_v40  ;;  %3219 = vadd.xlane.f32.xlu0 %v3218_v32  ;;  %v6669_v0 = vpop.f32.mrf.mxu1 }
0x15e9   :  { %v8616_v41 = vpop.f32.mrf.mxu1 }
0x15eb   :  { %v6672_v33 = vpop.f32.mrf.mxu1 }
0x15ed   :  { %v8618_v54 = vpop.f32.mrf.mxu1 }
0x15ef   :  { %v6675_v5 = vpop.f32.mrf.mxu1 }
0x15f8   :  { %3675 = vrot.lane.b32.xlu1 %v8359_v46, %s7160_s25 }
0x15fc   :  { %3673 = vrot.lane.b32.xlu1 %v8356_v51, %s7160_s25 }
0x15fd   :  { %3677 = vrot.lane.b32.xlu0 %v8376_v14, %s7160_s25 }
0x1600   :  { %3904 = vrot.lane.b32.xlu1 %v8376_v14, %s7161_s27 }
0x1658   :  { %v3642_v36 = vpop.xlane.xlu0 %3641 }
0x1659   :  { %v3649_v56 = vsub.f32 %v3626_v49, %v3642_v36 }
0x165b   :  { %v3652_v38 = vmul.f32 1.442695, %v3649_v56 }
0x165c   :  { %v3645_v10 = vpop.xlane.xlu0 %3644 }
0x165d   :  { %7027 = vpow2.f32 %v3652_v38  ;;  %v3650_v13 = vsub.f32 %v3631_v27, %v3645_v10 }
0x165f   :  { %v3654_v58 = vmul.f32 1.442695, %v3650_v13 }
0x1660   :  { %v3648_v23 = vpop.xlane.xlu1 %3647 }
0x1661   :  { %7029 = vpow2.f32 %v3654_v58  ;;  %v3651_v44 = vsub.f32 %v3636_v21, %v3648_v23 }
0x1663   :  { %v3656_v55 = vmul.f32 1.442695, %v3651_v44 }
0x1664   :  { %v3869_v62 = vpop.xlane.xlu0 %3868 }
0x1665   :  { %7031 = vpow2.f32 %v3656_v55  ;;  %v3876_v37 = vsub.f32 %v3853_v20, %v3869_v62 }
0x1667   :  { %v3879_v24 = vmul.f32 1.442695, %v3876_v37 }
0x1668   :  { %v3872_v16 = vpop.xlane.xlu1 %3871 }
0x1669   :  { %7033 = vpow2.f32 %v3879_v24  ;;  %v3877_v18 = vsub.f32 %v3858_v19, %v3872_v16 }
0x166a   :  { %v8628_v31 = vpop.eup %7027 }
0x166b   :  { %v3881_v15 = vmul.f32 1.442695, %v3877_v18  ;;  %v3658_v49 = vsel %vm596_vm6, %v8628_v31, 0.0 }
0x166c   :  { %v3217_v50 = vpop.xlane.xlu1 %3216  ;;  %3659 = vadd.xlane.f32.xlu0 %v3658_v49  ;;  %v3875_v27 = vpop.xlane.xlu0 %3874 }
0x166d   :  { %7035 = vpow2.f32 %v3881_v15 }
0x166e   :  { %v8632_v9 = vpop.eup %7029  ;;  %7037 = vrcp.f32 %v3217_v50 }
0x166f   :  { %v3661_v21 = vsel %vm596_vm6, %v8632_v9, 0.0 }
0x1670   :  { %3662 = vadd.xlane.f32.xlu1 %v3661_v21  ;;  %v3220_v63 = vpop.xlane.xlu0 %3219  ;;  %v3223_v20 = vpop.xlane.xlu1 %3222 }
0x1671   :  { %7039 = vrcp.f32 %v3220_v63 }
0x1672   :  { %v8636_v25 = vpop.eup %7031  ;;  %7041 = vrcp.f32 %v3223_v20 }
0x1673   :  { %v3664_v61 = vsel %vm603_vm7, %v8636_v25, 0.0 }
0x1674   :  { %3665 = vadd.xlane.f32.xlu0 %v3664_v61  ;;  %v3676_v2 = vpop.permute.xlu1 %3675  ;;  %v3678_v40 = vpop.permute.xlu0 %3677 }
0x1676   :  { %v8640_v11 = vpop.eup %7033 }
0x1677   :  { %v3885_v19 = vsel %vm596_vm6, %v8640_v11, 0.0 }
0x1678   :  { %3886 = vadd.xlane.f32.xlu1 %v3885_v19 }
0x167a   :  { %v8644_v48 = vpop.eup %7035 }
0x167b   :  { %v7038_v17 = vpop.eup %7037  ;;  %v3888_v47 = vsel %vm596_vm6, %v8644_v48, 0.0 }
0x167c   :  { %v3225_v8 = vmul.f32 %v7038_v17, %v8598_v26  ;;  %3889 = vadd.xlane.f32.xlu0 %v3888_v47  ;;  %v3674_v26 = vpop.permute.xlu1 %3673  ;;  %v4270_v17 = vrot.slane %v8446_v12, 1 }
0x167e   :  { %6593 = vmatmul.mubr.msk.f32.vlgmr.msra.gmra.mxu0 %vm596_vm6, %v3225_v8  ;;  %v7040_v32 = vpop.eup %7039 }
0x167f   :  { %6617 = vmatpush3.msk.msra.mxu0 %vm776_vm5, %v3678_v40  ;;  %6595 = vmatprep.mubr.msk.f32.mxu0 %vm7158_vm4, %v7157_v53  ;;  %v3227_v0 = vmul.f32 %v7040_v32, %v8602_v57  ;;  %v7042_v33 = vpop.eup %7041  ;;  %v3878_v57 = vsub.f32 %v8600_v30, %v3875_v27 }
0x1680   :  { %6618 = vmatprep.subr.mxu0 %v7157_v53  ;;  %v3229_v5 = vmul.f32 %v7042_v33, %v8608_v7 }
0x1681   :  { %6619 = vmatpush3.msra.mxu0 %v3676_v2  ;;  %v3883_v36 = vmul.f32 1.442695, %v3878_v57 }
0x1682   :  { %6620 = vmatprep.subr.mxu0 %v7157_v53  ;;  %6596 = vmatmul.mubr.msk.f32.gmra.mxu0 %vm596_vm6, %v3227_v0 }
0x1683   :  { %6621 = vmatpush3.msra.mxu0 %v3674_v26  ;;  %6598 = vmatprep.mubr.msk.f32.mxu0 %vm7158_vm4, %v7157_v53  ;;  %7043 = vpow2.f32 %v3883_v36 }
0x1684   :  { %6646 = vmatprep.subr.mxu0 %v7157_v53 }
0x1686   :  { %6599 = vmatmul.mubr.msk.f32.gmra.mxu0 %vm596_vm6, %v3229_v5 }
0x1687   :  { %6622 = vmatprep.mubr.msk.f32.mxu0 %vm7158_vm4, %v7157_v53 }
0x1689   :  { %3900 = vrot.lane.b32.xlu1 %v8356_v51, %s7161_s27  ;;  %v3905_v51 = vpop.permute.xlu1 %3904 }
0x1690   :  { %v7044_v7 = vpop.eup %7043 }
0x1691   :  { %v3891_v56 = vsel %vm603_vm7, %v7044_v7, 0.0 }
0x1692   :  { %3902 = vrot.lane.b32.xlu0 %v8359_v46, %s7161_s27 }
0x1696   :  { %4142 = vrot.lane.b32.xlu0 %v8564_v35, %s7159_s2 }
0x169a   :  { %4146 = vrot.lane.b32.xlu0 %v8566_v42, %s7159_s2 }
0x16ad   :  { %3892 = vadd.xlane.f32.xlu1 %v3891_v56 }
0x16be   :  { %4144 = vrot.lane.b32.xlu1 %v8574_v1, %s7159_s2 }
0x16f5   :  { %v3660_v38 = vpop.xlane.xlu0 %3659 }
0x16f6   :  { %7045 = vrcp.f32 %v3660_v38 }
0x16f9   :  { %v3663_v46 = vpop.xlane.xlu1 %3662 }
0x16fa   :  { %7047 = vrcp.f32 %v3663_v46 }
0x16fd   :  { %v3666_v30 = vpop.xlane.xlu0 %3665 }
0x16fe   :  { %7049 = vrcp.f32 %v3666_v30 }
0x1701   :  { %v3887_v10 = vpop.xlane.xlu1 %3886 }
0x1702   :  { %7051 = vrcp.f32 %v3887_v10 }
0x1703   :  { %v7046_v13 = vpop.eup %7045 }
0x1704   :  { %v3668_v58 = vmul.f32 %v7046_v13, %v8628_v31 }
0x1705   :  { %v3890_v23 = vpop.xlane.xlu0 %3889  ;;  %v3901_v24 = vpop.permute.xlu1 %3900 }
0x1706   :  { %7053 = vrcp.f32 %v3890_v23  ;;  %6623 = vmatmul.mubr.msk.f32.vlgmr.msra.gmra.mxu0 %vm596_vm6, %v3668_v58 }
0x1707   :  { %v7048_v44 = vpop.eup %7047  ;;  %6647 = vmatpush3.msk.msra.mxu0 %vm776_vm5, %v3905_v51  ;;  %6625 = vmatprep.mubr.msk.f32.mxu0 %vm7158_vm4, %v7157_v53 }
0x1708   :  { %6648 = vmatprep.subr.mxu0 %v7157_v53  ;;  %v3670_v55 = vmul.f32 %v7048_v44, %v8632_v9 }
0x1709   :  { %v3903_v62 = vpop.permute.xlu0 %3902 }
0x170a   :  { %6626 = vmatmul.mubr.msk.f32.gmra.mxu0 %vm596_vm6, %v3670_v55 }
0x170b   :  { %v7050_v37 = vpop.eup %7049  ;;  %6649 = vmatpush3.msra.mxu0 %v3903_v62  ;;  %6628 = vmatprep.mubr.msk.f32.mxu0 %vm7158_vm4, %v7157_v53 }
0x170c   :  { %6650 = vmatprep.subr.mxu0 %v7157_v53  ;;  %v3672_v16 = vmul.f32 %v7050_v37, %v8636_v25 }
0x170d   :  { %6651 = vmatpush3.msra.mxu0 %v3901_v24 }
0x170e   :  { %6629 = vmatmul.mubr.msk.f32.gmra.mxu0 %vm596_vm6, %v3672_v16  ;;  %6676 = vmatprep.subr.mxu0 %v7157_v53 }
0x170f   :  { %v7052_v18 = vpop.eup %7051  ;;  %6652 = vmatprep.mubr.msk.f32.mxu0 %vm7158_vm4, %v7157_v53 }
0x1710   :  { %v3895_v31 = vmul.f32 %v7052_v18, %v8640_v11  ;;  %v8713_v11 = vrot.slane %v8450_v22, 1  ;;  %v4269_v22 = vrot.slane %v8376_v14, 1 }
0x1712   :  { %6653 = vmatmul.mubr.msk.f32.vlgmr.msra.gmra.mxu0 %vm596_vm6, %v3895_v31  ;;  %v8724_v47 = vsel %vm1409_vm8, %v4270_v17, %v8713_v11  ;;  %v8731_v12 = vsel %vm1409_vm8, %v4269_v22, %v4270_v17 }
0x1713   :  { %v7054_v15 = vpop.eup %7053  ;;  %6677 = vmatpush3.xpose.msk.msra.mxu0 %vm193_vm2, %v8529_v28  ;;  %6655 = vmatprep.mubr.msk.f32.mxu0 %vm7158_vm4, %v7157_v53 }
0x1714   :  { %6678 = vmatprep.subr.mxu0 %v7157_v53  ;;  %v3897_v49 = vmul.f32 %v7054_v15, %v8644_v48  ;;  %v4143_v48 = vpop.permute.xlu0 %4142 }
0x1716   :  { %6656 = vmatmul.mubr.msk.f32.gmra.mxu0 %vm596_vm6, %v3897_v49 }
0x1717   :  { %6679 = vmatpush3.xpose.msk.msra.mxu0 %vm193_vm2, %v8543_v45  ;;  %6658 = vmatprep.mubr.msk.f32.mxu0 %vm7158_vm4, %v7157_v53 }
0x1718   :  { %6680 = vmatprep.subr.mxu0 %v7157_v53  ;;  %v4147_v2 = vpop.permute.xlu0 %4146 }
0x171b   :  { %6681 = vmatpush3.xpose.msk.msra.mxu0 %vm193_vm2, %v8555_v43 }
0x171c   :  { %6706 = vmatprep.subr.mxu0 %v7157_v53 }
0x1736   :  { %v3893_v50 = vpop.xlane.xlu1 %3892 }
0x1737   :  { %7055 = vrcp.f32 %v3893_v50 }
0x173a   :  { %v4145_v8 = vpop.permute.xlu1 %4144 }
0x173e   :  { %v3534_v27 = vpop.f32.mrf.mxu0 }
0x173f   :  { %v3535_v26 = vadd.f32 %v3534_v27, %v8584_v29 }
0x1740   :  { %v6594_v9 = vpop.f32.mrf.mxu0 }
0x1742   :  { %v3539_v21 = vpop.f32.mrf.mxu0 }
0x1744   :  { %v7056_v63 = vpop.eup %7055  ;;  %v6597_v25 = vpop.f32.mrf.mxu0 }
0x1745   :  { %v3899_v20 = vmul.f32 %v7056_v63, %v7044_v7  ;;  %v3540_v7 = vadd.f32 %v3539_v21, %v8586_v3 }
0x1746   :  { %v3544_v61 = vpop.f32.mrf.mxu0 }
0x1747   :  { %6659 = vmatmul.mubr.msk.f32.gmra.mxu0 %vm596_vm6, %v3899_v20  ;;  %v3545_v13 = vadd.f32 %v3544_v61, %v8588_v52 }
0x1748   :  { %6682 = vmatprep.mubr.msk.f32.mxu0 %vm7158_vm4, %v7157_v53  ;;  %v6600_v19 = vpop.f32.mrf.mxu0 }
0x174b   :  { %6683 = vmatmul.mubr.msk.f32.vlgmr.msra.gmra.mxu0 %vm193_vm2, %v4143_v48 }
0x174c   :  { %6707 = vmatpush3.msk.msra.mxu0 %vm776_vm5, %v8713_v11  ;;  %6685 = vmatprep.mubr.msk.f32.mxu0 %vm7158_vm4, %v7157_v53 }
0x174d   :  { %6708 = vmatprep.subr.mxu0 %v7157_v53 }
0x174e   :  { %6709 = vmatpush3.msra.mxu0 %v8724_v47 }
0x174f   :  { %6710 = vmatprep.subr.mxu0 %v7157_v53  ;;  %6686 = vmatmul.mubr.msk.f32.gmra.mxu0 %vm193_vm2, %v4145_v8 }
0x1750   :  { %6711 = vmatpush3.msra.mxu0 %v8731_v12  ;;  %6688 = vmatprep.mubr.msk.f32.mxu0 %vm7158_vm4, %v7157_v53 }
0x1751   :  { %6736 = vmatprep.subr.mxu0 %v7157_v53 }
0x1753   :  { %6689 = vmatmul.mubr.msk.f32.gmra.mxu0 %vm193_vm2, %v4147_v2 }
0x1754   :  { %6712 = vmatprep.mubr.msk.f32.mxu0 %vm7158_vm4, %v7157_v53 }
0x17c6   :  { %v3758_v14 = vpop.f32.mrf.mxu0 }
0x17c7   :  { %v3772_v57 = vadd.f32 %v3758_v14, %v3535_v26  ;;  %v4109_v14 = vsel %vm596_vm6, %v8610_v39, -inf }
0x17c8   :  { %v6624_v40 = vpop.f32.mrf.mxu0 }
0x17c9   :  { %v4112_v40 = vsel %vm596_vm6, %v8616_v41, -inf }
0x17ca   :  { %v3763_v32 = vpop.f32.mrf.mxu0 }
0x17cb   :  { %v3773_v38 = vadd.f32 %v3763_v32, %v3540_v7  ;;  %v4115_v32 = vsel %vm603_vm7, %v8618_v54, -inf }
0x17cc   :  { %v6627_v0 = vpop.f32.mrf.mxu0 }
0x17ce   :  { %v3768_v33 = vpop.f32.mrf.mxu0 }
0x17cf   :  { %v3774_v58 = vadd.f32 %v3768_v33, %v3545_v13 }
0x17d0   :  { %v6630_v5 = vpop.f32.mrf.mxu0 }
0x17d2   :  { %v3985_v36 = vpop.f32.mrf.mxu0 }
0x17d3   :  { %v3999_v56 = vadd.f32 %v3985_v36, %v3772_v57 }
0x17d4   :  { %v6654_v51 = vpop.f32.mrf.mxu0 }
0x17d5   :  { %4002 = vst.msk [vmem:[#allocation2] sm:$0xff] %vm193_vm2, %v3999_v56 }
0x17d6   :  { %v3990_v46 = vpop.f32.mrf.mxu0 }
0x17d7   :  { %v4000_v30 = vadd.f32 %v3990_v46, %v3773_v38 }
0x17d8   :  { %v6657_v10 = vpop.f32.mrf.mxu0 }
0x17d9   :  { %4003 = vst.msk [vmem:[#allocation2 + $0x8] sm:$0xff] %vm193_vm2, %v4000_v30 }
0x1807   :  { %v3995_v23 = vpop.f32.mrf.mxu0 }
0x1808   :  { %v4001_v29 = vadd.f32 %v3995_v23, %v3774_v58 }
0x1809   :  { %v6660_v44 = vpop.f32.mrf.mxu0 }
0x180a   :  { %4004 = vst.msk [vmem:[#allocation2 + $0x10] sm:$0x1] %vm189_vm1, %v4001_v29 }
0x180b   :  { %v4220_v55 = vpop.f32.mrf.mxu0 }
0x180c   :  { %v4234_v3 = vsel %vm596_vm6, %v4220_v55, -inf }
0x180d   :  { %4235 = vmax.xlane.f32.xlu1 %v4234_v3  ;;  %v6684_v62 = vpop.f32.mrf.mxu0 }
0x180f   :  { %v4225_v37 = vpop.f32.mrf.mxu0 }
0x1810   :  { %v4237_v24 = vsel %vm596_vm6, %v4225_v37, -inf }
0x1811   :  { %4238 = vmax.xlane.f32.xlu0 %v4237_v24  ;;  %v6687_v16 = vpop.f32.mrf.mxu0 }
0x1813   :  { %v4230_v18 = vpop.f32.mrf.mxu0 }
0x1814   :  { %v4240_v31 = vsel %vm603_vm7, %v4230_v18, -inf }
0x1815   :  { %4241 = vmax.xlane.f32.xlu0 %v4240_v31  ;;  %v6690_v52 = vpop.f32.mrf.mxu0 }
0x181e   :  { %4278 = vrot.lane.b32.xlu1 %v8713_v11, %s7159_s2 }
0x1896   :  { %v4236_v15 = vpop.xlane.xlu1 %4235 }
0x1897   :  { %v4243_v49 = vsub.f32 %v4220_v55, %v4236_v15 }
0x1899   :  { %v4246_v50 = vmul.f32 1.442695, %v4243_v49 }
0x189a   :  { %v4279_v27 = vpop.permute.xlu1 %4278  ;;  %v4239_v9 = vpop.xlane.xlu0 %4238 }
0x189b   :  { %7057 = vpow2.f32 %v4246_v50  ;;  %v4244_v21 = vsub.f32 %v4225_v37, %v4239_v9  ;;  %6692 = vmatpush3.msk.msra.mxu1 %vm776_vm5, %v4279_v27 }
0x189c   :  { %6693 = vmatprep.subr.mxu1 %v7157_v53 }
0x189d   :  { %v4248_v63 = vmul.f32 1.442695, %v4244_v21 }
0x189e   :  { %v4242_v25 = vpop.xlane.xlu0 %4241 }
0x189f   :  { %7059 = vpow2.f32 %v4248_v63  ;;  %v4245_v20 = vsub.f32 %v4230_v18, %v4242_v25 }
0x18a1   :  { %v4250_v61 = vmul.f32 1.442695, %v4245_v20 }
0x18a3   :  { %7061 = vpow2.f32 %v4250_v61 }
0x18a8   :  { %v7058_v19 = vpop.eup %7057 }
0x18a9   :  { %v4252_v48 = vsel %vm596_vm6, %v7058_v19, 0.0 }
0x18aa   :  { %4253 = vadd.xlane.f32.xlu0 %v4252_v48 }
0x18ac   :  { %v7060_v17 = vpop.eup %7059 }
0x18ad   :  { %v4255_v22 = vsel %vm596_vm6, %v7060_v17, 0.0 }
0x18ae   :  { %4256 = vadd.xlane.f32.xlu1 %v4255_v22 }
0x18b0   :  { %v7062_v8 = vpop.eup %7061 }
0x18b1   :  { %v4258_v2 = vsel %vm603_vm7, %v7062_v8, 0.0 }
0x18b2   :  { %4259 = vadd.xlane.f32.xlu0 %v4258_v2 }
0x18bf   :  { %4274 = vrot.lane.b32.xlu1 %v8731_v12, %s7159_s2 }
0x18c3   :  { %4466 = vrot.lane.b32.xlu1 %v8564_v35, %s7160_s25 }
0x18c7   :  { %4468 = vrot.lane.b32.xlu1 %v8574_v1, %s7160_s25 }
0x18c8   :  { %4276 = vrot.lane.b32.xlu0 %v8724_v47, %s7159_s2 }
0x18cb   :  { %4693 = vrot.lane.b32.xlu1 %v8564_v35, %s7161_s27 }
0x18cc   :  { %4470 = vrot.lane.b32.xlu0 %v8566_v42, %s7160_s25 }
0x18cf   :  { %4697 = vrot.lane.b32.xlu1 %v8566_v42, %s7161_s27 }
0x18d0   :  { %4695 = vrot.lane.b32.xlu0 %v8574_v1, %s7161_s27 }
0x18ef   :  { %4110 = vmax.xlane.f32.xlu0 %v4109_v14 }
0x18f3   :  { %4113 = vmax.xlane.f32.xlu1 %v4112_v40  ;;  %4116 = vmax.xlane.f32.xlu0 %v4115_v32 }
0x1933   :  { %v4254_v35 = vpop.xlane.xlu0 %4253 }
0x1934   :  { %7063 = vrcp.f32 %v4254_v35 }
0x1937   :  { %v4257_v0 = vpop.xlane.xlu1 %4256 }
0x1938   :  { %7065 = vrcp.f32 %v4257_v0 }
0x193b   :  { %v4260_v42 = vpop.xlane.xlu0 %4259  ;;  %v4275_v26 = vpop.permute.xlu1 %4274 }
0x193c   :  { %7067 = vrcp.f32 %v4260_v42 }
0x193f   :  { %v4277_v33 = vpop.permute.xlu0 %4276  ;;  %v4467_v51 = vpop.permute.xlu1 %4466 }
0x1940   :  { %6694 = vmatpush3.msra.mxu1 %v4277_v33 }
0x1941   :  { %v7064_v1 = vpop.eup %7063  ;;  %6695 = vmatprep.subr.mxu1 %v7157_v53 }
0x1942   :  { %v4262_v5 = vmul.f32 %v7064_v1, %v7058_v19  ;;  %6696 = vmatpush3.msra.mxu1 %v4275_v26 }
0x1943   :  { %6721 = vmatprep.subr.mxu1 %v7157_v53  ;;  %v4469_v38 = vpop.permute.xlu1 %4468  ;;  %v4471_v46 = vpop.permute.xlu0 %4470 }
0x1944   :  { %6698 = vmatmul.mubr.msk.f32.vlgmr.msra.gmra.mxu1 %vm596_vm6, %v4262_v5 }
0x1945   :  { %v7066_v57 = vpop.eup %7065  ;;  %6722 = vmatpush3.xpose.msk.msra.mxu1 %vm193_vm2, %v8529_v28  ;;  %6700 = vmatprep.mubr.msk.f32.mxu1 %vm7158_vm4, %v7157_v53 }
0x1946   :  { %6723 = vmatprep.subr.mxu1 %v7157_v53  ;;  %v4264_v36 = vmul.f32 %v7066_v57, %v7060_v17 }
0x1948   :  { %6701 = vmatmul.mubr.msk.f32.gmra.mxu1 %vm596_vm6, %v4264_v36 }
0x1949   :  { %v7068_v7 = vpop.eup %7067  ;;  %6724 = vmatpush3.xpose.msk.msra.mxu1 %vm193_vm2, %v8543_v45  ;;  %6703 = vmatprep.mubr.msk.f32.mxu1 %vm7158_vm4, %v7157_v53 }
0x194a   :  { %6725 = vmatprep.subr.mxu1 %v7157_v53  ;;  %v4266_v56 = vmul.f32 %v7068_v7, %v7062_v8 }
0x194c   :  { %6704 = vmatmul.mubr.msk.f32.gmra.mxu1 %vm596_vm6, %v4266_v56 }
0x194d   :  { %6726 = vmatpush3.xpose.msk.msra.mxu1 %vm193_vm2, %v8555_v43  ;;  %6727 = vmatprep.mubr.msk.f32.mxu1 %vm7158_vm4, %v7157_v53 }
0x194e   :  { %6751 = vmatprep.subr.mxu1 %v7157_v53 }
0x1950   :  { %6728 = vmatmul.mubr.msk.f32.vlgmr.msra.gmra.mxu1 %vm193_vm2, %v4467_v51 }
0x1951   :  { %6752 = vmatpush3.xpose.msk.msra.mxu1 %vm193_vm2, %v8529_v28  ;;  %6730 = vmatprep.mubr.msk.f32.mxu1 %vm7158_vm4, %v7157_v53  ;;  %v4694_v28 = vpop.permute.xlu1 %4693 }
0x1952   :  { %6753 = vmatprep.subr.mxu1 %v7157_v53 }
0x1954   :  { %6731 = vmatmul.mubr.msk.f32.gmra.mxu1 %vm193_vm2, %v4469_v38 }
0x1955   :  { %6754 = vmatpush3.xpose.msk.msra.mxu1 %vm193_vm2, %v8543_v45  ;;  %6733 = vmatprep.mubr.msk.f32.mxu1 %vm7158_vm4, %v7157_v53  ;;  %v4696_v45 = vpop.permute.xlu0 %4695  ;;  %v4698_v30 = vpop.permute.xlu1 %4697 }
0x1956   :  { %6755 = vmatprep.subr.mxu1 %v7157_v53 }
0x1958   :  { %6734 = vmatmul.mubr.msk.f32.gmra.mxu1 %vm193_vm2, %v4471_v46 }
0x1959   :  { %6756 = vmatpush3.xpose.msk.msra.mxu1 %vm193_vm2, %v8555_v43  ;;  %6757 = vmatprep.mubr.msk.f32.mxu1 %vm7158_vm4, %v7157_v53 }
0x195a   :  { %6781 = vmatprep.subr.mxu1 %v7157_v53 }
0x195c   :  { %6758 = vmatmul.mubr.msk.f32.vlgmr.msra.gmra.mxu1 %vm193_vm2, %v4694_v28 }
0x195d   :  { %6760 = vmatprep.mubr.msk.f32.mxu1 %vm7158_vm4, %v7157_v53 }
0x1960   :  { %6761 = vmatmul.mubr.msk.f32.gmra.mxu1 %vm193_vm2, %v4696_v45 }
0x1961   :  { %6763 = vmatprep.mubr.msk.f32.mxu1 %vm7158_vm4, %v7157_v53 }
0x1964   :  { %6764 = vmatmul.mubr.msk.f32.gmra.mxu1 %vm193_vm2, %v4698_v30 }
0x1965   :  { %6789 = vmatprep.mubr.msk.f32.mxu1 %vm7158_vm4, %v7157_v53 }
0x1978   :  { %v4111_v43 = vpop.xlane.xlu0 %4110 }
0x1979   :  { %v4118_v13 = vsub.f32 %v8610_v39, %v4111_v43 }
0x197b   :  { %v4121_v3 = vmul.f32 1.442695, %v4118_v13 }
0x197c   :  { %v4114_v58 = vpop.xlane.xlu1 %4113  ;;  %v4117_v23 = vpop.xlane.xlu0 %4116 }
0x197d   :  { %v4119_v44 = vsub.f32 %v8616_v41, %v4114_v58  ;;  %v4120_v62 = vsub.f32 %v8618_v54, %v4117_v23  ;;  %7069 = vpow2.f32 %v4121_v3 }
0x197f   :  { %v4123_v24 = vmul.f32 1.442695, %v4119_v44  ;;  %v4125_v18 = vmul.f32 1.442695, %v4120_v62 }
0x1981   :  { %7071 = vpow2.f32 %v4123_v24 }
0x1982   :  { %7073 = vpow2.f32 %v4125_v18 }
0x198a   :  { %v7070_v9 = vpop.eup %7069 }
0x198b   :  { %v4127_v20 = vsel %vm596_vm6, %v7070_v9, 0.0 }
0x198e   :  { %v7072_v25 = vpop.eup %7071 }
0x198f   :  { %v7074_v19 = vpop.eup %7073  ;;  %v4130_v8 = vsel %vm596_vm6, %v7072_v25, 0.0 }
0x1990   :  { %v4133_v22 = vsel %vm603_vm7, %v7074_v19, 0.0 }
0x1a04   :  { %v8825_v10 = vpop.f32.mrf.mxu1 }
0x1a06   :  { %v6699_v29 = vpop.f32.mrf.mxu1 }
0x1a08   :  { %v8829_v55 = vpop.f32.mrf.mxu1 }
0x1a0a   :  { %v6702_v37 = vpop.f32.mrf.mxu1 }
0x1a0c   :  { %v8832_v16 = vpop.f32.mrf.mxu1 }
0x1a0e   :  { %v6705_v31 = vpop.f32.mrf.mxu1 }
0x1a0f   :  { %v4924_v31 = vld [vmem:[#allocation2 + $0x8] sm:$0xff] }
0x1a10   :  { %v4544_v52 = vpop.f32.mrf.mxu1 }
0x1a11   :  { %v4558_v39 = vsel %vm596_vm6, %v4544_v52, -inf }
0x1a12   :  { %4559 = vmax.xlane.f32.xlu0 %v4558_v39  ;;  %v6729_v15 = vpop.f32.mrf.mxu1  ;;  %v8879_v39 = vld [vmem:[%s9160_s12 + $0x1] ss:$0 sm:$0xff] }
0x1a14   :  { %v4549_v41 = vpop.f32.mrf.mxu1 }
0x1a15   :  { %v4561_v49 = vsel %vm596_vm6, %v4549_v41, -inf }
0x1a16   :  { %4562 = vmax.xlane.f32.xlu0 %v4561_v49  ;;  %v6732_v50 = vpop.f32.mrf.mxu1 }
0x1a18   :  { %v8836_v54 = vpop.f32.mrf.mxu1 }
0x1a19   :  { %v4564_v27 = vsel %vm603_vm7, %v8836_v54, -inf }
0x1a1a   :  { %4565 = vmax.xlane.f32.xlu1 %v4564_v27  ;;  %v6735_v21 = vpop.f32.mrf.mxu1 }
0x1a1c   :  { %v4771_v63 = vpop.f32.mrf.mxu1 }
0x1a1d   :  { %v4785_v61 = vsel %vm596_vm6, %v4771_v63, -inf }
0x1a1e   :  { %4128 = vadd.xlane.f32.xlu1 %v4127_v20  ;;  %4786 = vmax.xlane.f32.xlu0 %v4785_v61  ;;  %v6759_v48 = vpop.f32.mrf.mxu1 }
0x1a20   :  { %v8842_v17 = vpop.f32.mrf.mxu1 }
0x1a22   :  { %4134 = vadd.xlane.f32.xlu1 %v4133_v22  ;;  %4131 = vadd.xlane.f32.xlu0 %v4130_v8  ;;  %v6762_v2 = vpop.f32.mrf.mxu1 }
0x1a24   :  { %v8846_v14 = vpop.f32.mrf.mxu1 }
0x1a26   :  { %v6765_v40 = vpop.f32.mrf.mxu1 }
0x1a33   :  { %4593 = vrot.lane.b32.xlu1 %v8724_v47, %s7160_s25 }
0x1a37   :  { %4591 = vrot.lane.b32.xlu1 %v8731_v12, %s7160_s25 }
0x1a3b   :  { %4822 = vrot.lane.b32.xlu1 %v8713_v11, %s7161_s27 }
0x1a9b   :  { %v4560_v32 = vpop.xlane.xlu0 %4559 }
0x1a9c   :  { %v4567_v35 = vsub.f32 %v4544_v52, %v4560_v32  ;;  %v4929_v52 = vadd.f32 %v4924_v31, %v8218_v4  ;;  %v4788_v4 = vsel %vm596_vm6, %v8842_v17, -inf }
0x1a9e   :  { %v4570_v0 = vmul.f32 1.442695, %v4567_v35  ;;  %v8884_v15 = vadd.f32 %v8879_v39, %v4929_v52 }
0x1a9f   :  { %v4563_v42 = vpop.xlane.xlu0 %4562 }
0x1aa0   :  { %7075 = vpow2.f32 %v4570_v0  ;;  %v4568_v33 = vsub.f32 %v4549_v41, %v4563_v42 }
0x1aa2   :  { %v4572_v1 = vmul.f32 1.442695, %v4568_v33 }
0x1aa3   :  { %v4566_v26 = vpop.xlane.xlu1 %4565 }
0x1aa4   :  { %7077 = vpow2.f32 %v4572_v1  ;;  %v4569_v62 = vsub.f32 %v8836_v54, %v4566_v26 }
0x1aa6   :  { %v4574_v37 = vmul.f32 1.442695, %v4569_v62 }
0x1aa7   :  { %v4129_v5 = vpop.xlane.xlu1 %4128  ;;  %v4787_v57 = vpop.xlane.xlu0 %4786 }
0x1aa8   :  { %v4794_v36 = vsub.f32 %v4771_v63, %v4787_v57  ;;  %7079 = vrcp.f32 %v4129_v5 }
0x1aaa   :  { %v4797_v7 = vmul.f32 1.442695, %v4794_v36 }
0x1aab   :  { %v4132_v56 = vpop.xlane.xlu0 %4131  ;;  %v4135_v38 = vpop.xlane.xlu1 %4134 }
0x1aac   :  { %7081 = vpow2.f32 %v4797_v7 }
0x1aad   :  { %v7076_v51 = vpop.eup %7075  ;;  %7083 = vrcp.f32 %v4132_v56 }
0x1aae   :  { %v4576_v46 = vsel %vm596_vm6, %v7076_v51, 0.0  ;;  %7085 = vrcp.f32 %v4135_v38 }
0x1aaf   :  { %4577 = vadd.xlane.f32.xlu0 %v4576_v46  ;;  %7087 = vpow2.f32 %v4574_v37  ;;  %v4594_v41 = vpop.permute.xlu1 %4593 }
0x1ab1   :  { %v7078_v28 = vpop.eup %7077 }
0x1ab2   :  { %v4579_v45 = vsel %vm596_vm6, %v7078_v28, 0.0 }
0x1ab3   :  { %4580 = vadd.xlane.f32.xlu1 %v4579_v45  ;;  %v4592_v49 = vpop.permute.xlu1 %4591 }
0x1ab5   :  { %v7080_v30 = vpop.eup %7079 }
0x1ab6   :  { %v4137_v43 = vmul.f32 %v7080_v30, %v7070_v9 }
0x1ab7   :  { %v4823_v50 = vpop.permute.xlu1 %4822 }
0x1ab8   :  { %6713 = vmatmul.mubr.msk.f32.vlgmr.msra.gmra.mxu0 %vm596_vm6, %v4137_v43 }
0x1ab9   :  { %v8856_v13 = vpop.eup %7081  ;;  %6715 = vmatprep.mubr.msk.f32.mxu0 %vm7158_vm4, %v7157_v53 }
0x1aba   :  { %v4803_v58 = vsel %vm596_vm6, %v8856_v13, 0.0  ;;  %v7084_v23 = vpop.eup %7083 }
0x1abb   :  { %4804 = vadd.xlane.f32.xlu1 %v4803_v58  ;;  %v4139_v29 = vmul.f32 %v7084_v23, %v7072_v25  ;;  %v7086_v44 = vpop.eup %7085 }
0x1abc   :  { %v4141_v3 = vmul.f32 %v7086_v44, %v7074_v19  ;;  %v7088_v24 = vpop.eup %7087 }
0x1abd   :  { %6716 = vmatmul.mubr.msk.f32.gmra.mxu0 %vm596_vm6, %v4139_v29  ;;  %v4582_v18 = vsel %vm603_vm7, %v7088_v24, 0.0 }
0x1abe   :  { %6718 = vmatprep.mubr.msk.f32.mxu0 %vm7158_vm4, %v7157_v53 }
0x1ac1   :  { %6719 = vmatmul.mubr.msk.f32.gmra.mxu0 %vm596_vm6, %v4141_v3 }
0x1ac2   :  { %6742 = vmatprep.mubr.msk.f32.mxu0 %vm7158_vm4, %v7157_v53 }
0x1ac5   :  { %4595 = vrot.lane.b32.xlu0 %v8713_v11, %s7160_s25  ;;  %v4791_v11 = vsel %vm603_vm7, %v8846_v14, -inf }
0x1acc   :  { %4818 = vrot.lane.b32.xlu1 %v8731_v12, %s7161_s27  ;;  %v4953_v12 = vsel %vm193_vm2, %v8884_v15, 0.0 }
0x1ae4   :  { %4583 = vadd.xlane.f32.xlu0 %v4582_v18 }
0x1af0   :  { %4792 = vmax.xlane.f32.xlu1 %v4791_v11 }
0x1af4   :  { %4954 = vadd.xlane.f32.xlu1 %v4953_v12 }
0x1afa   :  { %4820 = vrot.lane.b32.xlu0 %v8724_v47, %s7161_s27 }
0x1b19   :  { %4789 = vmax.xlane.f32.xlu0 %v4788_v4 }
0x1b38   :  { %v4578_v54 = vpop.xlane.xlu0 %4577 }
0x1b39   :  { %7089 = vrcp.f32 %v4578_v54 }
0x1b3c   :  { %v4581_v27 = vpop.xlane.xlu1 %4580  ;;  %v4596_v9 = vpop.permute.xlu0 %4595 }
0x1b3d   :  { %7091 = vrcp.f32 %v4581_v27  ;;  %6737 = vmatpush3.msk.msra.mxu0 %vm776_vm5, %v4596_v9 }
0x1b3e   :  { %6738 = vmatprep.subr.mxu0 %v7157_v53 }
0x1b3f   :  { %6739 = vmatpush3.msra.mxu0 %v4594_v41 }
0x1b40   :  { %6740 = vmatprep.subr.mxu0 %v7157_v53 }
0x1b41   :  { %6741 = vmatpush3.msra.mxu0 %v4592_v49 }
0x1b42   :  { %6766 = vmatprep.subr.mxu0 %v7157_v53 }
0x1b44   :  { %v4805_v20 = vpop.xlane.xlu1 %4804 }
0x1b46   :  { %v7090_v47 = vpop.eup %7089 }
0x1b47   :  { %v4586_v21 = vmul.f32 %v7090_v47, %v7076_v51  ;;  %v4923_v51 = vld [vmem:[#allocation2] sm:$0xff] }
0x1b48   :  { %v4819_v48 = vpop.permute.xlu1 %4818 }
0x1b49   :  { %6743 = vmatmul.mubr.msk.f32.vlgmr.msra.gmra.mxu0 %vm596_vm6, %v4586_v21 }
0x1b4a   :  { %v7092_v63 = vpop.eup %7091  ;;  %6767 = vmatpush3.msk.msra.mxu0 %vm776_vm5, %v4823_v50  ;;  %6745 = vmatprep.mubr.msk.f32.mxu0 %vm7158_vm4, %v7157_v53 }
0x1b4b   :  { %v4588_v25 = vmul.f32 %v7092_v63, %v7078_v28  ;;  %6768 = vmatprep.subr.mxu0 %v7157_v53  ;;  %v4928_v28 = vadd.f32 %v4923_v51, %v8212_v60 }
0x1b4d   :  { %6746 = vmatmul.mubr.msk.f32.gmra.mxu0 %vm596_vm6, %v4588_v25  ;;  %v8919_v43 = vadd.f32 %v8879_v39, %v4928_v28 }
0x1b4e   :  { %6748 = vmatprep.mubr.msk.f32.mxu0 %vm7158_vm4, %v7157_v53 }
0x1b6d   :  { %v4584_v61 = vpop.xlane.xlu0 %4583 }
0x1b6e   :  { %7093 = vrcp.f32 %v4584_v61 }
0x1b6f   :  { %7095 = vrcp.f32 %v4805_v20 }
0x1b71   :  { %v4821_v19 = vpop.permute.xlu0 %4820 }
0x1b72   :  { %6769 = vmatpush3.msra.mxu0 %v4821_v19 }
0x1b73   :  { %6770 = vmatprep.subr.mxu0 %v7157_v53 }
0x1b74   :  { %6771 = vmatpush3.msra.mxu0 %v4819_v48  ;;  %v5805_v48 = vld [vmem:[%s9163_s15 + $0x38] sm:$0xff] }
0x1b75   :  { %6804 = vmatprep.subr.mxu0 %v7157_v53  ;;  %6782 = vmatpush3.msra.mxu1 %v5805_v48 }
0x1b76   :  { %6783 = vmatprep.subr.mxu1 %v7157_v53 }
0x1b78   :  { %v4452_v22 = vpop.f32.mrf.mxu0 }
0x1b79   :  { %v4793_v26 = vpop.xlane.xlu1 %4792  ;;  %v4453_v62 = vadd.f32 %v4452_v22, %v8825_v10  ;;  %v5804_v22 = vld [vmem:[%s9163_s15 + $0x30] sm:$0xff] }
0x1b7a   :  { %v6714_v2 = vpop.f32.mrf.mxu0  ;;  %v4796_v5 = vsub.f32 %v8846_v14, %v4793_v26  ;;  %6784 = vmatpush3.msra.mxu1 %v5804_v22 }
0x1b7b   :  { %v7094_v8 = vpop.eup %7093  ;;  %6785 = vmatprep.subr.mxu1 %v7157_v53  ;;  %v5802_v2 = vld [vmem:[%s9163_s15 + $0x20] sm:$0xff] }
0x1b7c   :  { %v4590_v40 = vmul.f32 %v7094_v8, %v7088_v24  ;;  %v7096_v32 = vpop.eup %7095  ;;  %v4801_v7 = vmul.f32 1.442695, %v4796_v5  ;;  %v5803_v8 = vld [vmem:[%s9163_s15 + $0x28] sm:$0xff]  ;;  %s9185_s15 = sld [smem:[#allocation11_spill]] }
0x1b7d   :  { %v4457_v35 = vpop.f32.mrf.mxu0  ;;  %v4813_v0 = vmul.f32 %v7096_v32, %v8856_v13  ;;  %v4955_v4 = vpop.xlane.xlu1 %4954  ;;  %6786 = vmatpush3.msra.mxu1 %v5803_v8 }
0x1b7e   :  { %6749 = vmatmul.mubr.msk.f32.gmra.mxu0 %vm596_vm6, %v4590_v40  ;;  %v4458_v58 = vadd.f32 %v4457_v35, %v8829_v55  ;;  %6787 = vmatprep.subr.mxu1 %v7157_v53 }
0x1b7f   :  { %6772 = vmatprep.mubr.msk.f32.mxu0 %vm7158_vm4, %v7157_v53  ;;  %v6717_v42 = vpop.f32.mrf.mxu0  ;;  %6788 = vmatpush3.msra.mxu1 %v5802_v2 }
0x1b80   :  { %6835 = vmatprep.subr.mxu1 %v7157_v53 }
0x1b81   :  { %v4462_v33 = vpop.f32.mrf.mxu0 }
0x1b82   :  { %6773 = vmatmul.mubr.msk.f32.vlgmr.msra.gmra.mxu0 %vm596_vm6, %v4813_v0  ;;  %v4463_v44 = vadd.f32 %v4462_v33, %v8832_v16  ;;  %v4966_v16 = vmul.f32 0.03125, %v4955_v4 }
0x1b83   :  { %6775 = vmatprep.mubr.msk.f32.mxu0 %vm7158_vm4, %v7157_v53  ;;  %v6720_v1 = vpop.f32.mrf.mxu0 }
0x1b84   :  { %v4971_v9 = vsub.f32 %v8884_v15, %v4966_v16 }
0x1b86   :  { %v4976_v19 = vmul.f32 %v4971_v9, %v4971_v9 }
0x1ba2   :  { %v4790_v57 = vpop.xlane.xlu0 %4789 }
0x1ba3   :  { %v4795_v36 = vsub.f32 %v8842_v17, %v4790_v57  ;;  %v4950_v17 = vsel %vm193_vm2, %v8919_v43, 0.0 }
0x1ba5   :  { %v4799_v56 = vmul.f32 1.442695, %v4795_v36 }
0x1ba7   :  { %7097 = vpow2.f32 %v4799_v56  ;;  %v8968_v56 = vld [vmem:[%s9161_s13 + $0x1] ss:$0 sm:$0xff] }
0x1ba8   :  { %7099 = vpow2.f32 %v4801_v7 }
0x1bb4   :  { %v7098_v38 = vpop.eup %7097 }
0x1bb5   :  { %v4806_v46 = vsel %vm596_vm6, %v7098_v38, 0.0  ;;  %v7100_v45 = vpop.eup %7099 }
0x1bb6   :  { %4807 = vadd.xlane.f32.xlu0 %v4806_v46  ;;  %v4809_v30 = vsel %vm603_vm7, %v7100_v45, 0.0 }
0x1bba   :  { %4810 = vadd.xlane.f32.xlu0 %v4809_v30 }
0x1bbe   :  { %4951 = vadd.xlane.f32.xlu0 %v4950_v17 }
0x1c09   :  { %v4676_v14 = vpop.f32.mrf.mxu0 }
0x1c0a   :  { %v4690_v31 = vadd.f32 %v4676_v14, %v4453_v62 }
0x1c0b   :  { %v6744_v13 = vpop.f32.mrf.mxu0 }
0x1c0d   :  { %v4681_v23 = vpop.f32.mrf.mxu0 }
0x1c0e   :  { %v8924_v29 = vadd.f32 %v4681_v23, %v4458_v58 }
0x1c0f   :  { %v6747_v60 = vpop.f32.mrf.mxu0 }
0x1c3e   :  { %v4686_v3 = vpop.f32.mrf.mxu0 }
0x1c3f   :  { %v8928_v37 = vadd.f32 %v4686_v3, %v4463_v44  ;;  %v4808_v24 = vpop.xlane.xlu0 %4807 }
0x1c40   :  { %7101 = vrcp.f32 %v4808_v24  ;;  %v6750_v18 = vpop.f32.mrf.mxu0 }
0x1c42   :  { %v4903_v52 = vpop.f32.mrf.mxu0 }
0x1c43   :  { %v4917_v11 = vadd.f32 %v4903_v52, %v4690_v31  ;;  %v4811_v12 = vpop.xlane.xlu0 %4810 }
0x1c44   :  { %7103 = vrcp.f32 %v4811_v12  ;;  %v6774_v55 = vpop.f32.mrf.mxu0 }
0x1c45   :  { %4920 = vst.msk [vmem:[#allocation2 + $0x11] sm:$0xff] %vm193_vm2, %v4917_v11 }
0x1c47   :  { %v4952_v41 = vpop.xlane.xlu0 %4951 }
0x1c48   :  { %v4965_v49 = vmul.f32 0.03125, %v4952_v41 }
0x1c4a   :  { %v4970_v50 = vsub.f32 %v8919_v43, %v4965_v49 }
0x1c4c   :  { %v4975_v10 = vmul.f32 %v4970_v50, %v4970_v50  ;;  %v4925_v54 = vld [vmem:[#allocation2 + $0x10] sm:$0xff] }
0x1c4d   :  { %v7102_v27 = vpop.eup %7101  ;;  %v4930_v47 = vadd.f32 %v4925_v54, %v8234_v59  ;;  %v4983_v59 = vsel %vm193_vm2, %v4976_v19, 0.0 }
0x1c4e   :  { %v4980_v21 = vsel %vm193_vm2, %v4975_v10, 0.0  ;;  %v4815_v63 = vmul.f32 %v7102_v27, %v7098_v38  ;;  %v8973_v38 = vld [vmem:[%s9162_s14 + $0x1] ss:$0 sm:$0xff] }
0x1c4f   :  { %4981 = vadd.xlane.f32.xlu1 %v4980_v21  ;;  %v8936_v25 = vadd.f32 %v8879_v39, %v4930_v47 }
0x1c50   :  { %6776 = vmatmul.mubr.msk.f32.gmra.mxu0 %vm596_vm6, %v4815_v63 }
0x1c51   :  { %v7104_v20 = vpop.eup %7103  ;;  %v4956_v61 = vsel %vm193_vm2, %v8936_v25, 0.0  ;;  %6778 = vmatprep.mubr.msk.f32.mxu0 %vm7158_vm4, %v7157_v53 }
0x1c52   :  { %4957 = vadd.xlane.f32.xlu0 %v4956_v61  ;;  %v4817_v15 = vmul.f32 %v7104_v20, %v7100_v45 }
0x1c54   :  { %6779 = vmatmul.mubr.msk.f32.gmra.mxu0 %vm596_vm6, %v4817_v15 }
0x1c55   :  { %6820 = vmatprep.mubr.msk.f32.mxu0 %vm7158_vm4, %v7157_v53 }
0x1c56   :  { %4984 = vadd.xlane.f32.xlu0 %v4983_v59 }
0x1cd8   :  { %v4982_v40 = vpop.xlane.xlu1 %4981 }
0x1cd9   :  { %v4995_v32 = vmul.f32 0.03125, %v4982_v40 }
0x1cdb   :  { %v5000_v35 = vadd.f32 1e-05, %v4995_v32  ;;  %v4958_v0 = vpop.xlane.xlu0 %4957 }
0x1cdc   :  { %v4967_v42 = vmul.f32 0.03125, %v4958_v0 }
0x1cdd   :  { %7105 = vrsqrt.f32 %v5000_v35 }
0x1cde   :  { %v4972_v33 = vsub.f32 %v8936_v25, %v4967_v42 }
0x1cdf   :  { %v4985_v1 = vpop.xlane.xlu0 %4984 }
0x1ce0   :  { %v4996_v26 = vmul.f32 0.03125, %v4985_v1  ;;  %v4977_v5 = vmul.f32 %v4972_v33, %v4972_v33 }
0x1ce2   :  { %v5001_v57 = vadd.f32 1e-05, %v4996_v26  ;;  %v4986_v36 = vsel %vm193_vm2, %v4977_v5, 0.0 }
0x1ce3   :  { %4987 = vadd.xlane.f32.xlu1 %v4986_v36 }
0x1ce4   :  { %7107 = vrsqrt.f32 %v5001_v57 }
0x1cea   :  { %v7106_v7 = vpop.eup %7105 }
0x1ceb   :  { %v5010_v51 = vmul.f32 %v7106_v7, %v4970_v50 }
0x1ced   :  { %v5021_v46 = vmul.f32 %v8968_v56, %v5010_v51 }
0x1cef   :  { %v5032_v28 = vadd.f32 %v8973_v38, %v5021_v46 }
0x1cf1   :  { %v7108_v45 = vpop.eup %7107  ;;  %6790 = vmatmul.mubr.msk.f32.vlgmr.msra.gmra.mxu1 %vm193_vm2, %v5032_v28 }
0x1cf2   :  { %v5011_v30 = vmul.f32 %v7108_v45, %v4971_v9  ;;  %6792 = vmatprep.mubr.msk.f32.mxu1 %vm7158_vm4, %v7157_v53  ;;  %v9003_v9 = vld [vmem:[%s9164_s16 + $0x1] ss:$0 sm:$0xff] }
0x1cf4   :  { %v5022_v17 = vmul.f32 %v8968_v56, %v5011_v30 }
0x1cf6   :  { %v5033_v14 = vadd.f32 %v8973_v38, %v5022_v17 }
0x1cf8   :  { %6793 = vmatmul.mubr.msk.f32.gmra.mxu1 %vm193_vm2, %v5033_v14 }
0x1cf9   :  { %6795 = vmatprep.mubr.msk.f32.mxu1 %vm7158_vm4, %v7157_v53 }
0x1d10   :  { %v4908_v13 = vpop.f32.mrf.mxu0 }
0x1d11   :  { %v4918_v58 = vadd.f32 %v4908_v13, %v8924_v29 }
0x1d12   :  { %v6777_v23 = vpop.f32.mrf.mxu0 }
0x1d13   :  { %4921 = vst.msk [vmem:[#allocation2 + $0x19] sm:$0xff] %vm193_vm2, %v4918_v58 }
0x1d14   :  { %v4913_v60 = vpop.f32.mrf.mxu0 }
0x1d15   :  { %v4919_v44 = vadd.f32 %v4913_v60, %v8928_v37 }
0x1d16   :  { %v6780_v3 = vpop.f32.mrf.mxu0 }
0x1d17   :  { %4922 = vst.msk [vmem:[#allocation2 + $0x21] sm:$0x1] %vm189_vm1, %v4919_v44 }
0x1d1a   :  { %v4926_v62 = vld [vmem:[#allocation2 + $0x18] sm:$0xff] }
0x1d1b   :  { %v4931_v24 = vadd.f32 %v4926_v62, %v8322_v6 }
0x1d1d   :  { %v4944_v18 = vadd.f32 %v8879_v39, %v4931_v24 }
0x1d1e   :  { %v4927_v31 = vld [vmem:[#allocation2 + $0x20] sm:$0x3] }
0x1d1f   :  { %v4959_v52 = vsel %vm193_vm2, %v4944_v18, 0.0  ;;  %v4932_v11 = vadd.f32 %v4927_v31, %v8328_v34  ;;  %v5829_v31 = vld [vmem:[%s9167_s19 + $0x78] sm:$0xff] }
0x1d20   :  { %4960 = vadd.xlane.f32.xlu0 %v4959_v52  ;;  %v5828_v52 = vld [vmem:[%s9167_s19 + $0x70] sm:$0xff]  ;;  %6805 = vmatpush3.msra.mxu0 %v5829_v31 }
0x1d21   :  { %v4945_v29 = vadd.f32 %v8879_v39, %v4932_v11  ;;  %6806 = vmatprep.subr.mxu0 %v7157_v53  ;;  %v5825_v11 = vld [vmem:[%s9167_s19 + $0x58] sm:$0xff] }
0x1d22   :  { %6807 = vmatpush3.msra.mxu0 %v5828_v52 }
0x1d23   :  { %v4962_v12 = vsel %vm220_vm3, %v4945_v29, 0.0  ;;  %6808 = vmatprep.subr.mxu0 %v7157_v53 }
0x1d24   :  { %4963 = vadd.xlane.f32.xlu1 %v4962_v12  ;;  %v5823_v12 = vld [vmem:[%s9167_s19 + $0x48] sm:$0xff] }
0x1d6c   :  { %v4988_v37 = vpop.xlane.xlu1 %4987 }
0x1d6d   :  { %v4997_v55 = vmul.f32 0.03125, %v4988_v37  ;;  %v5822_v37 = vld [vmem:[%s9167_s19 + $0x40] sm:$0xff] }
0x1d6f   :  { %v5002_v4 = vadd.f32 1e-05, %v4997_v55 }
0x1d71   :  { %7109 = vrsqrt.f32 %v5002_v4 }
0x1d7e   :  { %v7110_v41 = vpop.eup %7109 }
0x1d7f   :  { %v5012_v49 = vmul.f32 %v7110_v41, %v4972_v33 }
0x1d81   :  { %v5023_v6 = vmul.f32 %v8968_v56, %v5012_v49 }
0x1d83   :  { %v5034_v16 = vadd.f32 %v8973_v38, %v5023_v6 }
0x1d85   :  { %6796 = vmatmul.mubr.msk.f32.gmra.mxu1 %vm193_vm2, %v5034_v16 }
0x1d86   :  { %6798 = vmatprep.mubr.msk.f32.mxu1 %vm7158_vm4, %v7157_v53 }
0x1da9   :  { %v4961_v34 = vpop.xlane.xlu0 %4960 }
0x1daa   :  { %v4968_v39 = vmul.f32 0.03125, %v4961_v34 }
0x1dac   :  { %v4973_v50 = vsub.f32 %v4944_v18, %v4968_v39 }
0x1dad   :  { %v4964_v10 = vpop.xlane.xlu1 %4963 }
0x1dae   :  { %v4969_v54 = vmul.f32 0.03125, %v4964_v10  ;;  %v4978_v27 = vmul.f32 %v4973_v50, %v4973_v50 }
0x1db0   :  { %v4974_v47 = vsub.f32 %v4945_v29, %v4969_v54  ;;  %v4989_v21 = vsel %vm193_vm2, %v4978_v27, 0.0  ;;  %v5824_v29 = vld [vmem:[%s9167_s19 + $0x50] sm:$0xff] }
0x1db1   :  { %4990 = vadd.xlane.f32.xlu0 %v4989_v21  ;;  %v5131_v63 = vpop.f32.mrf.mxu1 }
0x1db2   :  { %v5132_v20 = vadd.f32 %v9003_v9, %v5131_v63  ;;  %v4979_v61 = vmul.f32 %v4974_v47, %v4974_v47  ;;  %v9078_v63 = vld [vmem:[%s9166_s18 + $0x1] ss:$0 sm:$0xff] }
0x1db3   :  { %v6791_v19 = vpop.f32.mrf.mxu1 }
0x1db4   :  { %v4992_v15 = vsel %vm220_vm3, %v4979_v61, 0.0  ;;  %v5159_v59 = vsel %vm88_vm0, %v5132_v20, 0.0 }
0x1db5   :  { %4993 = vadd.xlane.f32.xlu1 %v4992_v15  ;;  %5160 = vadd.xlane.f32.xlu0 %v5159_v59 }
0x1db8   :  { %v5136_v48 = vpop.f32.mrf.mxu1 }
0x1db9   :  { %v5137_v22 = vadd.f32 %v9003_v9, %v5136_v48 }
0x1dba   :  { %v6794_v8 = vpop.f32.mrf.mxu1 }
0x1dbb   :  { %v5162_v2 = vsel %vm88_vm0, %v5137_v22, 0.0 }
0x1dbc   :  { %5163 = vadd.xlane.f32.xlu1 %v5162_v2 }
0x1e3a   :  { %v4991_v40 = vpop.xlane.xlu0 %4990 }
0x1e3b   :  { %v4998_v32 = vmul.f32 0.03125, %v4991_v40 }
0x1e3d   :  { %v5003_v35 = vadd.f32 1e-05, %v4998_v32 }
0x1e3e   :  { %v4994_v0 = vpop.xlane.xlu1 %4993  ;;  %v5161_v42 = vpop.xlane.xlu0 %5160 }
0x1e3f   :  { %7111 = vrsqrt.f32 %v5003_v35  ;;  %v4999_v33 = vmul.f32 0.03125, %v4994_v0  ;;  %v5174_v1 = vmul.f32 0.015625, %v5161_v42 }
0x1e41   :  { %v5004_v26 = vadd.f32 1e-05, %v4999_v33  ;;  %v9011_v5 = vsub.f32 %v5132_v20, %v5174_v1 }
0x1e43   :  { %7113 = vrsqrt.f32 %v5004_v26  ;;  %v5184_v57 = vmul.f32 %v9011_v5, %v9011_v5 }
0x1e45   :  { %v5164_v36 = vpop.xlane.xlu1 %5163  ;;  %v5141_v7 = vpop.f32.mrf.mxu1  ;;  %v5189_v51 = vsel %vm88_vm0, %v5184_v57, 0.0 }
0x1e46   :  { %v5175_v46 = vmul.f32 0.015625, %v5164_v36  ;;  %v5142_v28 = vadd.f32 %v9003_v9, %v5141_v7  ;;  %5190 = vadd.xlane.f32.xlu1 %v5189_v51 }
0x1e47   :  { %v6797_v45 = vpop.f32.mrf.mxu1 }
0x1e48   :  { %v9017_v30 = vsub.f32 %v5137_v22, %v5175_v46  ;;  %v5165_v17 = vsel %vm88_vm0, %v5142_v28, 0.0  ;;  %v5402_v45 = vld [vmem:[%s9185_s15 + $0x18] sm:$0xff] }
0x1e49   :  { %5166 = vadd.xlane.f32.xlu0 %v5165_v17  ;;  %6836 = vmatpush3.msra.mxu1 %v5402_v45  ;;  %v5399_v17 = vld [vmem:[%s9185_s15] sm:$0xff] }
0x1e4a   :  { %v5185_v14 = vmul.f32 %v9017_v30, %v9017_v30  ;;  %6837 = vmatprep.subr.mxu1 %v7157_v53 }
0x1e4c   :  { %v7112_v13 = vpop.eup %7111  ;;  %v5192_v58 = vsel %vm88_vm0, %v5185_v14, 0.0 }
0x1e4d   :  { %v5013_v23 = vmul.f32 %v7112_v13, %v4973_v50  ;;  %5193 = vadd.xlane.f32.xlu0 %v5192_v58 }
0x1e4f   :  { %v5024_v60 = vmul.f32 %v8968_v56, %v5013_v23 }
0x1e50   :  { %v7114_v44 = vpop.eup %7113 }
0x1e51   :  { %v5014_v3 = vmul.f32 %v7114_v44, %v4974_v47  ;;  %v5035_v62 = vadd.f32 %v8973_v38, %v5024_v60  ;;  %v9072_v47 = vld [vmem:[%s9165_s17 + $0x1] ss:$0 sm:$0xff] }
0x1e53   :  { %6799 = vmatmul.mubr.msk.f32.gmra.mxu1 %vm193_vm2, %v5035_v62  ;;  %v5025_v24 = vmul.f32 %v8968_v56, %v5014_v3  ;;  %v5827_v56 = vld [vmem:[%s9167_s19 + $0x68] sm:$0xff] }
0x1e54   :  { %6801 = vmatprep.mubr.msk.f32.mxu1 %vm7158_vm4, %v7157_v53  ;;  %6809 = vmatpush3.msra.mxu0 %v5827_v56 }
0x1e55   :  { %v5036_v18 = vadd.f32 %v8973_v38, %v5025_v24  ;;  %v5826_v38 = vld [vmem:[%s9167_s19 + $0x60] sm:$0xff]  ;;  %6810 = vmatprep.subr.mxu0 %v7157_v53 }
0x1e56   :  { %6811 = vmatpush3.msra.mxu0 %v5826_v38 }
0x1e57   :  { %6802 = vmatmul.mubr.msk.f32.gmra.mxu1 %vm193_vm2, %v5036_v18  ;;  %6812 = vmatprep.subr.mxu0 %v7157_v53 }
0x1e58   :  { %6843 = vmatprep.mubr.msk.f32.mxu1 %vm7158_vm4, %v7157_v53  ;;  %6813 = vmatpush3.msra.mxu0 %v5825_v11 }
0x1e59   :  { %6814 = vmatprep.subr.mxu0 %v7157_v53 }
0x1e5a   :  { %6815 = vmatpush3.msra.mxu0 %v5824_v29 }
0x1e5b   :  { %6816 = vmatprep.subr.mxu0 %v7157_v53 }
0x1e5c   :  { %6817 = vmatpush3.msra.mxu0 %v5823_v12 }
0x1e5d   :  { %6818 = vmatprep.subr.mxu0 %v7157_v53 }
0x1e5e   :  { %6819 = vmatpush3.msra.mxu0 %v5822_v37 }
0x1ecf   :  { %v5191_v55 = vpop.xlane.xlu1 %5190 }
0x1ed0   :  { %v5204_v4 = vmul.f32 0.015625, %v5191_v55 }
0x1ed2   :  { %v5209_v41 = vadd.f32 1e-05, %v5204_v4  ;;  %v5167_v49 = vpop.xlane.xlu0 %5166 }
0x1ed3   :  { %v5176_v6 = vmul.f32 0.015625, %v5167_v49 }
0x1ed4   :  { %7115 = vrsqrt.f32 %v5209_v41 }
0x1ed5   :  { %v9064_v16 = vsub.f32 %v5142_v28, %v5176_v6 }
0x1ed6   :  { %v5194_v34 = vpop.xlane.xlu0 %5193 }
0x1ed7   :  { %v5205_v39 = vmul.f32 0.015625, %v5194_v34  ;;  %v5186_v50 = vmul.f32 %v9064_v16, %v9064_v16 }
0x1ed9   :  { %v5210_v10 = vadd.f32 1e-05, %v5205_v39  ;;  %v5195_v54 = vsel %vm88_vm0, %v5186_v50, 0.0 }
0x1eda   :  { %5196 = vadd.xlane.f32.xlu1 %v5195_v54 }
0x1edb   :  { %7117 = vrsqrt.f32 %v5210_v10 }
0x1ee1   :  { %v7116_v27 = vpop.eup %7115 }
0x1ee2   :  { %v5219_v21 = vmul.f32 %v7116_v27, %v9011_v5 }
0x1ee4   :  { %v5230_v20 = vmul.f32 %v9072_v47, %v5219_v21 }
0x1ee6   :  { %v5241_v61 = vadd.f32 %v9078_v63, %v5230_v20 }
0x1ee8   :  { %v7118_v19 = vpop.eup %7117  ;;  %v5251_v15 = vmin.f32 %v5241_v61, 0.0  ;;  %vm5246_vm15 = vcmp.gt.f32.partialorder %v5241_v61, 0.0 }
0x1ee9   :  { %v5220_v59 = vmul.f32 %v7118_v19, %v9017_v30  ;;  %v5401_v30 = vld [vmem:[%s9185_s15 + $0x10] sm:$0xff] }
0x1eea   :  { %v5256_v48 = vmul.f32 1.442695, %v5251_v15  ;;  %6838 = vmatpush3.msra.mxu1 %v5401_v30 }
0x1eeb   :  { %v5231_v22 = vmul.f32 %v9072_v47, %v5220_v59  ;;  %6839 = vmatprep.subr.mxu1 %v7157_v53 }
0x1eec   :  { %7119 = vpow2.f32 %v5256_v48 }
0x1eed   :  { %v5242_v8 = vadd.f32 %v9078_v63, %v5231_v22 }
0x1eef   :  { %v5252_v2 = vmin.f32 %v5242_v8, 0.0  ;;  %vm5247_vm1 = vcmp.gt.f32.partialorder %v5242_v8, 0.0 }
0x1ef1   :  { %v5258_v40 = vmul.f32 1.442695, %v5252_v2 }
0x1ef3   :  { %7121 = vpow2.f32 %v5258_v40 }
0x1ef9   :  { %v7120_v32 = vpop.eup %7119 }
0x1efa   :  { %v5817_v35 = vadd.f32 -1.0, %v7120_v32 }
0x1efc   :  { %v5271_v0 = vsel %vm5246_vm15, %v5241_v61, %v5817_v35 }
0x1efd   :  { %6821 = vmatmul.mubr.msk.f32.vlgmr.msra.gmra.mxu0 %vm88_vm0, %v5271_v0 }
0x1efe   :  { %6823 = vmatprep.mubr.msk.f32.mxu0 %vm7158_vm4, %v7157_v53 }
0x1f00   :  { %v7122_v42 = vpop.eup %7121 }
0x1f01   :  { %v5818_v33 = vadd.f32 -1.0, %v7122_v42 }
0x1f03   :  { %v5272_v1 = vsel %vm5247_vm1, %v5242_v8, %v5818_v33 }
0x1f04   :  { %6824 = vmatmul.mubr.msk.f32.gmra.mxu0 %vm88_vm0, %v5272_v1 }
0x1f05   :  { %6826 = vmatprep.mubr.msk.f32.mxu0 %vm7158_vm4, %v7157_v53 }
0x1f13   :  { %v5146_v26 = vpop.f32.mrf.mxu1 }
0x1f14   :  { %v5147_v5 = vadd.f32 %v9003_v9, %v5146_v26 }
0x1f15   :  { %v6800_v57 = vpop.f32.mrf.mxu1 }
0x1f16   :  { %v5168_v36 = vsel %vm88_vm0, %v5147_v5, 0.0 }
0x1f17   :  { %5169 = vadd.xlane.f32.xlu0 %v5168_v36  ;;  %v5151_v7 = vpop.f32.mrf.mxu1 }
0x1f18   :  { %v5152_v51 = vadd.f32 %v9003_v9, %v5151_v7  ;;  %v5400_v9 = vld [vmem:[%s9185_s15 + $0x8] sm:$0xff] }
0x1f19   :  { %v6803_v46 = vpop.f32.mrf.mxu1  ;;  %6840 = vmatpush3.msra.mxu1 %v5400_v9 }
0x1f1a   :  { %v5171_v28 = vsel %vm2567_vm11, %v5152_v51, 0.0  ;;  %6841 = vmatprep.subr.mxu1 %v7157_v53 }
0x1f1b   :  { %5172 = vadd.xlane.f32.xlu1 %v5171_v28  ;;  %6842 = vmatpush3.msra.mxu1 %v5399_v17 }
0x1f1c   :  { %6846 = vmatprep.subr.mxu1 %v7157_v53 }
0x1f63   :  { %v5197_v14 = vpop.xlane.xlu1 %5196 }
0x1f64   :  { %v5206_v13 = vmul.f32 0.015625, %v5197_v14 }
0x1f66   :  { %v5211_v58 = vadd.f32 1e-05, %v5206_v13 }
0x1f68   :  { %7123 = vrsqrt.f32 %v5211_v58 }
0x1f75   :  { %v7124_v23 = vpop.eup %7123 }
0x1f76   :  { %v5221_v60 = vmul.f32 %v7124_v23, %v9064_v16  ;;  %v5836_v16 = vld [vmem:[%s9168_s20 + $0x1] ss:$0 sm:$0xff] }
0x1f78   :  { %v5232_v44 = vmul.f32 %v9072_v47, %v5221_v60 }
0x1f7a   :  { %v5243_v3 = vadd.f32 %v9078_v63, %v5232_v44 }
0x1f7c   :  { %v5253_v62 = vmin.f32 %v5243_v3, 0.0  ;;  %vm5248_vm3 = vcmp.gt.f32.partialorder %v5243_v3, 0.0 }
0x1f7e   :  { %v5260_v24 = vmul.f32 1.442695, %v5253_v62 }
0x1f80   :  { %7125 = vpow2.f32 %v5260_v24 }
0x1f8d   :  { %v7126_v18 = vpop.eup %7125 }
0x1f8e   :  { %v5819_v31 = vadd.f32 -1.0, %v7126_v18 }
0x1f90   :  { %v5273_v52 = vsel %vm5248_vm3, %v5243_v3, %v5819_v31 }
0x1f91   :  { %6827 = vmatmul.mubr.msk.f32.gmra.mxu0 %vm88_vm0, %v5273_v52 }
0x1f92   :  { %6829 = vmatprep.mubr.msk.f32.mxu0 %vm7158_vm4, %v7157_v53 }
0x1fa0   :  { %v5170_v56 = vpop.xlane.xlu0 %5169 }
0x1fa1   :  { %v5177_v38 = vmul.f32 0.015625, %v5170_v56 }
0x1fa3   :  { %v5182_v11 = vsub.f32 %v5147_v5, %v5177_v38 }
0x1fa4   :  { %v5173_v29 = vpop.xlane.xlu1 %5172 }
0x1fa5   :  { %v5178_v12 = vmul.f32 0.015625, %v5173_v29  ;;  %v5187_v37 = vmul.f32 %v5182_v11, %v5182_v11 }
0x1fa7   :  { %v5183_v55 = vsub.f32 %v5152_v51, %v5178_v12  ;;  %v5198_v4 = vsel %vm88_vm0, %v5187_v37, 0.0 }
0x1fa8   :  { %5199 = vadd.xlane.f32.xlu0 %v5198_v4 }
0x1fa9   :  { %v5188_v41 = vmul.f32 %v5183_v55, %v5183_v55 }
0x1fab   :  { %v5201_v49 = vsel %vm2567_vm11, %v5188_v41, 0.0 }
0x1fac   :  { %5202 = vadd.xlane.f32.xlu1 %v5201_v49 }
0x1fbd   :  { %v5366_v6 = vpop.f32.mrf.mxu0 }
0x1fbe   :  { %v5387_v34 = vadd.f32 %v5366_v6, %v8919_v43 }
0x1fbf   :  { %v6822_v39 = vpop.f32.mrf.mxu0 }
0x1fc0   :  { %v5397_v50 = vadd.f32 %v5836_v16, %v5387_v34 }
0x1fc2   :  { %6844 = vmatmul.mubr.msk.f32.vlgmr.msra.gmra.mxu1 %vm193_vm2, %v5397_v50 }
0x1fc3   :  { %6847 = vmatpush3.msra.mxu1 %v5402_v45  ;;  %6854 = vmatprep.mubr.msk.f32.mxu1 %vm7158_vm4, %v7157_v53 }
0x1fc4   :  { %v5371_v10 = vpop.f32.mrf.mxu0  ;;  %6848 = vmatprep.subr.mxu1 %v7157_v53 }
0x1fc5   :  { %6849 = vmatpush3.msra.mxu1 %v5401_v30 }
0x1fc6   :  { %v6825_v54 = vpop.f32.mrf.mxu0  ;;  %6850 = vmatprep.subr.mxu1 %v7157_v53 }
0x1fc7   :  { %6851 = vmatpush3.msra.mxu1 %v5400_v9 }
0x1fc8   :  { %6852 = vmatprep.subr.mxu1 %v7157_v53 }
0x1fc9   :  { %6853 = vmatpush3.msra.mxu1 %v5399_v17  ;;  %v5482_v17 = vld [vmem:[%s9154_s6] sm:$0x1] }
0x2031   :  { %v5200_v43 = vpop.xlane.xlu0 %5199 }
0x2032   :  { %v5207_v27 = vmul.f32 0.015625, %v5200_v43 }
0x2034   :  { %v5212_v21 = vadd.f32 1e-05, %v5207_v27 }
0x2035   :  { %v5203_v20 = vpop.xlane.xlu1 %5202 }
0x2036   :  { %7127 = vrsqrt.f32 %v5212_v21  ;;  %v5208_v61 = vmul.f32 0.015625, %v5203_v20 }
0x2038   :  { %v5213_v19 = vadd.f32 1e-05, %v5208_v61 }
0x203a   :  { %7129 = vrsqrt.f32 %v5213_v19 }
0x2043   :  { %v7128_v15 = vpop.eup %7127 }
0x2044   :  { %v5222_v59 = vmul.f32 %v7128_v15, %v5182_v11 }
0x2046   :  { %v5233_v48 = vmul.f32 %v9072_v47, %v5222_v59 }
0x2047   :  { %v7130_v22 = vpop.eup %7129 }
0x2048   :  { %v5244_v8 = vadd.f32 %v9078_v63, %v5233_v48  ;;  %v5223_v2 = vmul.f32 %v7130_v22, %v5183_v55 }
0x204a   :  { %v5254_v40 = vmin.f32 %v5244_v8, 0.0  ;;  %v5234_v32 = vmul.f32 %v9072_v47, %v5223_v2  ;;  %vm5249_vm5 = vcmp.gt.f32.partialorder %v5244_v8, 0.0 }
0x204c   :  { %v5262_v35 = vmul.f32 1.442695, %v5254_v40  ;;  %v5245_v0 = vadd.f32 %v9078_v63, %v5234_v32 }
0x204e   :  { %7131 = vpow2.f32 %v5262_v35  ;;  %v5255_v42 = vmin.f32 %v5245_v0, 0.0  ;;  %vm5250_vm6 = vcmp.gt.f32.partialorder %v5245_v0, 0.0 }
0x2050   :  { %v5264_v33 = vmul.f32 1.442695, %v5255_v42 }
0x2051   :  { %v5375_v1 = vpop.f32.mrf.mxu0 }
0x2052   :  { %v5388_v26 = vadd.f32 %v5375_v1, %v8936_v25  ;;  %7133 = vpow2.f32 %v5264_v33  ;;  %v5403_v25 = vld [vmem:[%s9154_s6] sm:$0x1] }
0x2053   :  { %v6828_v5 = vpop.f32.mrf.mxu0 }
0x2054   :  { %v5398_v57 = vadd.f32 %v5836_v16, %v5388_v26 }
0x2056   :  { %v5484_v36 = vrot.slane %v5398_v57, 1 }
0x2058   :  { %6855 = vmatmul.mubr.msk.f32.vlgmr.msra.gmra.mxu1 %vm193_vm2, %v5484_v36 }
0x205b   :  { %v7132_v7 = vpop.eup %7131 }
0x205c   :  { %v5820_v51 = vadd.f32 -1.0, %v7132_v7 }
0x205e   :  { %v5274_v46 = vsel %vm5249_vm5, %v5244_v8, %v5820_v51 }
0x205f   :  { %v7134_v47 = vpop.eup %7133  ;;  %6830 = vmatmul.mubr.msk.f32.gmra.mxu0 %vm88_vm0, %v5274_v46 }
0x2060   :  { %6832 = vmatprep.mubr.msk.f32.mxu0 %vm7158_vm4, %v7157_v53  ;;  %v5821_v63 = vadd.f32 -1.0, %v7134_v47 }
0x2062   :  { %v5275_v28 = vsel %vm5250_vm6, %v5245_v0, %v5821_v63 }
0x2063   :  { %6833 = vmatmul.mubr.msk.f32.gmra.mxu0 %vm88_vm0, %v5275_v28 }
0x2082   :  { %v5473_v45 = vpop.f32.mrf.mxu1 }
0x2083   :  { %v5474_v30 = vadd.f32 %v5473_v45, %v5403_v25 }
0x2084   :  { %v6845_v9 = vpop.f32.mrf.mxu1 }
0x2085   :  { %5477 = vst [vmem:[#allocation3] sm:$0x1] %v5474_v30 }
0x2118   :  { %v5553_v53 = vpop.f32.mrf.mxu1 }
0x2119   :  { %v5554_v14 = vadd.f32 %v5553_v53, %v5482_v17 }
0x211a   :  { %v6856_v13 = vpop.f32.mrf.mxu1 }
0x211b   :  { %5557 = vst [vmem:[#allocation3 + $0x1] sm:$0x1] %v5554_v14 }
0x211c   :  { %7146 = shalt.err (!%p7143_p4)
}
0x211d   :  { %5567 = dma.vmem_to_hbm [thread:$0]  %s5565_s7, 32, %s9169_s21, [#allocation4]  }
0x211f   :  { %v5380_v58 = vpop.f32.mrf.mxu0 }
0x2121   :  { %v6831_v23 = vpop.f32.mrf.mxu0 }
0x2123   :  { %v5384_v60 = vpop.f32.mrf.mxu0 }
0x2125   :  { %v6834_v44 = vpop.f32.mrf.mxu0 }
0x2126   :  { %7155 = dma.done.wait [#allocation4], 32  }
0x2127   :  { %7156 = vsyncadd [#allocation4], 4294967264 }
0x2128   :  { %5571 = vsyncpa [#allocation4], 1 }

</bundles_post_ra>
